<compile_context>
chip_gen: v7x
topology: tpu7x:2x2x1
jax: 0.10.0
libtpu: 0.0.40
codegen_flags: <defaults>
</compile_context>

<pallas_src>
import jax
import jax.numpy as jnp
from jax import lax
from jax.experimental import pallas as pl
from jax.experimental.pallas import tpu as pltpu

KSIZE = 3
STRIDE = 1            # kernels assume config.stride == 1
PAD = KSIZE // 2
BN_EPS = 1e-5


# ----------------------------- Pallas kernels ------------------------------

def conv_stage_kernel(p1_ref, w1_ref, b1_ref, w2_ref, b2_ref, feat_ref,
                      y1p_ref, pool_ref):
    """conv1(+BN)+ReLU -> conv2(+BN) -> ReLU -> 2x2 maxpool for ONE image.

    p1_ref  : (1, H*W, 9*Cin)      im2col patches of the padded input
    w1_ref  : (9*Cin, C1)          conv1 weights, BN folded, im2col layout
    b1_ref  : (1, C1)              conv1 bias, BN folded
    w2_ref  : (9, C1, C2)          conv2 weights, BN folded, one (C1,C2) per tap
    b2_ref  : (1, C2)              conv2 bias, BN folded
    feat_ref: (1, (H//2)*(W//2), C2)  pooled features, NHWC-flattened rows
    y1p_ref : VMEM (H+2, W+2, C1)  zero-padded conv1 output (scratch)
    pool_ref: VMEM (H//2, W, C2)   staging buffer for the width pooling (scratch)
    """
    Hp, Wp, C1 = y1p_ref.shape
    H, W = Hp - 2 * PAD, Wp - 2 * PAD
    C2 = w2_ref.shape[2]

    # ---- conv1 + folded BN + ReLU: one im2col matmul over the whole image ----
    y1 = jnp.dot(p1_ref[0], w1_ref[...], preferred_element_type=jnp.float32)
    y1 = jnp.maximum(y1 + b1_ref[...], 0.0)                       # (H*W, C1)

    # ---- place conv1 output into a zero-padded VMEM scratch for conv2 ----
    y1p_ref[...] = jnp.zeros_like(y1p_ref)
    y1p_ref[pl.ds(PAD, H), pl.ds(PAD, W), :] = y1.reshape(H, W, C1)

    # ---- conv2 + folded BN: 9 accumulating whole-image matmuls ----
    taps = [(kh, kw) for kh in range(KSIZE) for kw in range(KSIZE)]

    def tap_matmul(t):
        kh, kw = taps[t]
        part = y1p_ref[pl.ds(kh, H), pl.ds(kw, W), :].reshape(H * W, C1)
        return jnp.dot(part, w2_ref[t], preferred_element_type=jnp.float32)

    y2 = tap_matmul(0)
    for t in range(1, len(taps)):
        y2 = y2 + tap_matmul(t)
    y2 = y2 + b2_ref[...]                                          # (H*W, C2)

    # ---- 2x2 max pool (ReLU commutes with max -> applied once at the end) ----
    y2 = y2.reshape(H // 2, 2, W, C2)                              # free reshape
    hp = jnp.maximum(y2[:, 0], y2[:, 1])                           # pool over h
    pool_ref[...] = hp                                             # (H//2, W, C2)
    pooled = jnp.maximum(pool_ref[:, pl.ds(0, W // 2, 2), :],
                         pool_ref[:, pl.ds(1, W // 2, 2), :])      # pool over w
    pooled = jnp.maximum(pooled, 0.0)                              # ReLU

    # ---- flatten in NHWC order (fc1 rows were permuted offline to match) ----
    feat_ref[0] = pooled.reshape((H // 2) * (W // 2), C2)


def mlp_kernel(x_ref, w1_ref, b1_ref, w15_ref, b15_ref, w2_ref, b2_ref, o_ref):
    """fc1 -> (dropout=identity) -> ReLU -> fc15 -> fc2 over the whole batch."""
    h = jnp.dot(x_ref[...], w1_ref[...],
                preferred_element_type=jnp.float32) + b1_ref[...]
    # TODO(synk): nn.Dropout(config.dropout1/dropout2) are identity at inference.
    h = jnp.maximum(h, 0.0)
    h = jnp.dot(h, w15_ref[...],
                preferred_element_type=jnp.float32) + b15_ref[...]
    o_ref[...] = jnp.dot(h, w2_ref[...],
                         preferred_element_type=jnp.float32) + b2_ref[...]


# ------------------------------- wrappers ----------------------------------

def conv_stage(patches1, w1f, b1f, w2f, b2f, H, W):
    N, HW, K1 = patches1.shape
    n_taps, C1, C2 = w2f.shape
    Ho, Wo = H // 2, W // 2
    return pl.pallas_call(
        conv_stage_kernel,
        out_shape=jax.ShapeDtypeStruct((N, Ho * Wo, C2), jnp.float32),
        grid=(N,),
        in_specs=[
            pl.BlockSpec((1, HW, K1), lambda n: (n, 0, 0)),
            pl.BlockSpec((K1, C1), lambda n: (0, 0)),
            pl.BlockSpec((1, C1), lambda n: (0, 0)),
            pl.BlockSpec((n_taps, C1, C2), lambda n: (0, 0, 0)),
            pl.BlockSpec((1, C2), lambda n: (0, 0)),
        ],
        out_specs=pl.BlockSpec((1, Ho * Wo, C2), lambda n: (n, 0, 0)),
        scratch_shapes=[
            pltpu.VMEM((H + 2 * PAD, W + 2 * PAD, C1), jnp.float32),
            pltpu.VMEM((Ho, W, C2), jnp.float32),
        ],
        compiler_params=pltpu.CompilerParams(
            dimension_semantics=("parallel",)),
    )(patches1, w1f, b1f, w2f, b2f)


def mlp(x, w1, b1, w15, b15, w2, b2):
    N = x.shape[0]
    classes = w2.shape[-1]
    return pl.pallas_call(
        mlp_kernel,
        out_shape=jax.ShapeDtypeStruct((N, classes), jnp.float32),
    )(x, w1, b1, w15, b15, w2, b2)


def prepare_kernel_params(p, H, W):
    """One-time folding / relayout of module params into kernel layout."""
    kh, kw, cin, c1 = p["w1"].shape
    _, _, _, c2 = p["w2"].shape
    Ho, Wo = H // 2, W // 2
    q = {}
    # fold eval-mode BatchNorm into conv weights / biases; im2col weight layouts
    q["w1"] = (p["w1"] * p["scale1"]).reshape(kh * kw * cin, c1)      # (36, 32)
    q["b1"] = p["b1"] * p["scale1"] + p["shift1"]
    q["w2"] = (p["w2"] * p["scale2"]).reshape(kh * kw, c1, c2)        # (9, 32, 64)
    q["b2"] = p["b2"] * p["scale2"] + p["shift2"]
    # permute fc1 rows from PyTorch NCHW flatten (c,h,w) to NHWC flatten (h,w,c)
    nfc = p["wfc1"].shape[1]
    q["wfc1"] = (p["wfc1"].reshape(c2, Ho, Wo, nfc)
                 .transpose(1, 2, 0, 3).reshape(c2 * Ho * Wo, nfc))
    q["bfc1"] = p["bfc1"]
    q["wfc15"], q["bfc15"] = p["wfc15"], p["bfc15"]
    q["wfc2"], q["bfc2"] = p["wfc2"], p["bfc2"]
    return q


def net_forward(x_nchw, q):
    """Forward pass using kernel-layout params q (see prepare_kernel_params)."""
    N, Cin, H, W = x_nchw.shape
    x = jnp.transpose(x_nchw, (0, 2, 3, 1)).astype(jnp.float32)       # NCHW -> NHWC
    xp = jnp.pad(x, ((0, 0), (PAD, PAD), (PAD, PAD), (0, 0)))
    # im2col for conv1 (single XLA op on the tiny padded input)
    patches1 = jnp.concatenate(
        [xp[:, kh:kh + H, kw:kw + W, :]
         for kh in range(KSIZE) for kw in range(KSIZE)],
        axis=-1).reshape(N, H * W, KSIZE * KSIZE * Cin)               # (N, 256, 36)

    feat = conv_stage(patches1, q["w1"], q["b1"], q["w2"], q["b2"], H, W)
    flat = feat.reshape(N, -1)         # contiguous NHWC flatten: metadata-only
    return mlp(flat, q["wfc1"], q["bfc1"], q["wfc15"], q["bfc15"],
               q["wfc2"], q["bfc2"])


# ------------------------- params & pure-JAX reference ---------------------

def _fold_bn(gamma, beta, mean, var):
    scale = gamma / jnp.sqrt(var + BN_EPS)
    shift = beta - mean * scale
    return scale, shift


def make_params(key, cin, c1, c2, fc_in, classes):
    ks = jax.random.split(key, 18)
    n = lambda k, s, sc: sc * jax.random.normal(k, s, jnp.float32)
    p = {}
    p["w1"] = n(ks[0], (KSIZE, KSIZE, cin, c1), 0.1)
    p["b1"] = n(ks[1], (1, c1), 0.1)
    p["scale1"], p["shift1"] = _fold_bn(
        1.0 + 0.1 * jax.random.normal(ks[2], (1, c1)),
        0.1 * jax.random.normal(ks[3], (1, c1)),
        0.1 * jax.random.normal(ks[4], (1, c1)),
        jax.random.uniform(ks[5], (1, c1), minval=0.5, maxval=1.5))
    p["w2"] = n(ks[6], (KSIZE, KSIZE, c1, c2), 0.1)
    p["b2"] = n(ks[7], (1, c2), 0.1)
    p["scale2"], p["shift2"] = _fold_bn(
        1.0 + 0.1 * jax.random.normal(ks[8], (1, c2)),
        0.1 * jax.random.normal(ks[9], (1, c2)),
        0.1 * jax.random.normal(ks[10], (1, c2)),
        jax.random.uniform(ks[11], (1, c2), minval=0.5, maxval=1.5))
    p["wfc1"] = n(ks[12], (fc_in, 128), 0.02)
    p["bfc1"] = n(ks[13], (1, 128), 0.02)
    p["wfc15"] = n(ks[14], (128, 64), 0.05)
    p["bfc15"] = n(ks[15], (1, 64), 0.05)
    p["wfc2"] = n(ks[16], (64, classes), 0.05)
    p["bfc2"] = n(ks[17], (1, classes), 0.05)
    return p


def reference_forward(x_nchw, p):
    """Pure-JAX reference, faithful to the module (unfolded BN, NCHW flatten)."""
    x = jnp.transpose(x_nchw, (0, 2, 3, 1)).astype(jnp.float32)

    def conv(a, w):
        return lax.conv_general_dilated(
            a, w, window_strides=(STRIDE, STRIDE),
            padding=[(PAD, PAD), (PAD, PAD)],
            dimension_numbers=("NHWC", "HWIO", "NHWC"))

    y = jnp.maximum((conv(x, p["w1"]) + p["b1"]) * p["scale1"] + p["shift1"], 0.0)
    y = jnp.maximum((conv(y, p["w2"]) + p["b2"]) * p["scale2"] + p["shift2"], 0.0)
    N, H, W, C = y.shape
    y = y.reshape(N, H // 2, 2, W // 2, 2, C).max(axis=(2, 4))
    flat = jnp.transpose(y, (0, 3, 1, 2)).reshape(N, -1)   # PyTorch NCHW flatten
    h = jnp.maximum(jnp.dot(flat, p["wfc1"]) + p["bfc1"], 0.0)
    h = jnp.dot(h, p["wfc15"]) + p["bfc15"]
    return jnp.dot(h, p["wfc2"]) + p["bfc2"]


# --------------------------------- main -------------------------------------

if __name__ == "__main__":
    N, CIN, H, W = 2, 4, 16, 16        # x is NCHW, myobj.size = [4, 16, 16]
    C1, C2, CLASSES = 32, 64, 10
    FC_IN = C2 * (H // 2) * (W // 2)   # int(c2 * p3 * q3) = 4096

    key = jax.random.PRNGKey(0)
    kx, kp = jax.random.split(key)
    x = jax.random.normal(kx, (N, CIN, H, W), jnp.float32)
    params = make_params(kp, CIN, C1, C2, FC_IN, CLASSES)
    kparams = prepare_kernel_params(params, H, W)   # offline BN fold / relayout

    out = jax.block_until_ready(jax.jit(net_forward)(x, kparams))
    ref = jax.block_until_ready(reference_forward(x, params))

    assert out.shape == (N, CLASSES), out.shape
    # both paths use default (bf16-pass) MXU precision with f32 accumulation
    if not jnp.allclose(out, ref, rtol=3e-2, atol=3e-2):
        raise AssertionError(
            f"mismatch vs reference, max abs err = {float(jnp.max(jnp.abs(out - ref)))}")
    print("KERNEL_OK")
</pallas_src>

<mosaic_0001>
module attributes {stable_mosaic.version = 11 : i64} {
  func.func @conv_stage_kernel(%arg0: i32, %arg1: memref<1x256x36xf32, #tpu.memory_space<vmem>>, %arg2: memref<36x32xf32, #tpu.memory_space<vmem>>, %arg3: memref<1x32xf32, #tpu.memory_space<vmem>>, %arg4: memref<9x32x64xf32, #tpu.memory_space<vmem>>, %arg5: memref<1x64xf32, #tpu.memory_space<vmem>>, %arg6: memref<1x64x64xf32, #tpu.memory_space<vmem>>, %arg7: memref<18x18x32xf32, #tpu.memory_space<vmem>>, %arg8: memref<8x16x64xf32, #tpu.memory_space<vmem>>) attributes {dimension_semantics = [#tpu.dimension_semantics<parallel>], iteration_bounds = array<i64: 2>, scalar_prefetch = 0 : i64, scratch_operands = 2 : i64, tpu.core_type = #tpu.core_type<tc>, window_params = [{transform_indices = @transform_0, window_bounds = array<i64: 1, 256, 36>}, {pipeline_mode = #tpu.pipeline_mode<synchronous>, transform_indices = @transform_1, window_bounds = array<i64: 36, 32>}, {pipeline_mode = #tpu.pipeline_mode<synchronous>, transform_indices = @transform_2, window_bounds = array<i64: 1, 32>}, {pipeline_mode = #tpu.pipeline_mode<synchronous>, transform_indices = @transform_3, window_bounds = array<i64: 9, 32, 64>}, {pipeline_mode = #tpu.pipeline_mode<synchronous>, transform_indices = @transform_4, window_bounds = array<i64: 1, 64>}, {transform_indices = @transform_5, window_bounds = array<i64: 1, 64, 64>}]} {
    %c0 = arith.constant 0 : index
    %c0_0 = arith.constant 0 : index
    %c0_1 = arith.constant 0 : index
    %0 = vector.load %arg1[%c0, %c0_0, %c0_1] : memref<1x256x36xf32, #tpu.memory_space<vmem>>, vector<1x256x36xf32>
    %1 = vector.shape_cast %0 : vector<1x256x36xf32> to vector<256x36xf32>
    %c0_2 = arith.constant 0 : index
    %c0_3 = arith.constant 0 : index
    %2 = vector.load %arg2[%c0_2, %c0_3] : memref<36x32xf32, #tpu.memory_space<vmem>>, vector<36x32xf32>
    %cst = arith.constant dense<0.000000e+00> : vector<256x32xf32>
    %3 = tpu.matmul %1, %2, %cst {dimension_numbers = #tpu.dot_dimension_numbers<[1], [0], [0], [1], [0, 0, 1, 1], [], []>} : vector<256x36xf32>, vector<36x32xf32>, vector<256x32xf32> -> vector<256x32xf32>
    %c0_4 = arith.constant 0 : index
    %c0_5 = arith.constant 0 : index
    %4 = vector.load %arg3[%c0_4, %c0_5] : memref<1x32xf32, #tpu.memory_space<vmem>>, vector<1x32xf32>
    %5 = vector.broadcast %4 : vector<1x32xf32> to vector<256x32xf32>
    %6 = arith.addf %3, %5 : vector<256x32xf32>
    %cst_6 = arith.constant 0.000000e+00 : f32
    %7 = vector.broadcast %cst_6 : f32 to vector<256x32xf32>
    %8 = arith.maximumf %6, %7 : vector<256x32xf32>
    %cst_7 = arith.constant 0.000000e+00 : f32
    %9 = vector.broadcast %cst_7 : f32 to vector<18x18x32xf32>
    %c0_8 = arith.constant 0 : index
    %c0_9 = arith.constant 0 : index
    %c0_10 = arith.constant 0 : index
    %10 = vector.load %arg7[%c0_8, %c0_9, %c0_10] : memref<18x18x32xf32, #tpu.memory_space<vmem>>, vector<18x18x32xf32>
    tpu.vector_store %arg7[%c0_8, %c0_9, %c0_10], %9 {strides = array<i32>} : memref<18x18x32xf32, #tpu.memory_space<vmem>>, vector<18x18x32xf32>,
    %11 = vector.shape_cast %8 : vector<256x32xf32> to vector<16x16x32xf32>
    %c1 = arith.constant 1 : index
    %c1_11 = arith.constant 1 : index
    %c0_12 = arith.constant 0 : index
    %12 = vector.load %arg7[%c1, %c1_11, %c0_12] : memref<18x18x32xf32, #tpu.memory_space<vmem>>, vector<16x16x32xf32>
    tpu.vector_store %arg7[%c1, %c1_11, %c0_12], %11 {strides = array<i32>} : memref<18x18x32xf32, #tpu.memory_space<vmem>>, vector<16x16x32xf32>,
    %c0_13 = arith.constant 0 : index
    %c0_14 = arith.constant 0 : index
    %c0_15 = arith.constant 0 : index
    %13 = vector.load %arg7[%c0_13, %c0_14, %c0_15] : memref<18x18x32xf32, #tpu.memory_space<vmem>>, vector<16x16x32xf32>
    %14 = vector.shape_cast %13 : vector<16x16x32xf32> to vector<256x32xf32>
    %c0_16 = arith.constant 0 : index
    %c0_17 = arith.constant 0 : index
    %c0_18 = arith.constant 0 : index
    %15 = vector.load %arg4[%c0_16, %c0_17, %c0_18] : memref<9x32x64xf32, #tpu.memory_space<vmem>>, vector<1x32x64xf32>
    %16 = vector.shape_cast %15 : vector<1x32x64xf32> to vector<32x64xf32>
    %cst_19 = arith.constant dense<0.000000e+00> : vector<256x64xf32>
    %17 = tpu.matmul %14, %16, %cst_19 {dimension_numbers = #tpu.dot_dimension_numbers<[1], [0], [0], [1], [0, 0, 1, 1], [], []>} : vector<256x32xf32>, vector<32x64xf32>, vector<256x64xf32> -> vector<256x64xf32>
    %c0_20 = arith.constant 0 : index
    %c1_21 = arith.constant 1 : index
    %c0_22 = arith.constant 0 : index
    %18 = vector.load %arg7[%c0_20, %c1_21, %c0_22] : memref<18x18x32xf32, #tpu.memory_space<vmem>>, vector<16x16x32xf32>
    %19 = vector.shape_cast %18 : vector<16x16x32xf32> to vector<256x32xf32>
    %c1_23 = arith.constant 1 : index
    %c0_24 = arith.constant 0 : index
    %c0_25 = arith.constant 0 : index
    %20 = vector.load %arg4[%c1_23, %c0_24, %c0_25] : memref<9x32x64xf32, #tpu.memory_space<vmem>>, vector<1x32x64xf32>
    %21 = vector.shape_cast %20 : vector<1x32x64xf32> to vector<32x64xf32>
    %cst_26 = arith.constant dense<0.000000e+00> : vector<256x64xf32>
    %22 = tpu.matmul %19, %21, %cst_26 {dimension_numbers = #tpu.dot_dimension_numbers<[1], [0], [0], [1], [0, 0, 1, 1], [], []>} : vector<256x32xf32>, vector<32x64xf32>, vector<256x64xf32> -> vector<256x64xf32>
    %23 = arith.addf %17, %22 : vector<256x64xf32>
    %c0_27 = arith.constant 0 : index
    %c2 = arith.constant 2 : index
    %c0_28 = arith.constant 0 : index
    %24 = vector.load %arg7[%c0_27, %c2, %c0_28] : memref<18x18x32xf32, #tpu.memory_space<vmem>>, vector<16x16x32xf32>
    %25 = vector.shape_cast %24 : vector<16x16x32xf32> to vector<256x32xf32>
    %c2_29 = arith.constant 2 : index
    %c0_30 = arith.constant 0 : index
    %c0_31 = arith.constant 0 : index
    %26 = vector.load %arg4[%c2_29, %c0_30, %c0_31] : memref<9x32x64xf32, #tpu.memory_space<vmem>>, vector<1x32x64xf32>
    %27 = vector.shape_cast %26 : vector<1x32x64xf32> to vector<32x64xf32>
    %cst_32 = arith.constant dense<0.000000e+00> : vector<256x64xf32>
    %28 = tpu.matmul %25, %27, %cst_32 {dimension_numbers = #tpu.dot_dimension_numbers<[1], [0], [0], [1], [0, 0, 1, 1], [], []>} : vector<256x32xf32>, vector<32x64xf32>, vector<256x64xf32> -> vector<256x64xf32>
    %29 = arith.addf %23, %28 : vector<256x64xf32>
    %c1_33 = arith.constant 1 : index
    %c0_34 = arith.constant 0 : index
    %c0_35 = arith.constant 0 : index
    %30 = vector.load %arg7[%c1_33, %c0_34, %c0_35] : memref<18x18x32xf32, #tpu.memory_space<vmem>>, vector<16x16x32xf32>
    %31 = vector.shape_cast %30 : vector<16x16x32xf32> to vector<256x32xf32>
    %c3 = arith.constant 3 : index
    %c0_36 = arith.constant 0 : index
    %c0_37 = arith.constant 0 : index
    %32 = vector.load %arg4[%c3, %c0_36, %c0_37] : memref<9x32x64xf32, #tpu.memory_space<vmem>>, vector<1x32x64xf32>
    %33 = vector.shape_cast %32 : vector<1x32x64xf32> to vector<32x64xf32>
    %cst_38 = arith.constant dense<0.000000e+00> : vector<256x64xf32>
    %34 = tpu.matmul %31, %33, %cst_38 {dimension_numbers = #tpu.dot_dimension_numbers<[1], [0], [0], [1], [0, 0, 1, 1], [], []>} : vector<256x32xf32>, vector<32x64xf32>, vector<256x64xf32> -> vector<256x64xf32>
    %35 = arith.addf %29, %34 : vector<256x64xf32>
    %c1_39 = arith.constant 1 : index
    %c1_40 = arith.constant 1 : index
    %c0_41 = arith.constant 0 : index
    %36 = vector.load %arg7[%c1_39, %c1_40, %c0_41] : memref<18x18x32xf32, #tpu.memory_space<vmem>>, vector<16x16x32xf32>
    %37 = vector.shape_cast %36 : vector<16x16x32xf32> to vector<256x32xf32>
    %c4 = arith.constant 4 : index
    %c0_42 = arith.constant 0 : index
    %c0_43 = arith.constant 0 : index
    %38 = vector.load %arg4[%c4, %c0_42, %c0_43] : memref<9x32x64xf32, #tpu.memory_space<vmem>>, vector<1x32x64xf32>
    %39 = vector.shape_cast %38 : vector<1x32x64xf32> to vector<32x64xf32>
    %cst_44 = arith.constant dense<0.000000e+00> : vector<256x64xf32>
    %40 = tpu.matmul %37, %39, %cst_44 {dimension_numbers = #tpu.dot_dimension_numbers<[1], [0], [0], [1], [0, 0, 1, 1], [], []>} : vector<256x32xf32>, vector<32x64xf32>, vector<256x64xf32> -> vector<256x64xf32>
    %41 = arith.addf %35, %40 : vector<256x64xf32>
    %c1_45 = arith.constant 1 : index
    %c2_46 = arith.constant 2 : index
    %c0_47 = arith.constant 0 : index
    %42 = vector.load %arg7[%c1_45, %c2_46, %c0_47] : memref<18x18x32xf32, #tpu.memory_space<vmem>>, vector<16x16x32xf32>
    %43 = vector.shape_cast %42 : vector<16x16x32xf32> to vector<256x32xf32>
    %c5 = arith.constant 5 : index
    %c0_48 = arith.constant 0 : index
    %c0_49 = arith.constant 0 : index
    %44 = vector.load %arg4[%c5, %c0_48, %c0_49] : memref<9x32x64xf32, #tpu.memory_space<vmem>>, vector<1x32x64xf32>
    %45 = vector.shape_cast %44 : vector<1x32x64xf32> to vector<32x64xf32>
    %cst_50 = arith.constant dense<0.000000e+00> : vector<256x64xf32>
    %46 = tpu.matmul %43, %45, %cst_50 {dimension_numbers = #tpu.dot_dimension_numbers<[1], [0], [0], [1], [0, 0, 1, 1], [], []>} : vector<256x32xf32>, vector<32x64xf32>, vector<256x64xf32> -> vector<256x64xf32>
    %47 = arith.addf %41, %46 : vector<256x64xf32>
    %c2_51 = arith.constant 2 : index
    %c0_52 = arith.constant 0 : index
    %c0_53 = arith.constant 0 : index
    %48 = vector.load %arg7[%c2_51, %c0_52, %c0_53] : memref<18x18x32xf32, #tpu.memory_space<vmem>>, vector<16x16x32xf32>
    %49 = vector.shape_cast %48 : vector<16x16x32xf32> to vector<256x32xf32>
    %c6 = arith.constant 6 : index
    %c0_54 = arith.constant 0 : index
    %c0_55 = arith.constant 0 : index
    %50 = vector.load %arg4[%c6, %c0_54, %c0_55] : memref<9x32x64xf32, #tpu.memory_space<vmem>>, vector<1x32x64xf32>
    %51 = vector.shape_cast %50 : vector<1x32x64xf32> to vector<32x64xf32>
    %cst_56 = arith.constant dense<0.000000e+00> : vector<256x64xf32>
    %52 = tpu.matmul %49, %51, %cst_56 {dimension_numbers = #tpu.dot_dimension_numbers<[1], [0], [0], [1], [0, 0, 1, 1], [], []>} : vector<256x32xf32>, vector<32x64xf32>, vector<256x64xf32> -> vector<256x64xf32>
    %53 = arith.addf %47, %52 : vector<256x64xf32>
    %c2_57 = arith.constant 2 : index
    %c1_58 = arith.constant 1 : index
    %c0_59 = arith.constant 0 : index
    %54 = vector.load %arg7[%c2_57, %c1_58, %c0_59] : memref<18x18x32xf32, #tpu.memory_space<vmem>>, vector<16x16x32xf32>
    %55 = vector.shape_cast %54 : vector<16x16x32xf32> to vector<256x32xf32>
    %c7 = arith.constant 7 : index
    %c0_60 = arith.constant 0 : index
    %c0_61 = arith.constant 0 : index
    %56 = vector.load %arg4[%c7, %c0_60, %c0_61] : memref<9x32x64xf32, #tpu.memory_space<vmem>>, vector<1x32x64xf32>
    %57 = vector.shape_cast %56 : vector<1x32x64xf32> to vector<32x64xf32>
    %cst_62 = arith.constant dense<0.000000e+00> : vector<256x64xf32>
    %58 = tpu.matmul %55, %57, %cst_62 {dimension_numbers = #tpu.dot_dimension_numbers<[1], [0], [0], [1], [0, 0, 1, 1], [], []>} : vector<256x32xf32>, vector<32x64xf32>, vector<256x64xf32> -> vector<256x64xf32>
    %59 = arith.addf %53, %58 : vector<256x64xf32>
    %c2_63 = arith.constant 2 : index
    %c2_64 = arith.constant 2 : index
    %c0_65 = arith.constant 0 : index
    %60 = vector.load %arg7[%c2_63, %c2_64, %c0_65] : memref<18x18x32xf32, #tpu.memory_space<vmem>>, vector<16x16x32xf32>
    %61 = vector.shape_cast %60 : vector<16x16x32xf32> to vector<256x32xf32>
    %c8 = arith.constant 8 : index
    %c0_66 = arith.constant 0 : index
    %c0_67 = arith.constant 0 : index
    %62 = vector.load %arg4[%c8, %c0_66, %c0_67] : memref<9x32x64xf32, #tpu.memory_space<vmem>>, vector<1x32x64xf32>
    %63 = vector.shape_cast %62 : vector<1x32x64xf32> to vector<32x64xf32>
    %cst_68 = arith.constant dense<0.000000e+00> : vector<256x64xf32>
    %64 = tpu.matmul %61, %63, %cst_68 {dimension_numbers = #tpu.dot_dimension_numbers<[1], [0], [0], [1], [0, 0, 1, 1], [], []>} : vector<256x32xf32>, vector<32x64xf32>, vector<256x64xf32> -> vector<256x64xf32>
    %65 = arith.addf %59, %64 : vector<256x64xf32>
    %c0_69 = arith.constant 0 : index
    %c0_70 = arith.constant 0 : index
    %66 = vector.load %arg5[%c0_69, %c0_70] : memref<1x64xf32, #tpu.memory_space<vmem>>, vector<1x64xf32>
    %67 = vector.broadcast %66 : vector<1x64xf32> to vector<256x64xf32>
    %68 = arith.addf %65, %67 : vector<256x64xf32>
    %69 = vector.shape_cast %68 : vector<256x64xf32> to vector<8x2x16x64xf32>
    %70 = vector.extract_strided_slice %69 {offsets = [0, 0, 0, 0], sizes = [8, 1, 16, 64], strides = [1, 1, 1, 1]} : vector<8x2x16x64xf32> to vector<8x1x16x64xf32>
    %71 = vector.shape_cast %70 : vector<8x1x16x64xf32> to vector<8x16x64xf32>
    %72 = vector.extract_strided_slice %69 {offsets = [0, 1, 0, 0], sizes = [8, 1, 16, 64], strides = [1, 1, 1, 1]} : vector<8x2x16x64xf32> to vector<8x1x16x64xf32>
    %73 = vector.shape_cast %72 : vector<8x1x16x64xf32> to vector<8x16x64xf32>
    %74 = arith.maximumf %71, %73 : vector<8x16x64xf32>
    %c0_71 = arith.constant 0 : index
    %c0_72 = arith.constant 0 : index
    %c0_73 = arith.constant 0 : index
    %75 = vector.load %arg8[%c0_71, %c0_72, %c0_73] : memref<8x16x64xf32, #tpu.memory_space<vmem>>, vector<8x16x64xf32>
    tpu.vector_store %arg8[%c0_71, %c0_72, %c0_73], %74 {strides = array<i32>} : memref<8x16x64xf32, #tpu.memory_space<vmem>>, vector<8x16x64xf32>,
    %c0_74 = arith.constant 0 : index
    %c0_75 = arith.constant 0 : index
    %c0_76 = arith.constant 0 : index
    %76 = tpu.strided_load %arg8[%c0_74, %c0_75, %c0_76] {strides = array<i32: 1, 2, 1>} : memref<8x16x64xf32, #tpu.memory_space<vmem>>, vector<8x8x64xf32>
    %c0_77 = arith.constant 0 : index
    %c1_78 = arith.constant 1 : index
    %c0_79 = arith.constant 0 : index
    %77 = tpu.strided_load %arg8[%c0_77, %c1_78, %c0_79] {strides = array<i32: 1, 2, 1>} : memref<8x16x64xf32, #tpu.memory_space<vmem>>, vector<8x8x64xf32>
    %78 = arith.maximumf %76, %77 : vector<8x8x64xf32>
    %cst_80 = arith.constant 0.000000e+00 : f32
    %79 = vector.broadcast %cst_80 : f32 to vector<8x8x64xf32>
    %80 = arith.maximumf %78, %79 : vector<8x8x64xf32>
    %81 = vector.shape_cast %80 : vector<8x8x64xf32> to vector<64x64xf32>
    %c0_81 = arith.constant 0 : index
    %c0_82 = arith.constant 0 : index
    %c0_83 = arith.constant 0 : index
    %82 = vector.load %arg6[%c0_81, %c0_82, %c0_83] : memref<1x64x64xf32, #tpu.memory_space<vmem>>, vector<1x64x64xf32>
    %83 = vector.shape_cast %82 : vector<1x64x64xf32> to vector<64x64xf32>
    %84 = vector.shape_cast %81 : vector<64x64xf32> to vector<1x64x64xf32>
    tpu.vector_store %arg6[%c0_81, %c0_82, %c0_83], %84 {strides = array<i32>} : memref<1x64x64xf32, #tpu.memory_space<vmem>>, vector<1x64x64xf32>,
    return
  }
  func.func @transform_0(%arg0: i32) -> (i32, i32, i32) {
    %c0_i32 = arith.constant 0 : i32
    %c0_i32_0 = arith.constant 0 : i32
    %c0_i32_1 = arith.constant 0 : i32
    return %arg0, %c0_i32, %c0_i32_0 : i32, i32, i32
  }
  func.func @transform_1(%arg0: i32) -> (i32, i32) {
    %c0_i32 = arith.constant 0 : i32
    %c0_i32_0 = arith.constant 0 : i32
    %c0_i32_1 = arith.constant 0 : i32
    return %c0_i32, %c0_i32_0 : i32, i32
  }
  func.func @transform_2(%arg0: i32) -> (i32, i32) {
    %c0_i32 = arith.constant 0 : i32
    %c0_i32_0 = arith.constant 0 : i32
    %c0_i32_1 = arith.constant 0 : i32
    return %c0_i32, %c0_i32_0 : i32, i32
  }
  func.func @transform_3(%arg0: i32) -> (i32, i32, i32) {
    %c0_i32 = arith.constant 0 : i32
    %c0_i32_0 = arith.constant 0 : i32
    %c0_i32_1 = arith.constant 0 : i32
    %c0_i32_2 = arith.constant 0 : i32
    return %c0_i32, %c0_i32_0, %c0_i32_1 : i32, i32, i32
  }
  func.func @transform_4(%arg0: i32) -> (i32, i32) {
    %c0_i32 = arith.constant 0 : i32
    %c0_i32_0 = arith.constant 0 : i32
    %c0_i32_1 = arith.constant 0 : i32
    return %c0_i32, %c0_i32_0 : i32, i32
  }
  func.func @transform_5(%arg0: i32) -> (i32, i32, i32) {
    %c0_i32 = arith.constant 0 : i32
    %c0_i32_0 = arith.constant 0 : i32
    %c0_i32_1 = arith.constant 0 : i32
    return %arg0, %c0_i32, %c0_i32_0 : i32, i32, i32
  }
}

module attributes {stable_mosaic.version = 11 : i64} {
  func.func @mlp_kernel(%arg0: memref<2x4096xf32, #tpu.memory_space<vmem>>, %arg1: memref<4096x128xf32, #tpu.memory_space<vmem>>, %arg2: memref<1x128xf32, #tpu.memory_space<vmem>>, %arg3: memref<128x64xf32, #tpu.memory_space<vmem>>, %arg4: memref<1x64xf32, #tpu.memory_space<vmem>>, %arg5: memref<64x10xf32, #tpu.memory_space<vmem>>, %arg6: memref<1x10xf32, #tpu.memory_space<vmem>>, %arg7: memref<2x10xf32, #tpu.memory_space<vmem>>) attributes {dimension_semantics = [], scalar_prefetch = 0 : i64, scratch_operands = 0 : i64, tpu.core_type = #tpu.core_type<tc>} {
    %c0 = arith.constant 0 : index
    %c0_0 = arith.constant 0 : index
    %0 = vector.load %arg0[%c0, %c0_0] : memref<2x4096xf32, #tpu.memory_space<vmem>>, vector<2x4096xf32>
    %c0_1 = arith.constant 0 : index
    %c0_2 = arith.constant 0 : index
    %1 = vector.load %arg1[%c0_1, %c0_2] : memref<4096x128xf32, #tpu.memory_space<vmem>>, vector<4096x128xf32>
    %cst = arith.constant dense<0.000000e+00> : vector<2x128xf32>
    %2 = tpu.matmul %0, %1, %cst {dimension_numbers = #tpu.dot_dimension_numbers<[1], [0], [0], [1], [0, 0, 1, 1], [], []>} : vector<2x4096xf32>, vector<4096x128xf32>, vector<2x128xf32> -> vector<2x128xf32>
    %c0_3 = arith.constant 0 : index
    %c0_4 = arith.constant 0 : index
    %3 = vector.load %arg2[%c0_3, %c0_4] : memref<1x128xf32, #tpu.memory_space<vmem>>, vector<1x128xf32>
    %4 = vector.broadcast %3 : vector<1x128xf32> to vector<2x128xf32>
    %5 = arith.addf %2, %4 : vector<2x128xf32>
    %cst_5 = arith.constant 0.000000e+00 : f32
    %6 = vector.broadcast %cst_5 : f32 to vector<2x128xf32>
    %7 = arith.maximumf %5, %6 : vector<2x128xf32>
    %c0_6 = arith.constant 0 : index
    %c0_7 = arith.constant 0 : index
    %8 = vector.load %arg3[%c0_6, %c0_7] : memref<128x64xf32, #tpu.memory_space<vmem>>, vector<128x64xf32>
    %cst_8 = arith.constant dense<0.000000e+00> : vector<2x64xf32>
    %9 = tpu.matmul %7, %8, %cst_8 {dimension_numbers = #tpu.dot_dimension_numbers<[1], [0], [0], [1], [0, 0, 1, 1], [], []>} : vector<2x128xf32>, vector<128x64xf32>, vector<2x64xf32> -> vector<2x64xf32>
    %c0_9 = arith.constant 0 : index
    %c0_10 = arith.constant 0 : index
    %10 = vector.load %arg4[%c0_9, %c0_10] : memref<1x64xf32, #tpu.memory_space<vmem>>, vector<1x64xf32>
    %11 = vector.broadcast %10 : vector<1x64xf32> to vector<2x64xf32>
    %12 = arith.addf %9, %11 : vector<2x64xf32>
    %c0_11 = arith.constant 0 : index
    %c0_12 = arith.constant 0 : index
    %13 = vector.load %arg5[%c0_11, %c0_12] : memref<64x10xf32, #tpu.memory_space<vmem>>, vector<64x10xf32>
    %cst_13 = arith.constant dense<0.000000e+00> : vector<2x10xf32>
    %14 = tpu.matmul %12, %13, %cst_13 {dimension_numbers = #tpu.dot_dimension_numbers<[1], [0], [0], [1], [0, 0, 1, 1], [], []>} : vector<2x64xf32>, vector<64x10xf32>, vector<2x10xf32> -> vector<2x10xf32>
    %c0_14 = arith.constant 0 : index
    %c0_15 = arith.constant 0 : index
    %15 = vector.load %arg6[%c0_14, %c0_15] : memref<1x10xf32, #tpu.memory_space<vmem>>, vector<1x10xf32>
    %16 = vector.broadcast %15 : vector<1x10xf32> to vector<2x10xf32>
    %17 = arith.addf %14, %16 : vector<2x10xf32>
    %c0_16 = arith.constant 0 : index
    %c0_17 = arith.constant 0 : index
    %18 = vector.load %arg7[%c0_16, %c0_17] : memref<2x10xf32, #tpu.memory_space<vmem>>, vector<2x10xf32>
    tpu.vector_store %arg7[%c0_16, %c0_17], %17 {strides = array<i32>} : memref<2x10xf32, #tpu.memory_space<vmem>>, vector<2x10xf32>,
    return
  }
}

</mosaic_0001>

<bundles_post_ra>
// kernel: net_forward.3
= control target key start
LH: loop header
LB: loop body
LE: loop exit
PB: predicated region body
PF: predicated region fallthrough
CT: control target
= control target key end

     0   :  { %v3278_v47 = vmov 1983009808   ;;  %v566_v49 = vlaneseq  ;;  %s5076_s0 = inlined_call_operand.vmem [shape: f32[2,4096], index: 0, kind: input, shape index: {}]   ;;  %s5077_s1 = inlined_call_operand.vmem [shape: f32[4096,128], index: 1, kind: input, shape index: {}]   ;;  %s5078_s2 = inlined_call_operand.vmem [shape: f32[1,128], index: 2, kind: input, shape index: {}]   ;;  %s5079_s3 = inlined_call_operand.vmem [shape: f32[128,64], index: 3, kind: input, shape index: {}]   ;;  %s5080_s4 = inlined_call_operand.vmem [shape: f32[1,64], index: 4, kind: input, shape index: {}]   ;;  %s5081_s5 = inlined_call_operand.vmem [shape: f32[64,10], index: 5, kind: input, shape index: {}]   ;;  %s5082_s6 = inlined_call_operand.vmem [shape: f32[1,10], index: 6, kind: input, shape index: {}]   ;;  %s5083_s7 = inlined_call_operand.hbm [shape: f32[2,10], index: 7, kind: output, shape index: {}]  }
   0x1   :  { %v51_v0 = vld [vmem:[%s5077_s1 + $0x80] sm:$0xff]  ;;  %v52_v1 = vld [vmem:[%s5077_s1 + $0x88] sm:$0xff]  ;;  %v53_v11 = vld [vmem:[%s5077_s1 + $0x90] sm:$0xff]  ;;  %v564_v48 = vunpack.c.l.s4 %v3278_v47 }
   0x2   :  { %v35_v2 = vld [vmem:[%s5077_s1] sm:$0xff]  ;;  %v2693_v3 = vpack.c.bf16 %v52_v1, %v51_v0  ;;  %v36_v4 = vld [vmem:[%s5077_s1 + $0x8] sm:$0xff]  ;;  %v54_v13 = vld [vmem:[%s5077_s1 + $0x98] sm:$0xff]  ;;  %v567_v0 = vshrl.u32 %v566_v49, 7 }
   0x3   :  { %v83_v5 = vld [vmem:[%s5077_s1 + $0x180] sm:$0xff]  ;;  %v84_v6 = vld [vmem:[%s5077_s1 + $0x188] sm:$0xff]  ;;  %v2695_v7 = vpack.c.bf16 %v36_v4, %v35_v2  ;;  %v37_v14 = vld [vmem:[%s5077_s1 + $0x10] sm:$0xff]  ;;  %v2697_v16 = vpack.c.bf16 %v54_v13, %v53_v11  ;;  %v565_v63 = vunpack.c.0.s8 %v564_v48 }
   0x4   :  { %v2725_v8 = vpack.c.bf16 %v84_v6, %v83_v5  ;;  %v67_v9 = vld [vmem:[%s5077_s1 + $0x100] sm:$0xff]  ;;  %v68_v10 = vld [vmem:[%s5077_s1 + $0x108] sm:$0xff]  ;;  %2694 = vmatprep.subr.bf16.mxu0 %v2693_v3  ;;  %v38_v15 = vld [vmem:[%s5077_s1 + $0x18] sm:$0xff] }
   0x5   :  { %v2727_v12 = vpack.c.bf16 %v68_v10, %v67_v9  ;;  %2696 = vmatpush3.bf16.msra.mxu0 %v2695_v7  ;;  %v2699_v17 = vpack.c.bf16 %v38_v15, %v37_v14  ;;  %v85_v18 = vld [vmem:[%s5077_s1 + $0x190] sm:$0xff]  ;;  %v86_v19 = vld [vmem:[%s5077_s1 + $0x198] sm:$0xff]  ;;  %v55_v23 = vld [vmem:[%s5077_s1 + $0xa0] sm:$0xff]  ;;  %v3473_v13 = vsub.s32 %v565_v63, %v567_v0 }
   0x6   :  { %2726 = vmatprep.subr.bf16.mxu1 %v2725_v8  ;;  %v69_v20 = vld [vmem:[%s5077_s1 + $0x110] sm:$0xff]  ;;  %v2729_v21 = vpack.c.bf16 %v86_v19, %v85_v18  ;;  %v70_v22 = vld [vmem:[%s5077_s1 + $0x118] sm:$0xff]  ;;  %v56_v24 = vld [vmem:[%s5077_s1 + $0xa8] sm:$0xff]  ;;  %2698 = vmatprep.subr.bf16.mxu0 %v2697_v16 }
   0x7   :  { %2728 = vmatpush3.bf16.msra.mxu1 %v2727_v12  ;;  %v2731_v25 = vpack.c.bf16 %v70_v22, %v69_v20  ;;  %v2701_v26 = vpack.c.bf16 %v56_v24, %v55_v23  ;;  %v39_v27 = vld [vmem:[%s5077_s1 + $0x20] sm:$0xff]  ;;  %v40_v28 = vld [vmem:[%s5077_s1 + $0x28] sm:$0xff]  ;;  %v57_v35 = vld [vmem:[%s5077_s1 + $0xb0] sm:$0xff] }
   0x8   :  { %v87_v29 = vld [vmem:[%s5077_s1 + $0x1a0] sm:$0xff]  ;;  %2730 = vmatprep.subr.bf16.mxu1 %v2729_v21  ;;  %v88_v30 = vld [vmem:[%s5077_s1 + $0x1a8] sm:$0xff]  ;;  %v2703_v33 = vpack.c.bf16 %v40_v28, %v39_v27  ;;  %v58_v36 = vld [vmem:[%s5077_s1 + $0xb8] sm:$0xff] }
   0x9   :  { %v71_v31 = vld [vmem:[%s5077_s1 + $0x120] sm:$0xff]  ;;  %v72_v32 = vld [vmem:[%s5077_s1 + $0x128] sm:$0xff]  ;;  %2700 = vmatpush3.bf16.msra.mxu0 %v2699_v17  ;;  %v2733_v34 = vpack.c.bf16 %v88_v30, %v87_v29  ;;  %v41_v37 = vld [vmem:[%s5077_s1 + $0x30] sm:$0xff]  ;;  %v2705_v39 = vpack.c.bf16 %v58_v36, %v57_v35 }
   0xa   :  { %2702 = vmatprep.subr.bf16.mxu0 %v2701_v26  ;;  %v2735_v38 = vpack.c.bf16 %v72_v32, %v71_v31  ;;  %v42_v40 = vld [vmem:[%s5077_s1 + $0x38] sm:$0xff]  ;;  %v89_v41 = vld [vmem:[%s5077_s1 + $0x1b0] sm:$0xff]  ;;  %v59_v46 = vld [vmem:[%s5077_s1 + $0xc0] sm:$0xff] }
   0xb   :  { %2732 = vmatpush3.bf16.msra.mxu1 %v2731_v25  ;;  %v90_v42 = vld [vmem:[%s5077_s1 + $0x1b8] sm:$0xff]  ;;  %v73_v44 = vld [vmem:[%s5077_s1 + $0x130] sm:$0xff]  ;;  %v60_v50 = vld [vmem:[%s5077_s1 + $0xc8] sm:$0xff]  ;;  %v2707_v51 = vpack.c.bf16 %v42_v40, %v41_v37 }
   0xc   :  { %2734 = vmatprep.subr.bf16.mxu1 %v2733_v34  ;;  %v2737_v43 = vpack.c.bf16 %v90_v42, %v89_v41  ;;  %v74_v45 = vld [vmem:[%s5077_s1 + $0x138] sm:$0xff]  ;;  %v91_v52 = vld [vmem:[%s5077_s1 + $0x1c0] sm:$0xff]  ;;  %v92_v53 = vld [vmem:[%s5077_s1 + $0x1c8] sm:$0xff]  ;;  %v2709_v55 = vpack.c.bf16 %v60_v50, %v59_v46 }
   0xd   :  { %2704 = vmatpush3.bf16.msra.mxu0 %v2703_v33  ;;  %v2739_v54 = vpack.c.bf16 %v74_v45, %v73_v44  ;;  %v43_v56 = vld [vmem:[%s5077_s1 + $0x40] sm:$0xff]  ;;  %v44_v57 = vld [vmem:[%s5077_s1 + $0x48] sm:$0xff]  ;;  %v2741_v59 = vpack.c.bf16 %v92_v53, %v91_v52  ;;  %v61_v61 = vld [vmem:[%s5077_s1 + $0xd0] sm:$0xff] }
   0xe   :  { %2706 = vmatprep.subr.bf16.mxu0 %v2705_v39  ;;  %v75_v58 = vld [vmem:[%s5077_s1 + $0x140] sm:$0xff]  ;;  %v76_v60 = vld [vmem:[%s5077_s1 + $0x148] sm:$0xff]  ;;  %v62_v62 = vld [vmem:[%s5077_s1 + $0xd8] sm:$0xff]  ;;  %v2711_v3 = vpack.c.bf16 %v44_v57, %v43_v56 }
   0xf   :  { %2736 = vmatpush3.bf16.msra.mxu1 %v2735_v38  ;;  %v93_v1 = vld [vmem:[%s5077_s1 + $0x1d0] sm:$0xff]  ;;  %v94_v2 = vld [vmem:[%s5077_s1 + $0x1d8] sm:$0xff]  ;;  %v2743_v4 = vpack.c.bf16 %v76_v60, %v75_v58  ;;  %v2713_v5 = vpack.c.bf16 %v62_v62, %v61_v61  ;;  %v63_v11 = vld [vmem:[%s5077_s1 + $0xe0] sm:$0xff] }
  0x10   :  { %2738 = vmatprep.subr.bf16.mxu1 %v2737_v43  ;;  %v45_v6 = vld [vmem:[%s5077_s1 + $0x50] sm:$0xff]  ;;  %v46_v7 = vld [vmem:[%s5077_s1 + $0x58] sm:$0xff]  ;;  %v2745_v9 = vpack.c.bf16 %v94_v2, %v93_v1  ;;  %v64_v12 = vld [vmem:[%s5077_s1 + $0xe8] sm:$0xff] }
  0x11   :  { %2708 = vmatpush3.bf16.msra.mxu0 %v2707_v51  ;;  %v77_v8 = vld [vmem:[%s5077_s1 + $0x150] sm:$0xff]  ;;  %v78_v10 = vld [vmem:[%s5077_s1 + $0x158] sm:$0xff]  ;;  %v95_v14 = vld [vmem:[%s5077_s1 + $0x1e0] sm:$0xff]  ;;  %v2715_v16 = vpack.c.bf16 %v46_v7, %v45_v6  ;;  %v2717_v19 = vpack.c.bf16 %v64_v12, %v63_v11 }
  0x12   :  { %2710 = vmatprep.subr.bf16.mxu0 %v2709_v55  ;;  %v96_v15 = vld [vmem:[%s5077_s1 + $0x1e8] sm:$0xff]  ;;  %v47_v17 = vld [vmem:[%s5077_s1 + $0x60] sm:$0xff]  ;;  %v2747_v18 = vpack.c.bf16 %v78_v10, %v77_v8  ;;  %v65_v25 = vld [vmem:[%s5077_s1 + $0xf0] sm:$0xff] }
  0x13   :  { %2740 = vmatpush3.bf16.msra.mxu1 %v2739_v54  ;;  %v48_v20 = vld [vmem:[%s5077_s1 + $0x68] sm:$0xff]  ;;  %v79_v21 = vld [vmem:[%s5077_s1 + $0x160] sm:$0xff]  ;;  %v2749_v23 = vpack.c.bf16 %v96_v15, %v95_v14  ;;  %v66_v26 = vld [vmem:[%s5077_s1 + $0xf8] sm:$0xff] }
  0x14   :  { %2742 = vmatprep.subr.bf16.mxu1 %v2741_v59  ;;  %v27_v22 = vld [vmem:[%s5076_s0] sm:$0xff]  ;;  %v80_v24 = vld [vmem:[%s5077_s1 + $0x168] sm:$0xff]  ;;  %v97_v29 = vld [vmem:[%s5077_s1 + $0x1f0] sm:$0xff]  ;;  %v2719_v31 = vpack.c.bf16 %v48_v20, %v47_v17  ;;  %v2721_v35 = vpack.c.bf16 %v66_v26, %v65_v25 }
  0x15   :  { %2712 = vmatpush3.bf16.msra.mxu0 %v2711_v3  ;;  %v569_v27 = vrot.slane %v27_v22, %v3473_v13  ;;  %v562_v28 = vcombine.high %v27_v22, %v27_v22  ;;  %v98_v30 = vld [vmem:[%s5077_s1 + $0x1f8] sm:$0xff]  ;;  %v2751_v34 = vpack.c.bf16 %v80_v24, %v79_v21  ;;  %v49_v36 = vld [vmem:[%s5077_s1 + $0x70] sm:$0xff]  ;;  %v115_v41 = vld [vmem:[%s5077_s1 + $0x280] sm:$0xff] }
  0x16   :  { %2714 = vmatprep.subr.bf16.mxu0 %v2713_v5  ;;  %v50_v37 = vld [vmem:[%s5077_s1 + $0x78] sm:$0xff]  ;;  %v81_v38 = vld [vmem:[%s5077_s1 + $0x170] sm:$0xff]  ;;  %v2753_v39 = vpack.c.bf16 %v98_v30, %v97_v29  ;;  %v116_v42 = vld [vmem:[%s5077_s1 + $0x288] sm:$0xff] }
  0x17   :  { %2744 = vmatpush3.bf16.msra.mxu1 %v2743_v4  ;;  %v577_v32 = vcombine.high %v569_v27, %v569_v27  ;;  %v576_v33 = vrot.slane %v562_v28, %v3473_v13  ;;  %v82_v40 = vld [vmem:[%s5077_s1 + $0x178] sm:$0xff]  ;;  %v147_v44 = vld [vmem:[%s5077_s1 + $0x380] sm:$0xff]  ;;  %v148_v45 = vld [vmem:[%s5077_s1 + $0x388] sm:$0xff]  ;;  %v2723_v46 = vpack.c.bf16 %v50_v37, %v49_v36  ;;  %v2757_v48 = vpack.c.bf16 %v116_v42, %v115_v41 }
  0x18   :  { %2746 = vmatprep.subr.bf16.mxu1 %v2745_v9  ;;  %v2755_v47 = vpack.c.bf16 %v82_v40, %v81_v38  ;;  %v99_v49 = vld [vmem:[%s5077_s1 + $0x200] sm:$0xff]  ;;  %v100_v50 = vld [vmem:[%s5077_s1 + $0x208] sm:$0xff]  ;;  %v2789_v52 = vpack.c.bf16 %v148_v45, %v147_v44  ;;  %v117_v54 = vld [vmem:[%s5077_s1 + $0x290] sm:$0xff] }
  0x19   :  { %2716 = vmatpush3.bf16.msra.mxu0 %v2715_v16  ;;  %794 = vmatprep.mubr.f32.mxu0 %v577_v32  ;;  %v578_v43 = vcombine.high %v576_v33, %v576_v33  ;;  %v131_v51 = vld [vmem:[%s5077_s1 + $0x300] sm:$0xff]  ;;  %v132_v53 = vld [vmem:[%s5077_s1 + $0x308] sm:$0xff]  ;;  %v118_v55 = vld [vmem:[%s5077_s1 + $0x298] sm:$0xff]  ;;  %v2759_v58 = vpack.c.bf16 %v100_v50, %v99_v49 }
  0x1a   :  { %2718 = vmatprep.subr.bf16.mxu0 %v2717_v19  ;;  %v149_v56 = vld [vmem:[%s5077_s1 + $0x390] sm:$0xff]  ;;  %v150_v57 = vld [vmem:[%s5077_s1 + $0x398] sm:$0xff]  ;;  %v2791_v59 = vpack.c.bf16 %v132_v53, %v131_v51  ;;  %v2761_v60 = vpack.c.bf16 %v118_v55, %v117_v54  ;;  %v119_v2 = vld [vmem:[%s5077_s1 + $0x2a0] sm:$0xff] }
  0x1b   :  { %2748 = vmatpush3.bf16.msra.mxu1 %v2747_v18  ;;  %864 = vmatprep.mubr.f32.mxu1 %v578_v43  ;;  %v101_v61 = vld [vmem:[%s5077_s1 + $0x210] sm:$0xff]  ;;  %v102_v62 = vld [vmem:[%s5077_s1 + $0x218] sm:$0xff]  ;;  %v2793_v0 = vpack.c.bf16 %v150_v57, %v149_v56  ;;  %v120_v3 = vld [vmem:[%s5077_s1 + $0x2a8] sm:$0xff] }
  0x1c   :  { %2750 = vmatprep.subr.bf16.mxu1 %v2749_v23  ;;  %v133_v63 = vld [vmem:[%s5077_s1 + $0x310] sm:$0xff]  ;;  %v134_v1 = vld [vmem:[%s5077_s1 + $0x318] sm:$0xff]  ;;  %v151_v4 = vld [vmem:[%s5077_s1 + $0x3a0] sm:$0xff]  ;;  %v2763_v6 = vpack.c.bf16 %v102_v62, %v101_v61  ;;  %v2765_v8 = vpack.c.bf16 %v120_v3, %v119_v2 }
  0x1d   :  { %2720 = vmatpush3.bf16.msra.mxu0 %v2719_v31  ;;  %v152_v5 = vld [vmem:[%s5077_s1 + $0x3a8] sm:$0xff]  ;;  %v2795_v7 = vpack.c.bf16 %v134_v1, %v133_v63  ;;  %v103_v9 = vld [vmem:[%s5077_s1 + $0x220] sm:$0xff]  ;;  %v121_v15 = vld [vmem:[%s5077_s1 + $0x2b0] sm:$0xff] }
  0x1e   :  { %2722 = vmatprep.subr.bf16.mxu0 %v2721_v35  ;;  %v104_v10 = vld [vmem:[%s5077_s1 + $0x228] sm:$0xff]  ;;  %v135_v11 = vld [vmem:[%s5077_s1 + $0x320] sm:$0xff]  ;;  %v2797_v12 = vpack.c.bf16 %v152_v5, %v151_v4  ;;  %v122_v16 = vld [vmem:[%s5077_s1 + $0x2b8] sm:$0xff] }
  0x1f   :  { %2752 = vmatpush3.bf16.msra.mxu1 %v2751_v34  ;;  %v136_v14 = vld [vmem:[%s5077_s1 + $0x328] sm:$0xff]  ;;  %v153_v17 = vld [vmem:[%s5077_s1 + $0x3b0] sm:$0xff]  ;;  %v154_v18 = vld [vmem:[%s5077_s1 + $0x3b8] sm:$0xff]  ;;  %v2767_v19 = vpack.c.bf16 %v104_v10, %v103_v9  ;;  %v2769_v21 = vpack.c.bf16 %v122_v16, %v121_v15 }
  0x20   :  { %2754 = vmatprep.subr.bf16.mxu1 %v2753_v39  ;;  %v2799_v20 = vpack.c.bf16 %v136_v14, %v135_v11  ;;  %v105_v22 = vld [vmem:[%s5077_s1 + $0x230] sm:$0xff]  ;;  %v106_v23 = vld [vmem:[%s5077_s1 + $0x238] sm:$0xff]  ;;  %v2801_v25 = vpack.c.bf16 %v154_v18, %v153_v17  ;;  %v124_v28 = vld [vmem:[%s5077_s1 + $0x2c8] sm:$0xff] }
  0x21   :  { %2724 = vmatpush3.bf16.msra.mxu0 %v2723_v46  ;;  %v137_v24 = vld [vmem:[%s5077_s1 + $0x330] sm:$0xff]  ;;  %v138_v26 = vld [vmem:[%s5077_s1 + $0x338] sm:$0xff]  ;;  %v155_v29 = vld [vmem:[%s5077_s1 + $0x3c0] sm:$0xff]  ;;  %v2771_v32 = vpack.c.bf16 %v106_v23, %v105_v22 }
  0x22   :  { %2758 = vmatprep.subr.bf16.mxu0 %v2757_v48  ;;  %v156_v30 = vld [vmem:[%s5077_s1 + $0x3c8] sm:$0xff]  ;;  %v2803_v35 = vpack.c.bf16 %v138_v26, %v137_v24  ;;  %v107_v37 = vld [vmem:[%s5077_s1 + $0x240] sm:$0xff]  ;;  %v125_v42 = vld [vmem:[%s5077_s1 + $0x2d0] sm:$0xff] }
  0x23   :  { %2756 = vmatpush3.bf16.msra.mxu1 %v2755_v47  ;;  %v28_v31 = vld [vmem:[%s5076_s0 + $0x8] sm:$0xff]  ;;  %v139_v39 = vld [vmem:[%s5077_s1 + $0x340] sm:$0xff]  ;;  %v2805_v40 = vpack.c.bf16 %v156_v30, %v155_v29  ;;  %v126_v43 = vld [vmem:[%s5077_s1 + $0x2d8] sm:$0xff] }
  0x24   :  { %2790 = vmatprep.subr.bf16.mxu1 %v2789_v52  ;;  %795 = vmatmul.mubr.f32.vlgmr.msra.gmra.mrb[0].mxu0 %v569_v27  ;;  %v123_v27 = vld [vmem:[%s5077_s1 + $0x2c0] sm:$0xff]  ;;  %v579_v34 = vcombine.high %v28_v31, %v28_v31  ;;  %v108_v38 = vld [vmem:[%s5077_s1 + $0x248] sm:$0xff]  ;;  %v157_v46 = vld [vmem:[%s5077_s1 + $0x3d0] sm:$0xff]  ;;  %v2777_v51 = vpack.c.bf16 %v126_v43, %v125_v42 }
  0x25   :  { %2760 = vmatpush3.bf16.msra.mxu0 %v2759_v58  ;;  %v2773_v36 = vpack.c.bf16 %v124_v28, %v123_v27  ;;  %v140_v41 = vld [vmem:[%s5077_s1 + $0x348] sm:$0xff]  ;;  %v158_v47 = vld [vmem:[%s5077_s1 + $0x3d8] sm:$0xff]  ;;  %v2775_v48 = vpack.c.bf16 %v108_v38, %v107_v37  ;;  %v109_v52 = vld [vmem:[%s5077_s1 + $0x250] sm:$0xff] }
  0x26   :  { %865 = vmatmul.mubr.f32.vlgmr.msra.gmra.mrb[0].mxu1 %v576_v33  ;;  %2762 = vmatprep.subr.bf16.mxu0 %v2761_v60  ;;  %v3634_v33 = vrot.slane %v28_v31, %v3473_v13  ;;  %v3657_v45 = vrot.slane %v579_v34, %v3473_v13  ;;  %v2807_v50 = vpack.c.bf16 %v140_v41, %v139_v39  ;;  %v110_v53 = vld [vmem:[%s5077_s1 + $0x258] sm:$0xff]  ;;  %v141_v54 = vld [vmem:[%s5077_s1 + $0x350] sm:$0xff]  ;;  %v127_v57 = vld [vmem:[%s5077_s1 + $0x2e0] sm:$0xff] }
  0x27   :  { %2792 = vmatpush3.bf16.msra.mxu1 %v2791_v59  ;;  %v2809_v55 = vpack.c.bf16 %v158_v47, %v157_v46  ;;  %v142_v56 = vld [vmem:[%s5077_s1 + $0x358] sm:$0xff]  ;;  %v128_v58 = vld [vmem:[%s5077_s1 + $0x2e8] sm:$0xff]  ;;  %v159_v59 = vld [vmem:[%s5077_s1 + $0x3e0] sm:$0xff]  ;;  %v2779_v61 = vpack.c.bf16 %v110_v53, %v109_v52 }
  0x28   :  { %2794 = vmatprep.subr.bf16.mxu1 %v2793_v0  ;;  %v594_v44 = vcombine.high %v3634_v33, %v3634_v33  ;;  %v595_v49 = vcombine.high %v3657_v45, %v3657_v45  ;;  %v160_v60 = vld [vmem:[%s5077_s1 + $0x3e8] sm:$0xff]  ;;  %v2811_v62 = vpack.c.bf16 %v142_v56, %v141_v54  ;;  %v2781_v63 = vpack.c.bf16 %v128_v58, %v127_v57  ;;  %v111_v0 = vld [vmem:[%s5077_s1 + $0x260] sm:$0xff]  ;;  %v129_v5 = vld [vmem:[%s5077_s1 + $0x2f0] sm:$0xff] }
  0x29   :  { %2764 = vmatpush3.bf16.msra.mxu0 %v2763_v6  ;;  %v112_v1 = vld [vmem:[%s5077_s1 + $0x268] sm:$0xff]  ;;  %v143_v2 = vld [vmem:[%s5077_s1 + $0x360] sm:$0xff]  ;;  %v2813_v3 = vpack.c.bf16 %v160_v60, %v159_v59  ;;  %v130_v6 = vld [vmem:[%s5077_s1 + $0x2f8] sm:$0xff] }
  0x2a   :  { %2766 = vmatprep.subr.bf16.mxu0 %v2765_v8  ;;  %934 = vmatprep.mubr.f32.mxu0 %v594_v44  ;;  %v144_v4 = vld [vmem:[%s5077_s1 + $0x368] sm:$0xff]  ;;  %v162_v8 = vld [vmem:[%s5077_s1 + $0x3f8] sm:$0xff]  ;;  %v2783_v9 = vpack.c.bf16 %v112_v1, %v111_v0  ;;  %v2785_v11 = vpack.c.bf16 %v130_v6, %v129_v5  ;;  %v145_v15 = vld [vmem:[%s5077_s1 + $0x370] sm:$0xff] }
  0x2b   :  { %2796 = vmatpush3.bf16.msra.mxu1 %v2795_v7  ;;  %1004 = vmatprep.mubr.f32.mxu1 %v595_v49  ;;  %v161_v7 = vld [vmem:[%s5077_s1 + $0x3f0] sm:$0xff]  ;;  %v2815_v10 = vpack.c.bf16 %v144_v4, %v143_v2  ;;  %v114_v14 = vld [vmem:[%s5077_s1 + $0x278] sm:$0xff]  ;;  %v179_v18 = vld [vmem:[%s5077_s1 + $0x480] sm:$0xff] }
  0x2c   :  { %2798 = vmatprep.subr.bf16.mxu1 %v2797_v12  ;;  %v113_v12 = vld [vmem:[%s5077_s1 + $0x270] sm:$0xff]  ;;  %v2817_v16 = vpack.c.bf16 %v162_v8, %v161_v7  ;;  %v146_v17 = vld [vmem:[%s5077_s1 + $0x378] sm:$0xff]  ;;  %v163_v23 = vld [vmem:[%s5077_s1 + $0x400] sm:$0xff] }
  0x2d   :  { %2768 = vmatpush3.bf16.msra.mxu0 %v2767_v19  ;;  %v180_v19 = vld [vmem:[%s5077_s1 + $0x488] sm:$0xff]  ;;  %v2787_v22 = vpack.c.bf16 %v114_v14, %v113_v12  ;;  %v2819_v24 = vpack.c.bf16 %v146_v17, %v145_v15  ;;  %v195_v27 = vld [vmem:[%s5077_s1 + $0x500] sm:$0xff]  ;;  %v181_v30 = vld [vmem:[%s5077_s1 + $0x490] sm:$0xff] }
  0x2e   :  { %2770 = vmatprep.subr.bf16.mxu0 %v2769_v21  ;;  %v212_v21 = vld [vmem:[%s5077_s1 + $0x588] sm:$0xff]  ;;  %v182_v31 = vld [vmem:[%s5077_s1 + $0x498] sm:$0xff]  ;;  %v29_v37 = vld [vmem:[%s5076_s0 + $0x10] sm:$0xff] }
  0x2f   :  { %2800 = vmatpush3.bf16.msra.mxu1 %v2799_v20  ;;  %v211_v20 = vld [vmem:[%s5077_s1 + $0x580] sm:$0xff]  ;;  %v164_v26 = vld [vmem:[%s5077_s1 + $0x408] sm:$0xff]  ;;  %v214_v34 = vld [vmem:[%s5077_s1 + $0x598] sm:$0xff]  ;;  %v2825_v38 = vpack.c.bf16 %v182_v31, %v181_v30  ;;  %v3776_v42 = vrot.slane %v29_v37, %v3473_v13  ;;  %v596_v43 = vcombine.high %v29_v37, %v29_v37 }
  0x30   :  { %2802 = vmatprep.subr.bf16.mxu1 %v2801_v25  ;;  %v2821_v25 = vpack.c.bf16 %v180_v19, %v179_v18  ;;  %v196_v28 = vld [vmem:[%s5077_s1 + $0x508] sm:$0xff]  ;;  %v2853_v29 = vpack.c.bf16 %v212_v21, %v211_v20  ;;  %v165_v39 = vld [vmem:[%s5077_s1 + $0x410] sm:$0xff]  ;;  %v198_v46 = vld [vmem:[%s5077_s1 + $0x518] sm:$0xff] }
  0x31   :  { %2772 = vmatpush3.bf16.msra.mxu0 %v2771_v32  ;;  %v213_v32 = vld [vmem:[%s5077_s1 + $0x590] sm:$0xff]  ;;  %v183_v47 = vld [vmem:[%s5077_s1 + $0x4a0] sm:$0xff]  ;;  %v3797_v52 = vrot.slane %v596_v43, %v3473_v13  ;;  %v168_v56 = vld [vmem:[%s5077_s1 + $0x428] sm:$0xff] }
  0x32   :  { %2774 = vmatprep.subr.bf16.mxu0 %v2773_v36  ;;  %v2855_v36 = vpack.c.bf16 %v196_v28, %v195_v27  ;;  %v197_v41 = vld [vmem:[%s5077_s1 + $0x510] sm:$0xff]  ;;  %v2857_v44 = vpack.c.bf16 %v214_v34, %v213_v32  ;;  %v215_v49 = vld [vmem:[%s5077_s1 + $0x5a0] sm:$0xff]  ;;  %v200_v59 = vld [vmem:[%s5077_s1 + $0x528] sm:$0xff] }
  0x33   :  { %2804 = vmatpush3.bf16.msra.mxu1 %v2803_v35  ;;  %v2823_v35 = vpack.c.bf16 %v164_v26, %v163_v23  ;;  %v199_v57 = vld [vmem:[%s5077_s1 + $0x520] sm:$0xff]  ;;  %v185_v60 = vld [vmem:[%s5077_s1 + $0x4b0] sm:$0xff]  ;;  %v170_v4 = vld [vmem:[%s5077_s1 + $0x438] sm:$0xff] }
  0x34   :  { %2806 = vmatprep.subr.bf16.mxu1 %v2805_v40  ;;  %v166_v40 = vld [vmem:[%s5077_s1 + $0x418] sm:$0xff]  ;;  %v2863_v1 = vpack.c.bf16 %v200_v59, %v199_v57  ;;  %v201_v5 = vld [vmem:[%s5077_s1 + $0x530] sm:$0xff]  ;;  %v187_v8 = vld [vmem:[%s5077_s1 + $0x4c0] sm:$0xff] }
  0x35   :  { %2776 = vmatpush3.bf16.msra.mxu0 %v2775_v48  ;;  %v184_v48 = vld [vmem:[%s5077_s1 + $0x4a8] sm:$0xff]  ;;  %v2827_v53 = vpack.c.bf16 %v166_v40, %v165_v39  ;;  %v202_v7 = vld [vmem:[%s5077_s1 + $0x538] sm:$0xff]  ;;  %v203_v18 = vld [vmem:[%s5077_s1 + $0x540] sm:$0xff] }
  0x36   :  { %2778 = vmatprep.subr.bf16.mxu0 %v2777_v51  ;;  %v611_v51 = vcombine.high %v3776_v42, %v3776_v42  ;;  %v2829_v54 = vpack.c.bf16 %v184_v48, %v183_v47  ;;  %v2867_v14 = vpack.c.bf16 %v202_v7, %v201_v5  ;;  %v172_v17 = vld [vmem:[%s5077_s1 + $0x448] sm:$0xff]  ;;  %v189_v21 = vld [vmem:[%s5077_s1 + $0x4d0] sm:$0xff]  ;;  %v206_v32 = vld [vmem:[%s5077_s1 + $0x558] sm:$0xff] }
  0x37   :  { %2808 = vmatpush3.bf16.msra.mxu1 %v2807_v50  ;;  %v216_v50 = vld [vmem:[%s5077_s1 + $0x5a8] sm:$0xff]  ;;  %v221_v23 = vld [vmem:[%s5077_s1 + $0x5d0] sm:$0xff]  ;;  %v191_v34 = vld [vmem:[%s5077_s1 + $0x4e0] sm:$0xff] }
  0x38   :  { %2810 = vmatprep.subr.bf16.mxu1 %v2809_v55  ;;  %v167_v55 = vld [vmem:[%s5077_s1 + $0x420] sm:$0xff]  ;;  %v2861_v58 = vpack.c.bf16 %v216_v50, %v215_v49  ;;  %v204_v20 = vld [vmem:[%s5077_s1 + $0x548] sm:$0xff]  ;;  %v173_v28 = vld [vmem:[%s5077_s1 + $0x450] sm:$0xff] }
  0x39   :  { %2780 = vmatpush3.bf16.msra.mxu0 %v2779_v61  ;;  %v186_v61 = vld [vmem:[%s5077_s1 + $0x4b8] sm:$0xff]  ;;  %v2831_v0 = vpack.c.bf16 %v168_v56, %v167_v55  ;;  %v2871_v26 = vpack.c.bf16 %v204_v20, %v203_v18  ;;  %v205_v30 = vld [vmem:[%s5077_s1 + $0x550] sm:$0xff]  ;;  %v224_v37 = vld [vmem:[%s5077_s1 + $0x5e8] sm:$0xff] }
  0x3a   :  { %2782 = vmatprep.subr.bf16.mxu0 %v2781_v63  ;;  %v218_v63 = vld [vmem:[%s5077_s1 + $0x5b8] sm:$0xff]  ;;  %v2833_v2 = vpack.c.bf16 %v186_v61, %v185_v60  ;;  %v2875_v39 = vpack.c.bf16 %v206_v32, %v205_v30  ;;  %v176_v43 = vld [vmem:[%s5077_s1 + $0x468] sm:$0xff]  ;;  %v193_v48 = vld [vmem:[%s5077_s1 + $0x4f0] sm:$0xff] }
  0x3b   :  { %2812 = vmatpush3.bf16.msra.mxu1 %v2811_v62  ;;  %v217_v62 = vld [vmem:[%s5077_s1 + $0x5b0] sm:$0xff]  ;;  %v208_v47 = vld [vmem:[%s5077_s1 + $0x568] sm:$0xff]  ;;  %v194_v49 = vld [vmem:[%s5077_s1 + $0x4f8] sm:$0xff] }
  0x3c   :  { %2814 = vmatprep.subr.bf16.mxu1 %v2813_v3  ;;  %v169_v3 = vld [vmem:[%s5077_s1 + $0x430] sm:$0xff]  ;;  %v2865_v6 = vpack.c.bf16 %v218_v63, %v217_v62  ;;  %v2849_v55 = vpack.c.bf16 %v194_v49, %v193_v48  ;;  %v178_v57 = vld [vmem:[%s5077_s1 + $0x478] sm:$0xff]  ;;  %v243_v60 = vld [vmem:[%s5077_s1 + $0x680] sm:$0xff] }
  0x3d   :  { %2784 = vmatpush3.bf16.msra.mxu0 %v2783_v9  ;;  %v188_v9 = vld [vmem:[%s5077_s1 + $0x4c8] sm:$0xff]  ;;  %v2835_v12 = vpack.c.bf16 %v170_v4, %v169_v3  ;;  %v225_v50 = vld [vmem:[%s5077_s1 + $0x5f0] sm:$0xff]  ;;  %v210_v59 = vld [vmem:[%s5077_s1 + $0x578] sm:$0xff] }
  0x3e   :  { %2786 = vmatprep.subr.bf16.mxu0 %v2785_v11  ;;  %v220_v11 = vld [vmem:[%s5077_s1 + $0x5c8] sm:$0xff]  ;;  %v2837_v15 = vpack.c.bf16 %v188_v9, %v187_v8  ;;  %v177_v56 = vld [vmem:[%s5077_s1 + $0x470] sm:$0xff]  ;;  %v275_v62 = vld [vmem:[%s5077_s1 + $0x780] sm:$0xff] }
  0x3f   :  { %2816 = vmatpush3.bf16.msra.mxu1 %v2815_v10  ;;  %v219_v10 = vld [vmem:[%s5077_s1 + $0x5c0] sm:$0xff]  ;;  %v244_v61 = vld [vmem:[%s5077_s1 + $0x688] sm:$0xff]  ;;  %v245_v9 = vld [vmem:[%s5077_s1 + $0x690] sm:$0xff] }
  0x40   :  { %2818 = vmatprep.subr.bf16.mxu1 %v2817_v16  ;;  %v171_v16 = vld [vmem:[%s5077_s1 + $0x440] sm:$0xff]  ;;  %v2869_v19 = vpack.c.bf16 %v220_v11, %v219_v10  ;;  %v276_v63 = vld [vmem:[%s5077_s1 + $0x788] sm:$0xff]  ;;  %v2885_v3 = vpack.c.bf16 %v244_v61, %v243_v60  ;;  %v246_v10 = vld [vmem:[%s5077_s1 + $0x698] sm:$0xff] }
  0x41   :  { %2788 = vmatpush3.bf16.msra.mxu0 %v2787_v22  ;;  %v190_v22 = vld [vmem:[%s5077_s1 + $0x4d8] sm:$0xff]  ;;  %v227_v4 = vld [vmem:[%s5077_s1 + $0x600] sm:$0xff]  ;;  %v228_v5 = vld [vmem:[%s5077_s1 + $0x608] sm:$0xff]  ;;  %v2917_v7 = vpack.c.bf16 %v276_v63, %v275_v62  ;;  %v2889_v18 = vpack.c.bf16 %v246_v10, %v245_v9 }
  0x42   :  { %2822 = vmatprep.subr.bf16.mxu0 %v2821_v25  ;;  %v2839_v25 = vpack.c.bf16 %v172_v17, %v171_v16  ;;  %v2841_v27 = vpack.c.bf16 %v190_v22, %v189_v21  ;;  %v260_v8 = vld [vmem:[%s5077_s1 + $0x708] sm:$0xff]  ;;  %v2887_v16 = vpack.c.bf16 %v228_v5, %v227_v4  ;;  %v230_v20 = vld [vmem:[%s5077_s1 + $0x618] sm:$0xff]  ;;  %v261_v21 = vld [vmem:[%s5077_s1 + $0x710] sm:$0xff] }
  0x43   :  { %2820 = vmatpush3.bf16.msra.mxu1 %v2819_v24  ;;  %v222_v24 = vld [vmem:[%s5077_s1 + $0x5d8] sm:$0xff]  ;;  %v265_v48 = vld [vmem:[%s5077_s1 + $0x730] sm:$0xff]  ;;  %v268_v61 = vld [vmem:[%s5077_s1 + $0x748] sm:$0xff] }
  0x44   :  { %2854 = vmatprep.subr.bf16.mxu1 %v2853_v29  ;;  %935 = vmatmul.mubr.f32.vlgmr.msra.gmra.mrb[2].mxu0 %v3634_v33  ;;  %v2859_v33 = vpack.c.bf16 %v198_v46, %v197_v41  ;;  %v174_v29 = vld [vmem:[%s5077_s1 + $0x458] sm:$0xff]  ;;  %v2873_v31 = vpack.c.bf16 %v222_v24, %v221_v23  ;;  %v175_v41 = vld [vmem:[%s5077_s1 + $0x460] sm:$0xff]  ;;  %v253_v62 = vld [vmem:[%s5077_s1 + $0x6d0] sm:$0xff] }
  0x45   :  { %2824 = vmatpush3.bf16.msra.mxu0 %v2823_v35  ;;  %1074 = vmatprep.mubr.f32.mxu0 %v611_v51  ;;  %v192_v35 = vld [vmem:[%s5077_s1 + $0x4e8] sm:$0xff]  ;;  %v226_v51 = vld [vmem:[%s5077_s1 + $0x5f8] sm:$0xff]  ;;  %v247_v24 = vld [vmem:[%s5077_s1 + $0x6a0] sm:$0xff] }
  0x46   :  { %1005 = vmatmul.mubr.f32.vlgmr.msra.gmra.mrb[2].mxu1 %v3657_v45  ;;  %2826 = vmatprep.subr.bf16.mxu0 %v2825_v38  ;;  %v612_v45 = vcombine.high %v3797_v52, %v3797_v52  ;;  %v2843_v38 = vpack.c.bf16 %v174_v29, %v173_v28  ;;  %v2845_v40 = vpack.c.bf16 %v192_v35, %v191_v34  ;;  %v262_v23 = vld [vmem:[%s5077_s1 + $0x718] sm:$0xff]  ;;  %v280_v28 = vld [vmem:[%s5077_s1 + $0x7a8] sm:$0xff]  ;;  %v263_v35 = vld [vmem:[%s5077_s1 + $0x720] sm:$0xff] }
  0x47   :  { %2856 = vmatpush3.bf16.msra.mxu1 %v2855_v36  ;;  %v223_v36 = vld [vmem:[%s5077_s1 + $0x5e0] sm:$0xff]  ;;  %v232_v34 = vld [vmem:[%s5077_s1 + $0x628] sm:$0xff]  ;;  %v254_v63 = vld [vmem:[%s5077_s1 + $0x6d8] sm:$0xff] }
  0x48   :  { %2858 = vmatprep.subr.bf16.mxu1 %v2857_v44  ;;  %1144 = vmatprep.mubr.f32.mxu1 %v612_v45  ;;  %v207_v44 = vld [vmem:[%s5077_s1 + $0x560] sm:$0xff]  ;;  %v2877_v46 = vpack.c.bf16 %v224_v37, %v223_v36  ;;  %v209_v45 = vld [vmem:[%s5077_s1 + $0x570] sm:$0xff]  ;;  %v2905_v4 = vpack.c.bf16 %v254_v63, %v253_v62  ;;  %v270_v9 = vld [vmem:[%s5077_s1 + $0x758] sm:$0xff] }
  0x49   :  { %2828 = vmatpush3.bf16.msra.mxu0 %v2827_v53  ;;  %v2847_v53 = vpack.c.bf16 %v176_v43, %v175_v41  ;;  %v249_v37 = vld [vmem:[%s5077_s1 + $0x6b0] sm:$0xff]  ;;  %v255_v10 = vld [vmem:[%s5077_s1 + $0x6e0] sm:$0xff] }
  0x4a   :  { %2830 = vmatprep.subr.bf16.mxu0 %v2829_v54  ;;  %v2879_v54 = vpack.c.bf16 %v208_v47, %v207_v44  ;;  %v234_v47 = vld [vmem:[%s5077_s1 + $0x638] sm:$0xff]  ;;  %v237_v5 = vld [vmem:[%s5077_s1 + $0x650] sm:$0xff] }
  0x4b   :  { %2860 = vmatpush3.bf16.msra.mxu1 %v2859_v33  ;;  %v30_v33 = vld [vmem:[%s5076_s0 + $0x18] sm:$0xff]  ;;  %v325_v62 = vld [vmem:[%s5077_s1 + $0x910] sm:$0xff] }
  0x4c   :  { %2862 = vmatprep.subr.bf16.mxu1 %v2861_v58  ;;  %v2881_v58 = vpack.c.bf16 %v226_v51, %v225_v50  ;;  %v3968_v11 = vrot.slane %v30_v33, %v3473_v13  ;;  %v266_v50 = vld [vmem:[%s5077_s1 + $0x738] sm:$0xff]  ;;  %v251_v51 = vld [vmem:[%s5077_s1 + $0x6c0] sm:$0xff] }
  0x4d   :  { %2832 = vmatpush3.bf16.msra.mxu0 %v2831_v0  ;;  %v613_v0 = vcombine.high %v30_v33, %v30_v33  ;;  %v283_v33 = vld [vmem:[%s5077_s1 + $0x7c0] sm:$0xff] }
  0x4e   :  { %2834 = vmatprep.subr.bf16.mxu0 %v2833_v2  ;;  %v2883_v2 = vpack.c.bf16 %v210_v59, %v209_v45  ;;  %v235_v45 = vld [vmem:[%s5077_s1 + $0x640] sm:$0xff] }
  0x4f   :  { %2864 = vmatpush3.bf16.msra.mxu1 %v2863_v1  ;;  %v2851_v1 = vpack.c.bf16 %v178_v57, %v177_v56  ;;  %v2931_v56 = vpack.c.bf16 %v266_v50, %v265_v48  ;;  %v267_v59 = vld [vmem:[%s5077_s1 + $0x740] sm:$0xff]  ;;  %v292_v48 = vld [vmem:[%s5077_s1 + $0x808] sm:$0xff] }
  0x50   :  { %2866 = vmatprep.subr.bf16.mxu1 %v2865_v6  ;;  %v259_v6 = vld [vmem:[%s5077_s1 + $0x700] sm:$0xff] }
  0x51   :  { %2836 = vmatpush3.bf16.msra.mxu0 %v2835_v12  ;;  %v277_v12 = vld [vmem:[%s5077_s1 + $0x790] sm:$0xff]  ;;  %v2919_v17 = vpack.c.bf16 %v260_v8, %v259_v6  ;;  %v238_v6 = vld [vmem:[%s5077_s1 + $0x658] sm:$0xff] }
  0x52   :  { %2838 = vmatprep.subr.bf16.mxu0 %v2837_v15  ;;  %v3977_v15 = vrot.slane %v613_v0, %v3473_v13  ;;  %v285_v0 = vld [vmem:[%s5077_s1 + $0x7d0] sm:$0xff] }
  0x53   :  { %2868 = vmatpush3.bf16.msra.mxu1 %v2867_v14  ;;  %v278_v14 = vld [vmem:[%s5077_s1 + $0x798] sm:$0xff] }
  0x54   :  { %2870 = vmatprep.subr.bf16.mxu1 %v2869_v19  ;;  %v229_v19 = vld [vmem:[%s5077_s1 + $0x610] sm:$0xff]  ;;  %v2921_v22 = vpack.c.bf16 %v278_v14, %v277_v12  ;;  %v629_v29 = vcombine.high %v3977_v15, %v3977_v15  ;;  %v256_v12 = vld [vmem:[%s5077_s1 + $0x6e8] sm:$0xff]  ;;  %v287_v14 = vld [vmem:[%s5077_s1 + $0x7e0] sm:$0xff] }
  0x55   :  { %2840 = vmatpush3.bf16.msra.mxu0 %v2839_v25  ;;  %v248_v25 = vld [vmem:[%s5077_s1 + $0x6a8] sm:$0xff]  ;;  %v2891_v30 = vpack.c.bf16 %v230_v20, %v229_v19  ;;  %v2909_v19 = vpack.c.bf16 %v256_v12, %v255_v10  ;;  %v239_v20 = vld [vmem:[%s5077_s1 + $0x660] sm:$0xff] }
  0x56   :  { %2842 = vmatprep.subr.bf16.mxu0 %v2841_v27  ;;  %v279_v27 = vld [vmem:[%s5077_s1 + $0x7a0] sm:$0xff]  ;;  %v2893_v32 = vpack.c.bf16 %v248_v25, %v247_v24  ;;  %v272_v24 = vld [vmem:[%s5077_s1 + $0x768] sm:$0xff]  ;;  %v257_v25 = vld [vmem:[%s5077_s1 + $0x6f0] sm:$0xff] }
  0x57   :  { %2872 = vmatpush3.bf16.msra.mxu1 %v2871_v26  ;;  %v628_v26 = vcombine.high %v3968_v11, %v3968_v11  ;;  %v2925_v36 = vpack.c.bf16 %v280_v28, %v279_v27  ;;  %v289_v27 = vld [vmem:[%s5077_s1 + $0x7f0] sm:$0xff]  ;;  %v290_v28 = vld [vmem:[%s5077_s1 + $0x7f8] sm:$0xff]  ;;  %v296_v10 = vld [vmem:[%s5077_s1 + $0x828] sm:$0xff] }
  0x58   :  { %2874 = vmatprep.subr.bf16.mxu1 %v2873_v31  ;;  %v2923_v31 = vpack.c.bf16 %v262_v23, %v261_v21  ;;  %v240_v21 = vld [vmem:[%s5077_s1 + $0x668] sm:$0xff]  ;;  %v327_v12 = vld [vmem:[%s5077_s1 + $0x920] sm:$0xff] }
  0x59   :  { %2844 = vmatpush3.bf16.msra.mxu0 %v2843_v38  ;;  %v250_v38 = vld [vmem:[%s5077_s1 + $0x6b8] sm:$0xff] }
  0x5a   :  { %2846 = vmatprep.subr.bf16.mxu0 %v2845_v40  ;;  %v282_v40 = vld [vmem:[%s5077_s1 + $0x7b8] sm:$0xff]  ;;  %v2897_v44 = vpack.c.bf16 %v250_v38, %v249_v37  ;;  %v307_v37 = vld [vmem:[%s5077_s1 + $0x880] sm:$0xff]  ;;  %v308_v38 = vld [vmem:[%s5077_s1 + $0x888] sm:$0xff] }
  0x5b   :  { %2876 = vmatpush3.bf16.msra.mxu1 %v2875_v39  ;;  %v281_v39 = vld [vmem:[%s5077_s1 + $0x7b0] sm:$0xff] }
  0x5c   :  { %2878 = vmatprep.subr.bf16.mxu1 %v2877_v46  ;;  %v233_v46 = vld [vmem:[%s5077_s1 + $0x630] sm:$0xff]  ;;  %v2929_v49 = vpack.c.bf16 %v282_v40, %v281_v39  ;;  %v339_v39 = vld [vmem:[%s5077_s1 + $0x980] sm:$0xff]  ;;  %v340_v40 = vld [vmem:[%s5077_s1 + $0x988] sm:$0xff] }
  0x5d   :  { %2848 = vmatpush3.bf16.msra.mxu0 %v2847_v53  ;;  %v252_v53 = vld [vmem:[%s5077_s1 + $0x6c8] sm:$0xff]  ;;  %v2981_v50 = vpack.c.bf16 %v340_v40, %v339_v39  ;;  %v317_v39 = vld [vmem:[%s5077_s1 + $0x8d0] sm:$0xff]  ;;  %v318_v40 = vld [vmem:[%s5077_s1 + $0x8d8] sm:$0xff] }
  0x5e   :  { %2850 = vmatprep.subr.bf16.mxu0 %v2849_v55  ;;  %v2899_v55 = vpack.c.bf16 %v234_v47, %v233_v46  ;;  %v2901_v57 = vpack.c.bf16 %v252_v53, %v251_v51  ;;  %v2949_v46 = vpack.c.bf16 %v308_v38, %v307_v37  ;;  %v291_v47 = vld [vmem:[%s5077_s1 + $0x800] sm:$0xff]  ;;  %v324_v51 = vld [vmem:[%s5077_s1 + $0x908] sm:$0xff]  ;;  %v309_v53 = vld [vmem:[%s5077_s1 + $0x890] sm:$0xff] }
  0x5f   :  { %2880 = vmatpush3.bf16.msra.mxu1 %v2879_v54  ;;  %v284_v54 = vld [vmem:[%s5077_s1 + $0x7c8] sm:$0xff] }
  0x60   :  { %2882 = vmatprep.subr.bf16.mxu1 %v2881_v58  ;;  %v236_v58 = vld [vmem:[%s5077_s1 + $0x648] sm:$0xff]  ;;  %v2933_v60 = vpack.c.bf16 %v284_v54, %v283_v33  ;;  %v310_v33 = vld [vmem:[%s5077_s1 + $0x898] sm:$0xff] }
  0x61   :  { %2852 = vmatpush3.bf16.msra.mxu0 %v2851_v1  ;;  %v286_v1 = vld [vmem:[%s5077_s1 + $0x7d8] sm:$0xff]  ;;  %v332_v38 = vld [vmem:[%s5077_s1 + $0x948] sm:$0xff] }
  0x62   :  { %2886 = vmatprep.subr.bf16.mxu0 %v2885_v3  ;;  %v2935_v3 = vpack.c.bf16 %v268_v61, %v267_v59  ;;  %v2937_v8 = vpack.c.bf16 %v286_v1, %v285_v0  ;;  %v2953_v59 = vpack.c.bf16 %v310_v33, %v309_v53  ;;  %v294_v61 = vld [vmem:[%s5077_s1 + $0x818] sm:$0xff]  ;;  %v311_v1 = vld [vmem:[%s5077_s1 + $0x8a0] sm:$0xff] }
  0x63   :  { %2884 = vmatpush3.bf16.msra.mxu1 %v2883_v2  ;;  %v2903_v2 = vpack.c.bf16 %v236_v58, %v235_v45  ;;  %v2951_v45 = vpack.c.bf16 %v292_v48, %v291_v47  ;;  %v326_v0 = vld [vmem:[%s5077_s1 + $0x918] sm:$0xff]  ;;  %v2969_v47 = vpack.c.bf16 %v318_v40, %v317_v39  ;;  %v301_v48 = vld [vmem:[%s5077_s1 + $0x850] sm:$0xff]  ;;  %v319_v33 = vld [vmem:[%s5077_s1 + $0x8e0] sm:$0xff] }
  0x64   :  { %2918 = vmatprep.subr.bf16.mxu1 %v2917_v7  ;;  %1075 = vmatmul.mubr.f32.vlgmr.msra.gmra.mrb[4].mxu0 %v3776_v42  ;;  %v231_v42 = vld [vmem:[%s5077_s1 + $0x620] sm:$0xff]  ;;  %v269_v7 = vld [vmem:[%s5077_s1 + $0x750] sm:$0xff]  ;;  %v334_v53 = vld [vmem:[%s5077_s1 + $0x958] sm:$0xff] }
  0x65   :  { %2888 = vmatpush3.bf16.msra.mxu0 %v2887_v16  ;;  %1214 = vmatprep.mubr.f32.mxu0 %v628_v26  ;;  %v2895_v41 = vpack.c.bf16 %v232_v34, %v231_v42  ;;  %v288_v16 = vld [vmem:[%s5077_s1 + $0x7e8] sm:$0xff]  ;;  %v258_v26 = vld [vmem:[%s5077_s1 + $0x6f8] sm:$0xff]  ;;  %v241_v42 = vld [vmem:[%s5077_s1 + $0x670] sm:$0xff] }
  0x66   :  { %1145 = vmatmul.mubr.f32.vlgmr.msra.gmra.mrb[4].mxu1 %v3797_v52  ;;  %2890 = vmatprep.subr.bf16.mxu0 %v2889_v18  ;;  %v264_v52 = vld [vmem:[%s5077_s1 + $0x728] sm:$0xff]  ;;  %v2939_v18 = vpack.c.bf16 %v270_v9, %v269_v7  ;;  %v2941_v23 = vpack.c.bf16 %v288_v16, %v287_v14  ;;  %v242_v34 = vld [vmem:[%s5077_s1 + $0x678] sm:$0xff]  ;;  %v313_v16 = vld [vmem:[%s5077_s1 + $0x8b0] sm:$0xff] }
  0x67   :  { %2920 = vmatpush3.bf16.msra.mxu1 %v2919_v17  ;;  %1284 = vmatprep.mubr.f32.mxu1 %v629_v29  ;;  %v2927_v43 = vpack.c.bf16 %v264_v52, %v263_v35  ;;  %v2907_v17 = vpack.c.bf16 %v238_v6, %v237_v5  ;;  %v2911_v29 = vpack.c.bf16 %v240_v21, %v239_v20  ;;  %v273_v35 = vld [vmem:[%s5077_s1 + $0x770] sm:$0xff]  ;;  %v274_v52 = vld [vmem:[%s5077_s1 + $0x778] sm:$0xff]  ;;  %v344_v5 = vld [vmem:[%s5077_s1 + $0x9a8] sm:$0xff] }
  0x68   :  { %2922 = vmatprep.subr.bf16.mxu1 %v2921_v22  ;;  %v271_v22 = vld [vmem:[%s5077_s1 + $0x760] sm:$0xff]  ;;  %v389_v39 = vld [vmem:[%s5077_s1 + $0xb10] sm:$0xff] }
  0x69   :  { %2892 = vmatpush3.bf16.msra.mxu0 %v2891_v30  ;;  %v31_v30 = vld [vmem:[%s5076_s0 + $0x20] sm:$0xff] }
  0x6a   :  { %2894 = vmatprep.subr.bf16.mxu0 %v2893_v32  ;;  %v2913_v32 = vpack.c.bf16 %v258_v26, %v257_v25  ;;  %v4175_v54 = vrot.slane %v31_v30, %v3473_v13  ;;  %v329_v25 = vld [vmem:[%s5077_s1 + $0x930] sm:$0xff] }
  0x6b   :  { %2924 = vmatpush3.bf16.msra.mxu1 %v2923_v31  ;;  %v2943_v31 = vpack.c.bf16 %v272_v24, %v271_v22  ;;  %v298_v24 = vld [vmem:[%s5077_s1 + $0x838] sm:$0xff] }
  0x6c   :  { %2926 = vmatprep.subr.bf16.mxu1 %v2925_v36  ;;  %v2945_v36 = vpack.c.bf16 %v290_v28, %v289_v27  ;;  %v330_v27 = vld [vmem:[%s5077_s1 + $0x938] sm:$0xff]  ;;  %v315_v28 = vld [vmem:[%s5077_s1 + $0x8c0] sm:$0xff] }
  0x6d   :  { %2896 = vmatpush3.bf16.msra.mxu0 %v2895_v41  ;;  %v630_v41 = vcombine.high %v31_v30, %v31_v30  ;;  %v347_v30 = vld [vmem:[%s5077_s1 + $0x9c0] sm:$0xff] }
  0x6e   :  { %2898 = vmatprep.subr.bf16.mxu0 %v2897_v44  ;;  %v2947_v44 = vpack.c.bf16 %v274_v52, %v273_v35  ;;  %v299_v35 = vld [vmem:[%s5077_s1 + $0x840] sm:$0xff] }
  0x6f   :  { %2928 = vmatpush3.bf16.msra.mxu1 %v2927_v43  ;;  %v2915_v43 = vpack.c.bf16 %v242_v34, %v241_v42  ;;  %v2995_v42 = vpack.c.bf16 %v330_v27, %v329_v25  ;;  %v331_v52 = vld [vmem:[%s5077_s1 + $0x940] sm:$0xff]  ;;  %v356_v25 = vld [vmem:[%s5077_s1 + $0xa08] sm:$0xff] }
  0x70   :  { %2930 = vmatprep.subr.bf16.mxu1 %v2929_v49  ;;  %v323_v49 = vld [vmem:[%s5077_s1 + $0x900] sm:$0xff] }
  0x71   :  { %2900 = vmatpush3.bf16.msra.mxu0 %v2899_v55  ;;  %v341_v55 = vld [vmem:[%s5077_s1 + $0x990] sm:$0xff]  ;;  %v2983_v58 = vpack.c.bf16 %v324_v51, %v323_v49  ;;  %v302_v49 = vld [vmem:[%s5077_s1 + $0x858] sm:$0xff] }
  0x72   :  { %2902 = vmatprep.subr.bf16.mxu0 %v2901_v57  ;;  %v4184_v57 = vrot.slane %v630_v41, %v3473_v13  ;;  %v349_v41 = vld [vmem:[%s5077_s1 + $0x9d0] sm:$0xff] }
  0x73   :  { %2932 = vmatpush3.bf16.msra.mxu1 %v2931_v56  ;;  %v342_v56 = vld [vmem:[%s5077_s1 + $0x998] sm:$0xff] }
  0x74   :  { %2934 = vmatprep.subr.bf16.mxu1 %v2933_v60  ;;  %v293_v60 = vld [vmem:[%s5077_s1 + $0x810] sm:$0xff]  ;;  %v2985_v63 = vpack.c.bf16 %v342_v56, %v341_v55  ;;  %v646_v6 = vcombine.high %v4184_v57, %v4184_v57  ;;  %v320_v55 = vld [vmem:[%s5077_s1 + $0x8e8] sm:$0xff]  ;;  %v351_v56 = vld [vmem:[%s5077_s1 + $0x9e0] sm:$0xff] }
  0x75   :  { %2904 = vmatpush3.bf16.msra.mxu0 %v2903_v2  ;;  %v312_v2 = vld [vmem:[%s5077_s1 + $0x8a8] sm:$0xff]  ;;  %v2955_v7 = vpack.c.bf16 %v294_v61, %v293_v60  ;;  %v2973_v60 = vpack.c.bf16 %v320_v55, %v319_v33  ;;  %v303_v61 = vld [vmem:[%s5077_s1 + $0x860] sm:$0xff] }
  0x76   :  { %2906 = vmatprep.subr.bf16.mxu0 %v2905_v4  ;;  %v343_v4 = vld [vmem:[%s5077_s1 + $0x9a0] sm:$0xff]  ;;  %v2957_v9 = vpack.c.bf16 %v312_v2, %v311_v1  ;;  %v336_v1 = vld [vmem:[%s5077_s1 + $0x968] sm:$0xff]  ;;  %v321_v2 = vld [vmem:[%s5077_s1 + $0x8f0] sm:$0xff] }
  0x77   :  { %2936 = vmatpush3.bf16.msra.mxu1 %v2935_v3  ;;  %v645_v3 = vcombine.high %v4175_v54, %v4175_v54  ;;  %v2989_v14 = vpack.c.bf16 %v344_v5, %v343_v4  ;;  %v353_v4 = vld [vmem:[%s5077_s1 + $0x9f0] sm:$0xff]  ;;  %v354_v5 = vld [vmem:[%s5077_s1 + $0x9f8] sm:$0xff]  ;;  %v360_v33 = vld [vmem:[%s5077_s1 + $0xa28] sm:$0xff] }
  0x78   :  { %2938 = vmatprep.subr.bf16.mxu1 %v2937_v8  ;;  %v2987_v8 = vpack.c.bf16 %v326_v0, %v325_v62  ;;  %v304_v62 = vld [vmem:[%s5077_s1 + $0x868] sm:$0xff]  ;;  %v391_v55 = vld [vmem:[%s5077_s1 + $0xb20] sm:$0xff] }
  0x79   :  { %2908 = vmatpush3.bf16.msra.mxu0 %v2907_v17  ;;  %v314_v17 = vld [vmem:[%s5077_s1 + $0x8b8] sm:$0xff] }
  0x7a   :  { %2910 = vmatprep.subr.bf16.mxu0 %v2909_v19  ;;  %v346_v19 = vld [vmem:[%s5077_s1 + $0x9b8] sm:$0xff]  ;;  %v2961_v22 = vpack.c.bf16 %v314_v17, %v313_v16  ;;  %v371_v16 = vld [vmem:[%s5077_s1 + $0xa80] sm:$0xff]  ;;  %v372_v17 = vld [vmem:[%s5077_s1 + $0xa88] sm:$0xff] }
  0x7b   :  { %2940 = vmatpush3.bf16.msra.mxu1 %v2939_v18  ;;  %v345_v18 = vld [vmem:[%s5077_s1 + $0x9b0] sm:$0xff] }
  0x7c   :  { %2942 = vmatprep.subr.bf16.mxu1 %v2941_v23  ;;  %v297_v23 = vld [vmem:[%s5077_s1 + $0x830] sm:$0xff]  ;;  %v2993_v26 = vpack.c.bf16 %v346_v19, %v345_v18  ;;  %v403_v18 = vld [vmem:[%s5077_s1 + $0xb80] sm:$0xff]  ;;  %v404_v19 = vld [vmem:[%s5077_s1 + $0xb88] sm:$0xff] }
  0x7d   :  { %2912 = vmatpush3.bf16.msra.mxu0 %v2911_v29  ;;  %v316_v29 = vld [vmem:[%s5077_s1 + $0x8c8] sm:$0xff]  ;;  %v3045_v27 = vpack.c.bf16 %v404_v19, %v403_v18 }
  0x7e   :  { %2914 = vmatprep.subr.bf16.mxu0 %v2913_v32  ;;  %v2963_v32 = vpack.c.bf16 %v298_v24, %v297_v23  ;;  %v2965_v34 = vpack.c.bf16 %v316_v29, %v315_v28  ;;  %v3013_v23 = vpack.c.bf16 %v372_v17, %v371_v16  ;;  %v355_v24 = vld [vmem:[%s5077_s1 + $0xa00] sm:$0xff]  ;;  %v388_v28 = vld [vmem:[%s5077_s1 + $0xb08] sm:$0xff]  ;;  %v373_v29 = vld [vmem:[%s5077_s1 + $0xa90] sm:$0xff] }
  0x7f   :  { %2944 = vmatpush3.bf16.msra.mxu1 %v2943_v31  ;;  %v348_v31 = vld [vmem:[%s5077_s1 + $0x9c8] sm:$0xff] }
  0x80   :  { %2946 = vmatprep.subr.bf16.mxu1 %v2945_v36  ;;  %v300_v36 = vld [vmem:[%s5077_s1 + $0x848] sm:$0xff]  ;;  %v2997_v37 = vpack.c.bf16 %v348_v31, %v347_v30  ;;  %v374_v30 = vld [vmem:[%s5077_s1 + $0xa98] sm:$0xff] }
  0x81   :  { %2916 = vmatpush3.bf16.msra.mxu0 %v2915_v43  ;;  %v350_v43 = vld [vmem:[%s5077_s1 + $0x9d8] sm:$0xff] }
  0x82   :  { %2950 = vmatprep.subr.bf16.mxu0 %v2949_v46  ;;  %v2999_v46 = vpack.c.bf16 %v332_v38, %v331_v52  ;;  %v3001_v51 = vpack.c.bf16 %v350_v43, %v349_v41  ;;  %v3017_v52 = vpack.c.bf16 %v374_v30, %v373_v29  ;;  %v358_v38 = vld [vmem:[%s5077_s1 + $0xa18] sm:$0xff]  ;;  %v375_v43 = vld [vmem:[%s5077_s1 + $0xaa0] sm:$0xff] }
  0x83   :  { %2948 = vmatpush3.bf16.msra.mxu1 %v2947_v44  ;;  %v2967_v44 = vpack.c.bf16 %v300_v36, %v299_v35  ;;  %v3015_v35 = vpack.c.bf16 %v356_v25, %v355_v24  ;;  %v390_v41 = vld [vmem:[%s5077_s1 + $0xb18] sm:$0xff] }
  0x84   :  { %2982 = vmatprep.subr.bf16.mxu1 %v2981_v50  ;;  %1215 = vmatmul.mubr.f32.vlgmr.msra.gmra.mrb[6].mxu0 %v3968_v11  ;;  %v295_v11 = vld [vmem:[%s5077_s1 + $0x820] sm:$0xff]  ;;  %v333_v50 = vld [vmem:[%s5077_s1 + $0x950] sm:$0xff] }
  0x85   :  { %2952 = vmatpush3.bf16.msra.mxu0 %v2951_v45  ;;  %1354 = vmatprep.mubr.f32.mxu0 %v645_v3  ;;  %v2959_v20 = vpack.c.bf16 %v296_v10, %v295_v11  ;;  %v352_v45 = vld [vmem:[%s5077_s1 + $0x9e8] sm:$0xff]  ;;  %v322_v3 = vld [vmem:[%s5077_s1 + $0x8f8] sm:$0xff]  ;;  %v305_v11 = vld [vmem:[%s5077_s1 + $0x870] sm:$0xff] }
  0x86   :  { %1285 = vmatmul.mubr.f32.vlgmr.msra.gmra.mrb[6].mxu1 %v3977_v15  ;;  %2954 = vmatprep.subr.bf16.mxu0 %v2953_v59  ;;  %v328_v15 = vld [vmem:[%s5077_s1 + $0x928] sm:$0xff]  ;;  %v3003_v59 = vpack.c.bf16 %v334_v53, %v333_v50  ;;  %v3005_v0 = vpack.c.bf16 %v352_v45, %v351_v56  ;;  %v306_v10 = vld [vmem:[%s5077_s1 + $0x878] sm:$0xff]  ;;  %v377_v45 = vld [vmem:[%s5077_s1 + $0xab0] sm:$0xff] }
  0x87   :  { %2984 = vmatpush3.bf16.msra.mxu1 %v2983_v58  ;;  %1424 = vmatprep.mubr.f32.mxu1 %v646_v6  ;;  %v2991_v21 = vpack.c.bf16 %v328_v15, %v327_v12  ;;  %v2971_v58 = vpack.c.bf16 %v302_v49, %v301_v48  ;;  %v2975_v6 = vpack.c.bf16 %v304_v62, %v303_v61  ;;  %v337_v12 = vld [vmem:[%s5077_s1 + $0x970] sm:$0xff]  ;;  %v338_v15 = vld [vmem:[%s5077_s1 + $0x978] sm:$0xff]  ;;  %v408_v48 = vld [vmem:[%s5077_s1 + $0xba8] sm:$0xff] }
  0x88   :  { %2986 = vmatprep.subr.bf16.mxu1 %v2985_v63  ;;  %v335_v63 = vld [vmem:[%s5077_s1 + $0x960] sm:$0xff] }
  0x89   :  { %2956 = vmatpush3.bf16.msra.mxu0 %v2955_v7  ;;  %v32_v7 = vld [vmem:[%s5076_s0 + $0x28] sm:$0xff] }
  0x8a   :  { %2958 = vmatprep.subr.bf16.mxu0 %v2957_v9  ;;  %v2977_v9 = vpack.c.bf16 %v322_v3, %v321_v2  ;;  %v4382_v31 = vrot.slane %v32_v7, %v3473_v13  ;;  %v393_v2 = vld [vmem:[%s5077_s1 + $0xb30] sm:$0xff] }
  0x8b   :  { %2988 = vmatpush3.bf16.msra.mxu1 %v2987_v8  ;;  %v3007_v8 = vpack.c.bf16 %v336_v1, %v335_v63  ;;  %v362_v1 = vld [vmem:[%s5077_s1 + $0xa38] sm:$0xff] }
  0x8c   :  { %2990 = vmatprep.subr.bf16.mxu1 %v2989_v14  ;;  %v3009_v14 = vpack.c.bf16 %v354_v5, %v353_v4  ;;  %v394_v4 = vld [vmem:[%s5077_s1 + $0xb38] sm:$0xff]  ;;  %v379_v5 = vld [vmem:[%s5077_s1 + $0xac0] sm:$0xff] }
  0x8d   :  { %2960 = vmatpush3.bf16.msra.mxu0 %v2959_v20  ;;  %v647_v20 = vcombine.high %v32_v7, %v32_v7  ;;  %v411_v7 = vld [vmem:[%s5077_s1 + $0xbc0] sm:$0xff] }
  0x8e   :  { %2962 = vmatprep.subr.bf16.mxu0 %v2961_v22  ;;  %v3011_v22 = vpack.c.bf16 %v338_v15, %v337_v12  ;;  %v395_v15 = vld [vmem:[%s5077_s1 + $0xb40] sm:$0xff] }
  0x8f   :  { %2992 = vmatpush3.bf16.msra.mxu1 %v2991_v21  ;;  %v2979_v21 = vpack.c.bf16 %v306_v10, %v305_v11  ;;  %v363_v11 = vld [vmem:[%s5077_s1 + $0xa40] sm:$0xff]  ;;  %v3059_v10 = vpack.c.bf16 %v394_v4, %v393_v2 }
  0x90   :  { %2994 = vmatprep.subr.bf16.mxu1 %v2993_v26  ;;  %v387_v26 = vld [vmem:[%s5077_s1 + $0xb00] sm:$0xff] }
  0x91   :  { %2964 = vmatpush3.bf16.msra.mxu0 %v2963_v32  ;;  %v405_v32 = vld [vmem:[%s5077_s1 + $0xb90] sm:$0xff]  ;;  %v3047_v36 = vpack.c.bf16 %v388_v28, %v387_v26 }
  0x92   :  { %2966 = vmatprep.subr.bf16.mxu0 %v2965_v34  ;;  %v4391_v34 = vrot.slane %v647_v20, %v3473_v13 }
  0x93   :  { %2996 = vmatpush3.bf16.msra.mxu1 %v2995_v42  ;;  %v406_v42 = vld [vmem:[%s5077_s1 + $0xb98] sm:$0xff] }
  0x94   :  { %2998 = vmatprep.subr.bf16.mxu1 %v2997_v37  ;;  %v357_v37 = vld [vmem:[%s5077_s1 + $0xa10] sm:$0xff]  ;;  %v3049_v40 = vpack.c.bf16 %v406_v42, %v405_v32  ;;  %v663_v49 = vcombine.high %v4391_v34, %v4391_v34 }
  0x95   :  { %2968 = vmatpush3.bf16.msra.mxu0 %v2967_v44  ;;  %v376_v44 = vld [vmem:[%s5077_s1 + $0xaa8] sm:$0xff]  ;;  %v3019_v50 = vpack.c.bf16 %v358_v38, %v357_v37 }
  0x96   :  { %2970 = vmatprep.subr.bf16.mxu0 %v2969_v47  ;;  %v407_v47 = vld [vmem:[%s5077_s1 + $0xba0] sm:$0xff]  ;;  %v3021_v53 = vpack.c.bf16 %v376_v44, %v375_v43 }
  0x97   :  { %3000 = vmatpush3.bf16.msra.mxu1 %v2999_v46  ;;  %v662_v46 = vcombine.high %v4382_v31, %v4382_v31  ;;  %v3053_v56 = vpack.c.bf16 %v408_v48, %v407_v47 }
  0x98   :  { %3002 = vmatprep.subr.bf16.mxu1 %v3001_v51  ;;  %v3051_v51 = vpack.c.bf16 %v390_v41, %v389_v39 }
  0x99   :  { %2972 = vmatpush3.bf16.msra.mxu0 %v2971_v58  ;;  %v378_v58 = vld [vmem:[%s5077_s1 + $0xab8] sm:$0xff] }
  0x9a   :  { %2974 = vmatprep.subr.bf16.mxu0 %v2973_v60  ;;  %v410_v60 = vld [vmem:[%s5077_s1 + $0xbb8] sm:$0xff]  ;;  %v3025_v63 = vpack.c.bf16 %v378_v58, %v377_v45 }
  0x9b   :  { %3004 = vmatpush3.bf16.msra.mxu1 %v3003_v59  ;;  %v409_v59 = vld [vmem:[%s5077_s1 + $0xbb0] sm:$0xff] }
  0x9c   :  { %3006 = vmatprep.subr.bf16.mxu1 %v3005_v0  ;;  %v361_v0 = vld [vmem:[%s5077_s1 + $0xa30] sm:$0xff]  ;;  %v3057_v3 = vpack.c.bf16 %v410_v60, %v409_v59 }
  0x9d   :  { %2976 = vmatpush3.bf16.msra.mxu0 %v2975_v6  ;;  %v380_v6 = vld [vmem:[%s5077_s1 + $0xac8] sm:$0xff] }
  0x9e   :  { %2978 = vmatprep.subr.bf16.mxu0 %v2977_v9  ;;  %v3027_v9 = vpack.c.bf16 %v362_v1, %v361_v0  ;;  %v3029_v12 = vpack.c.bf16 %v380_v6, %v379_v5 }
  0x9f   :  { %3008 = vmatpush3.bf16.msra.mxu1 %v3007_v8  ;;  %v412_v8 = vld [vmem:[%s5077_s1 + $0xbc8] sm:$0xff] }
  0xa0   :  { %3010 = vmatprep.subr.bf16.mxu1 %v3009_v14  ;;  %v364_v14 = vld [vmem:[%s5077_s1 + $0xa48] sm:$0xff] }
  0xa1   :  { %2980 = vmatpush3.bf16.msra.mxu0 %v2979_v21 }
  0xa2   :  { %3014 = vmatprep.subr.bf16.mxu0 %v3013_v23 }
  0xa3   :  { %3012 = vmatpush3.bf16.msra.mxu1 %v3011_v22 }
  0xa4   :  { %3046 = vmatprep.subr.bf16.mxu1 %v3045_v27  ;;  %1355 = vmatmul.mubr.f32.vlgmr.msra.gmra.mrb[8].mxu0 %v4175_v54  ;;  %v359_v54 = vld [vmem:[%s5077_s1 + $0xa20] sm:$0xff] }
  0xa5   :  { %3016 = vmatpush3.bf16.msra.mxu0 %v3015_v35  ;;  %1494 = vmatprep.mubr.f32.mxu0 %v662_v46  ;;  %v3023_v61 = vpack.c.bf16 %v360_v33, %v359_v54 }
  0xa6   :  { %1425 = vmatmul.mubr.f32.vlgmr.msra.gmra.mrb[8].mxu1 %v4184_v57  ;;  %3018 = vmatprep.subr.bf16.mxu0 %v3017_v52  ;;  %v392_v57 = vld [vmem:[%s5077_s1 + $0xb28] sm:$0xff] }
  0xa7   :  { %3048 = vmatpush3.bf16.msra.mxu1 %v3047_v36  ;;  %1564 = vmatprep.mubr.f32.mxu1 %v663_v49  ;;  %v3055_v62 = vpack.c.bf16 %v392_v57, %v391_v55 }
  0xa8   :  { %3050 = vmatprep.subr.bf16.mxu1 %v3049_v40 }
  0xa9   :  { %3020 = vmatpush3.bf16.msra.mxu0 %v3019_v50 }
  0xaa   :  { %3022 = vmatprep.subr.bf16.mxu0 %v3021_v53 }
  0xab   :  { %3052 = vmatpush3.bf16.msra.mxu1 %v3051_v51 }
  0xac   :  { %3054 = vmatprep.subr.bf16.mxu1 %v3053_v56 }
  0xad   :  { %3024 = vmatpush3.bf16.msra.mxu0 %v3023_v61 }
  0xae   :  { %3026 = vmatprep.subr.bf16.mxu0 %v3025_v63 }
  0xaf   :  { %3056 = vmatpush3.bf16.msra.mxu1 %v3055_v62 }
  0xb0   :  { %12 = vsyncpa [#allocation3], 0  ;;  %3058 = vmatprep.subr.bf16.mxu1 %v3057_v3  ;;  %v3061_v16 = vpack.c.bf16 %v412_v8, %v411_v7  ;;  %v396_v17 = vld [vmem:[%s5077_s1 + $0xb48] sm:$0xff]  ;;  %v381_v18 = vld [vmem:[%s5077_s1 + $0xad0] sm:$0xff]  ;;  %v3031_v22 = vpack.c.bf16 %v364_v14, %v363_v11  ;;  %vm3280_vm0 = vmmov 0   ;;  %vm1959_vm1 = vcmask 523264  }
  0xb1   :  { %v382_v19 = vld [vmem:[%s5077_s1 + $0xad8] sm:$0xff]  ;;  %v413_v20 = vld [vmem:[%s5077_s1 + $0xbd0] sm:$0xff]  ;;  %3028 = vmatpush3.bf16.msra.mxu0 %v3027_v9  ;;  %v3063_v23 = vpack.c.bf16 %v396_v17, %v395_v15  ;;  %v383_v30 = vld [vmem:[%s5077_s1 + $0xae0] sm:$0xff]  ;;  %s3282_s23 = smov [#allocation2]   ;;  %vm2033_vm2 = vcmask 74752  }
  0xb2   :  { %v414_v21 = vld [vmem:[%s5077_s1 + $0xbd8] sm:$0xff]  ;;  %3030 = vmatprep.subr.bf16.mxu0 %v3029_v12  ;;  %v3033_v24 = vpack.c.bf16 %v382_v19, %v381_v18  ;;  %v365_v25 = vld [vmem:[%s5077_s1 + $0xa50] sm:$0xff]  ;;  %v384_v32 = vld [vmem:[%s5077_s1 + $0xae8] sm:$0xff] }
  0xb3   :  { %3060 = vmatpush3.bf16.msra.mxu1 %v3059_v10  ;;  %v366_v26 = vld [vmem:[%s5077_s1 + $0xa58] sm:$0xff]  ;;  %v397_v27 = vld [vmem:[%s5077_s1 + $0xb50] sm:$0xff]  ;;  %v3065_v28 = vpack.c.bf16 %v414_v21, %v413_v20  ;;  %v415_v42 = vld [vmem:[%s5077_s1 + $0xbe0] sm:$0xff]  ;;  %v3037_v37 = vpack.c.bf16 %v384_v32, %v383_v30 }
  0xb4   :  { %3062 = vmatprep.subr.bf16.mxu1 %v3061_v16  ;;  %v398_v29 = vld [vmem:[%s5077_s1 + $0xb58] sm:$0xff]  ;;  %v416_v35 = vld [vmem:[%s5077_s1 + $0xbe8] sm:$0xff]  ;;  %v3035_v36 = vpack.c.bf16 %v366_v26, %v365_v25  ;;  %v367_v38 = vld [vmem:[%s5077_s1 + $0xa60] sm:$0xff] }
  0xb5   :  { %3032 = vmatpush3.bf16.msra.mxu0 %v3031_v22  ;;  %v3067_v52 = vpack.c.bf16 %v398_v29, %v397_v27  ;;  %v368_v39 = vld [vmem:[%s5077_s1 + $0xa68] sm:$0xff]  ;;  %v399_v40 = vld [vmem:[%s5077_s1 + $0xb60] sm:$0xff]  ;;  %v3069_v41 = vpack.c.bf16 %v416_v35, %v415_v42  ;;  %v385_v44 = vld [vmem:[%s5077_s1 + $0xaf0] sm:$0xff] }
  0xb6   :  { %3034 = vmatprep.subr.bf16.mxu0 %v3033_v24  ;;  %v400_v43 = vld [vmem:[%s5077_s1 + $0xb68] sm:$0xff]  ;;  %v386_v46 = vld [vmem:[%s5077_s1 + $0xaf8] sm:$0xff]  ;;  %v417_v47 = vld [vmem:[%s5077_s1 + $0xbf0] sm:$0xff]  ;;  %v3039_v49 = vpack.c.bf16 %v368_v39, %v367_v38 }
  0xb7   :  { %3064 = vmatpush3.bf16.msra.mxu1 %v3063_v23  ;;  %v418_v48 = vld [vmem:[%s5077_s1 + $0xbf8] sm:$0xff]  ;;  %v33_v50 = vld [vmem:[%s5076_s0 + $0x30] sm:$0xff]  ;;  %v3071_v51 = vpack.c.bf16 %v400_v43, %v399_v40  ;;  %v3041_v53 = vpack.c.bf16 %v386_v46, %v385_v44  ;;  %v435_v45 = vld [vmem:[%s5077_s1 + $0xc80] sm:$0xff] }
  0xb8   :  { %3066 = vmatprep.subr.bf16.mxu1 %v3065_v28  ;;  %v369_v54 = vld [vmem:[%s5077_s1 + $0xa70] sm:$0xff]  ;;  %v370_v33 = vld [vmem:[%s5077_s1 + $0xa78] sm:$0xff]  ;;  %v3073_v56 = vpack.c.bf16 %v418_v48, %v417_v47  ;;  %v436_v58 = vld [vmem:[%s5077_s1 + $0xc88] sm:$0xff]  ;;  %v664_v61 = vcombine.high %v33_v50, %v33_v50  ;;  %v4589_v8 = vrot.slane %v33_v50, %v3473_v13 }
  0xb9   :  { %3036 = vmatpush3.bf16.msra.mxu0 %v3035_v36  ;;  %v401_v55 = vld [vmem:[%s5077_s1 + $0xb70] sm:$0xff]  ;;  %v402_v57 = vld [vmem:[%s5077_s1 + $0xb78] sm:$0xff]  ;;  %v467_v59 = vld [vmem:[%s5077_s1 + $0xd80] sm:$0xff]  ;;  %v3043_v62 = vpack.c.bf16 %v370_v33, %v369_v54  ;;  %v3077_v0 = vpack.c.bf16 %v436_v58, %v435_v45 }
  0xba   :  { %3038 = vmatprep.subr.bf16.mxu0 %v3037_v37  ;;  %v468_v60 = vld [vmem:[%s5077_s1 + $0xd88] sm:$0xff]  ;;  %v3075_v63 = vpack.c.bf16 %v402_v57, %v401_v55  ;;  %v419_v1 = vld [vmem:[%s5077_s1 + $0xc00] sm:$0xff]  ;;  %v437_v6 = vld [vmem:[%s5077_s1 + $0xc90] sm:$0xff]  ;;  %v4598_v10 = vrot.slane %v664_v61, %v3473_v13  ;;  %v679_v23 = vcombine.high %v4589_v8, %v4589_v8 }
  0xbb   :  { %3068 = vmatpush3.bf16.msra.mxu1 %v3067_v52  ;;  %v420_v2 = vld [vmem:[%s5077_s1 + $0xc08] sm:$0xff]  ;;  %v451_v3 = vld [vmem:[%s5077_s1 + $0xd00] sm:$0xff]  ;;  %v3109_v4 = vpack.c.bf16 %v468_v60, %v467_v59  ;;  %v438_v7 = vld [vmem:[%s5077_s1 + $0xc98] sm:$0xff] }
  0xbc   :  { %3070 = vmatprep.subr.bf16.mxu1 %v3069_v41  ;;  %v452_v5 = vld [vmem:[%s5077_s1 + $0xd08] sm:$0xff]  ;;  %v469_v9 = vld [vmem:[%s5077_s1 + $0xd90] sm:$0xff]  ;;  %v470_v11 = vld [vmem:[%s5077_s1 + $0xd98] sm:$0xff]  ;;  %v3079_v12 = vpack.c.bf16 %v420_v2, %v419_v1  ;;  %v3081_v15 = vpack.c.bf16 %v438_v7, %v437_v6  ;;  %v680_v26 = vcombine.high %v4598_v10, %v4598_v10 }
  0xbd   :  { %3040 = vmatpush3.bf16.msra.mxu0 %v3039_v49  ;;  %v3111_v14 = vpack.c.bf16 %v452_v5, %v451_v3  ;;  %v421_v16 = vld [vmem:[%s5077_s1 + $0xc10] sm:$0xff]  ;;  %v422_v17 = vld [vmem:[%s5077_s1 + $0xc18] sm:$0xff]  ;;  %v3113_v19 = vpack.c.bf16 %v470_v11, %v469_v9  ;;  %v439_v21 = vld [vmem:[%s5077_s1 + $0xca0] sm:$0xff] }
  0xbe   :  { %3042 = vmatprep.subr.bf16.mxu0 %v3041_v53  ;;  %v453_v18 = vld [vmem:[%s5077_s1 + $0xd10] sm:$0xff]  ;;  %v454_v20 = vld [vmem:[%s5077_s1 + $0xd18] sm:$0xff]  ;;  %v440_v22 = vld [vmem:[%s5077_s1 + $0xca8] sm:$0xff]  ;;  %v3083_v27 = vpack.c.bf16 %v422_v17, %v421_v16 }
  0xbf   :  { %3072 = vmatpush3.bf16.msra.mxu1 %v3071_v51  ;;  %v471_v24 = vld [vmem:[%s5077_s1 + $0xda0] sm:$0xff]  ;;  %v472_v25 = vld [vmem:[%s5077_s1 + $0xda8] sm:$0xff]  ;;  %v3115_v28 = vpack.c.bf16 %v454_v20, %v453_v18  ;;  %v3085_v29 = vpack.c.bf16 %v440_v22, %v439_v21  ;;  %v441_v35 = vld [vmem:[%s5077_s1 + $0xcb0] sm:$0xff] }
  0xc0   :  { %3074 = vmatprep.subr.bf16.mxu1 %v3073_v56  ;;  %v424_v30 = vld [vmem:[%s5077_s1 + $0xc28] sm:$0xff]  ;;  %v455_v32 = vld [vmem:[%s5077_s1 + $0xd20] sm:$0xff]  ;;  %v3117_v42 = vpack.c.bf16 %v472_v25, %v471_v24  ;;  %v442_v36 = vld [vmem:[%s5077_s1 + $0xcb8] sm:$0xff] }
  0xc1   :  { %3044 = vmatpush3.bf16.msra.mxu0 %v3043_v62  ;;  %v473_v52 = vld [vmem:[%s5077_s1 + $0xdb0] sm:$0xff]  ;;  %v474_v37 = vld [vmem:[%s5077_s1 + $0xdb8] sm:$0xff]  ;;  %v3089_v40 = vpack.c.bf16 %v442_v36, %v441_v35  ;;  %v443_v48 = vld [vmem:[%s5077_s1 + $0xcc0] sm:$0xff] }
  0xc2   :  { %3078 = vmatprep.subr.bf16.mxu0 %v3077_v0  ;;  %v425_v41 = vld [vmem:[%s5077_s1 + $0xc30] sm:$0xff]  ;;  %v426_v43 = vld [vmem:[%s5077_s1 + $0xc38] sm:$0xff]  ;;  %v3121_v46 = vpack.c.bf16 %v474_v37, %v473_v52  ;;  %v444_v49 = vld [vmem:[%s5077_s1 + $0xcc8] sm:$0xff] }
  0xc3   :  { %3076 = vmatpush3.bf16.msra.mxu1 %v3075_v63  ;;  %v457_v44 = vld [vmem:[%s5077_s1 + $0xd30] sm:$0xff]  ;;  %v458_v47 = vld [vmem:[%s5077_s1 + $0xd38] sm:$0xff]  ;;  %v475_v50 = vld [vmem:[%s5077_s1 + $0xdc0] sm:$0xff]  ;;  %v3091_v53 = vpack.c.bf16 %v426_v43, %v425_v41  ;;  %v3093_v33 = vpack.c.bf16 %v444_v49, %v443_v48 }
  0xc4   :  { %3110 = vmatprep.subr.bf16.mxu1 %v3109_v4  ;;  %1495 = vmatmul.mubr.f32.vlgmr.msra.gmra.mrb[10].mxu0 %v4382_v31  ;;  %v423_v31 = vld [vmem:[%s5077_s1 + $0xc20] sm:$0xff]  ;;  %v476_v51 = vld [vmem:[%s5077_s1 + $0xdc8] sm:$0xff]  ;;  %v3123_v54 = vpack.c.bf16 %v458_v47, %v457_v44  ;;  %v445_v59 = vld [vmem:[%s5077_s1 + $0xcd0] sm:$0xff] }
  0xc5   :  { %3080 = vmatpush3.bf16.msra.mxu0 %v3079_v12  ;;  %1634 = vmatprep.mubr.f32.mxu0 %v679_v23  ;;  %v3087_v38 = vpack.c.bf16 %v424_v30, %v423_v31  ;;  %v427_v55 = vld [vmem:[%s5077_s1 + $0xc40] sm:$0xff]  ;;  %v428_v56 = vld [vmem:[%s5077_s1 + $0xc48] sm:$0xff]  ;;  %v3125_v45 = vpack.c.bf16 %v476_v51, %v475_v50  ;;  %v446_v60 = vld [vmem:[%s5077_s1 + $0xcd8] sm:$0xff] }
  0xc6   :  { %1565 = vmatmul.mubr.f32.vlgmr.msra.gmra.mrb[10].mxu1 %v4391_v34  ;;  %3082 = vmatprep.subr.bf16.mxu0 %v3081_v15  ;;  %v456_v34 = vld [vmem:[%s5077_s1 + $0xd28] sm:$0xff]  ;;  %v459_v57 = vld [vmem:[%s5077_s1 + $0xd40] sm:$0xff]  ;;  %v477_v61 = vld [vmem:[%s5077_s1 + $0xdd0] sm:$0xff]  ;;  %v3095_v63 = vpack.c.bf16 %v428_v56, %v427_v55  ;;  %v3097_v1 = vpack.c.bf16 %v446_v60, %v445_v59 }
  0xc7   :  { %3112 = vmatpush3.bf16.msra.mxu1 %v3111_v14  ;;  %1704 = vmatprep.mubr.f32.mxu1 %v680_v26  ;;  %v3119_v39 = vpack.c.bf16 %v456_v34, %v455_v32  ;;  %v460_v58 = vld [vmem:[%s5077_s1 + $0xd48] sm:$0xff]  ;;  %v478_v62 = vld [vmem:[%s5077_s1 + $0xdd8] sm:$0xff]  ;;  %v429_v2 = vld [vmem:[%s5077_s1 + $0xc50] sm:$0xff] }
  0xc8   :  { %3114 = vmatprep.subr.bf16.mxu1 %v3113_v19  ;;  %v3127_v0 = vpack.c.bf16 %v460_v58, %v459_v57  ;;  %v430_v3 = vld [vmem:[%s5077_s1 + $0xc58] sm:$0xff]  ;;  %v461_v4 = vld [vmem:[%s5077_s1 + $0xd50] sm:$0xff]  ;;  %v3129_v5 = vpack.c.bf16 %v478_v62, %v477_v61  ;;  %v447_v7 = vld [vmem:[%s5077_s1 + $0xce0] sm:$0xff] }
  0xc9   :  { %3084 = vmatpush3.bf16.msra.mxu0 %v3083_v27  ;;  %v462_v6 = vld [vmem:[%s5077_s1 + $0xd58] sm:$0xff]  ;;  %v448_v9 = vld [vmem:[%s5077_s1 + $0xce8] sm:$0xff]  ;;  %v479_v11 = vld [vmem:[%s5077_s1 + $0xde0] sm:$0xff]  ;;  %v3099_v14 = vpack.c.bf16 %v430_v3, %v429_v2 }
  0xca   :  { %3086 = vmatprep.subr.bf16.mxu0 %v3085_v29  ;;  %v480_v12 = vld [vmem:[%s5077_s1 + $0xde8] sm:$0xff]  ;;  %v3131_v15 = vpack.c.bf16 %v462_v6, %v461_v4  ;;  %v3101_v16 = vpack.c.bf16 %v448_v9, %v447_v7  ;;  %v431_v17 = vld [vmem:[%s5077_s1 + $0xc60] sm:$0xff]  ;;  %v449_v22 = vld [vmem:[%s5077_s1 + $0xcf0] sm:$0xff] }
  0xcb   :  { %3116 = vmatpush3.bf16.msra.mxu1 %v3115_v28  ;;  %v432_v18 = vld [vmem:[%s5077_s1 + $0xc68] sm:$0xff]  ;;  %v463_v19 = vld [vmem:[%s5077_s1 + $0xd60] sm:$0xff]  ;;  %v3133_v20 = vpack.c.bf16 %v480_v12, %v479_v11  ;;  %v450_v23 = vld [vmem:[%s5077_s1 + $0xcf8] sm:$0xff] }
  0xcc   :  { %3118 = vmatprep.subr.bf16.mxu1 %v3117_v42  ;;  %v464_v21 = vld [vmem:[%s5077_s1 + $0xd68] sm:$0xff]  ;;  %v481_v24 = vld [vmem:[%s5077_s1 + $0xdf0] sm:$0xff]  ;;  %v482_v25 = vld [vmem:[%s5077_s1 + $0xdf8] sm:$0xff]  ;;  %v3103_v26 = vpack.c.bf16 %v432_v18, %v431_v17  ;;  %v3105_v29 = vpack.c.bf16 %v450_v23, %v449_v22 }
  0xcd   :  { %3088 = vmatpush3.bf16.msra.mxu0 %v3087_v38  ;;  %v34_v27 = vld [vmem:[%s5076_s0 + $0x38] sm:$0xff]  ;;  %v3135_v28 = vpack.c.bf16 %v464_v21, %v463_v19  ;;  %v433_v31 = vld [vmem:[%s5077_s1 + $0xc70] sm:$0xff]  ;;  %v3137_v42 = vpack.c.bf16 %v482_v25, %v481_v24  ;;  %v499_v35 = vld [vmem:[%s5077_s1 + $0xe80] sm:$0xff] }
  0xce   :  { %3090 = vmatprep.subr.bf16.mxu0 %v3089_v40  ;;  %v434_v30 = vld [vmem:[%s5077_s1 + $0xc78] sm:$0xff]  ;;  %v465_v32 = vld [vmem:[%s5077_s1 + $0xd70] sm:$0xff]  ;;  %v500_v36 = vld [vmem:[%s5077_s1 + $0xe88] sm:$0xff]  ;;  %v681_v38 = vcombine.high %v34_v27, %v34_v27  ;;  %v4796_v51 = vrot.slane %v34_v27, %v3473_v13 }
  0xcf   :  { %3120 = vmatpush3.bf16.msra.mxu1 %v3119_v39  ;;  %v466_v34 = vld [vmem:[%s5077_s1 + $0xd78] sm:$0xff]  ;;  %v531_v52 = vld [vmem:[%s5077_s1 + $0xf80] sm:$0xff]  ;;  %v532_v37 = vld [vmem:[%s5077_s1 + $0xf88] sm:$0xff]  ;;  %v3107_v39 = vpack.c.bf16 %v434_v30, %v433_v31  ;;  %v3141_v41 = vpack.c.bf16 %v500_v36, %v499_v35 }
  0xd0   :  { %3122 = vmatprep.subr.bf16.mxu1 %v3121_v46  ;;  %v3139_v40 = vpack.c.bf16 %v466_v34, %v465_v32  ;;  %v483_v43 = vld [vmem:[%s5077_s1 + $0xe00] sm:$0xff]  ;;  %v484_v44 = vld [vmem:[%s5077_s1 + $0xe08] sm:$0xff]  ;;  %v3173_v47 = vpack.c.bf16 %v532_v37, %v531_v52  ;;  %v501_v49 = vld [vmem:[%s5077_s1 + $0xe90] sm:$0xff] }
  0xd1   :  { %3092 = vmatpush3.bf16.msra.mxu0 %v3091_v53  ;;  %v515_v46 = vld [vmem:[%s5077_s1 + $0xf00] sm:$0xff]  ;;  %v516_v48 = vld [vmem:[%s5077_s1 + $0xf08] sm:$0xff]  ;;  %v502_v50 = vld [vmem:[%s5077_s1 + $0xe98] sm:$0xff]  ;;  %v3143_v55 = vpack.c.bf16 %v484_v44, %v483_v43 }
  0xd2   :  { %3094 = vmatprep.subr.bf16.mxu0 %v3093_v33  ;;  %v533_v53 = vld [vmem:[%s5077_s1 + $0xf90] sm:$0xff]  ;;  %v4805_v33 = vrot.slane %v681_v38, %v3473_v13  ;;  %v3175_v56 = vpack.c.bf16 %v516_v48, %v515_v46  ;;  %v3145_v57 = vpack.c.bf16 %v502_v50, %v501_v49  ;;  %v486_v58 = vld [vmem:[%s5077_s1 + $0xe18] sm:$0xff]  ;;  %v503_v61 = vld [vmem:[%s5077_s1 + $0xea0] sm:$0xff] }
  0xd3   :  { %3124 = vmatpush3.bf16.msra.mxu1 %v3123_v54  ;;  %v534_v54 = vld [vmem:[%s5077_s1 + $0xf98] sm:$0xff]  ;;  %v517_v59 = vld [vmem:[%s5077_s1 + $0xf10] sm:$0xff]  ;;  %v504_v62 = vld [vmem:[%s5077_s1 + $0xea8] sm:$0xff] }
  0xd4   :  { %3126 = vmatprep.subr.bf16.mxu1 %v3125_v45  ;;  %v485_v45 = vld [vmem:[%s5077_s1 + $0xe10] sm:$0xff]  ;;  %v3177_v13 = vpack.c.bf16 %v534_v54, %v533_v53  ;;  %v518_v60 = vld [vmem:[%s5077_s1 + $0xf18] sm:$0xff]  ;;  %v697_v2 = vcombine.high %v4805_v33, %v4805_v33  ;;  %v488_v6 = vld [vmem:[%s5077_s1 + $0xe28] sm:$0xff] }
  0xd5   :  { %3096 = vmatpush3.bf16.msra.mxu0 %v3095_v63  ;;  %v696_v63 = vcombine.high %v4796_v51, %v4796_v51  ;;  %v3147_v3 = vpack.c.bf16 %v486_v58, %v485_v45  ;;  %v3179_v4 = vpack.c.bf16 %v518_v60, %v517_v59  ;;  %v519_v7 = vld [vmem:[%s5077_s1 + $0xf20] sm:$0xff]  ;;  %v505_v11 = vld [vmem:[%s5077_s1 + $0xeb0] sm:$0xff]  ;;  %v506_v12 = vld [vmem:[%s5077_s1 + $0xeb8] sm:$0xff] }
  0xd6   :  { %3098 = vmatprep.subr.bf16.mxu0 %v3097_v1  ;;  %v536_v1 = vld [vmem:[%s5077_s1 + $0xfa8] sm:$0xff]  ;;  %v3153_v18 = vpack.c.bf16 %v506_v12, %v505_v11  ;;  %v489_v19 = vld [vmem:[%s5077_s1 + $0xe30] sm:$0xff]  ;;  %v522_v23 = vld [vmem:[%s5077_s1 + $0xf38] sm:$0xff] }
  0xd7   :  { %3128 = vmatpush3.bf16.msra.mxu1 %v3127_v0  ;;  %v535_v0 = vld [vmem:[%s5077_s1 + $0xfa0] sm:$0xff]  ;;  %v521_v21 = vld [vmem:[%s5077_s1 + $0xf30] sm:$0xff]  ;;  %v508_v25 = vld [vmem:[%s5077_s1 + $0xec8] sm:$0xff] }
  0xd8   :  { %3130 = vmatprep.subr.bf16.mxu1 %v3129_v5  ;;  %v3149_v5 = vpack.c.bf16 %v504_v62, %v503_v61  ;;  %v3181_v9 = vpack.c.bf16 %v536_v1, %v535_v0  ;;  %v507_v24 = vld [vmem:[%s5077_s1 + $0xec0] sm:$0xff]  ;;  %v540_v27 = vld [vmem:[%s5077_s1 + $0xfc8] sm:$0xff]  ;;  %v509_v36 = vld [vmem:[%s5077_s1 + $0xed0] sm:$0xff] }
  0xd9   :  { %3100 = vmatpush3.bf16.msra.mxu0 %v3099_v14  ;;  %v537_v14 = vld [vmem:[%s5077_s1 + $0xfb0] sm:$0xff]  ;;  %v3157_v31 = vpack.c.bf16 %v508_v25, %v507_v24  ;;  %v491_v30 = vld [vmem:[%s5077_s1 + $0xe40] sm:$0xff]  ;;  %v492_v32 = vld [vmem:[%s5077_s1 + $0xe48] sm:$0xff] }
  0xda   :  { %3102 = vmatprep.subr.bf16.mxu0 %v3101_v16  ;;  %v524_v35 = vld [vmem:[%s5077_s1 + $0xf48] sm:$0xff]  ;;  %v510_v52 = vld [vmem:[%s5077_s1 + $0xed8] sm:$0xff]  ;;  %v541_v37 = vld [vmem:[%s5077_s1 + $0xfd0] sm:$0xff] }
  0xdb   :  { %3132 = vmatpush3.bf16.msra.mxu1 %v3131_v15  ;;  %v538_v15 = vld [vmem:[%s5077_s1 + $0xfb8] sm:$0xff]  ;;  %v493_v43 = vld [vmem:[%s5077_s1 + $0xe50] sm:$0xff]  ;;  %v511_v49 = vld [vmem:[%s5077_s1 + $0xee0] sm:$0xff] }
  0xdc   :  { %3134 = vmatprep.subr.bf16.mxu1 %v3133_v20  ;;  %v490_v20 = vld [vmem:[%s5077_s1 + $0xe38] sm:$0xff]  ;;  %v3185_v22 = vpack.c.bf16 %v538_v15, %v537_v14  ;;  %v525_v46 = vld [vmem:[%s5077_s1 + $0xf50] sm:$0xff]  ;;  %v512_v50 = vld [vmem:[%s5077_s1 + $0xee8] sm:$0xff] }
  0xdd   :  { %3104 = vmatpush3.bf16.msra.mxu0 %v3103_v26  ;;  %v539_v26 = vld [vmem:[%s5077_s1 + $0xfc0] sm:$0xff]  ;;  %v542_v38 = vld [vmem:[%s5077_s1 + $0xfd8] sm:$0xff]  ;;  %v544_v54 = vld [vmem:[%s5077_s1 + $0xfe8] sm:$0xff] }
  0xde   :  { %3106 = vmatprep.subr.bf16.mxu0 %v3105_v29  ;;  %v3187_v29 = vpack.c.bf16 %v522_v23, %v521_v21  ;;  %v3189_v34 = vpack.c.bf16 %v540_v27, %v539_v26  ;;  %v494_v44 = vld [vmem:[%s5077_s1 + $0xe58] sm:$0xff]  ;;  %v543_v53 = vld [vmem:[%s5077_s1 + $0xfe0] sm:$0xff]  ;;  %v496_v58 = vld [vmem:[%s5077_s1 + $0xe68] sm:$0xff] }
  0xdf   :  { %3136 = vmatpush3.bf16.msra.mxu1 %v3135_v28  ;;  %v3155_v28 = vpack.c.bf16 %v490_v20, %v489_v19  ;;  %v526_v48 = vld [vmem:[%s5077_s1 + $0xf58] sm:$0xff]  ;;  %v495_v45 = vld [vmem:[%s5077_s1 + $0xe60] sm:$0xff]  ;;  %v3197_v60 = vpack.c.bf16 %v544_v54, %v543_v53  ;;  %v528_v61 = vld [vmem:[%s5077_s1 + $0xf68] sm:$0xff] }
  0xe0   :  { %3138 = vmatprep.subr.bf16.mxu1 %v3137_v42  ;;  %v523_v42 = vld [vmem:[%s5077_s1 + $0xf40] sm:$0xff]  ;;  %v513_v62 = vld [vmem:[%s5077_s1 + $0xef0] sm:$0xff]  ;;  %v498_v12 = vld [vmem:[%s5077_s1 + $0xe78] sm:$0xff] }
  0xe1   :  { %3108 = vmatpush3.bf16.msra.mxu0 %v3107_v39  ;;  %v3159_v39 = vpack.c.bf16 %v492_v32, %v491_v30  ;;  %v527_v59 = vld [vmem:[%s5077_s1 + $0xf60] sm:$0xff]  ;;  %v497_v11 = vld [vmem:[%s5077_s1 + $0xe70] sm:$0xff] }
  0xe2   :  { %3142 = vmatprep.subr.bf16.mxu0 %v3141_v41  ;;  %v3161_v41 = vpack.c.bf16 %v510_v52, %v509_v36  ;;  %v2049_v0 = vld [vmem:[%s5078_s2] ss:$0 sm:$0xff]  ;;  %v3171_v19 = vpack.c.bf16 %v498_v12, %v497_v11  ;;  %v1853_v52 = vld [vmem:[%s5079_s3 + $0x10] sm:$0xff] }
  0xe3   :  { %3140 = vmatpush3.bf16.msra.mxu1 %v3139_v40  ;;  %v3191_v40 = vpack.c.bf16 %v524_v35, %v523_v42  ;;  %v1861_v54 = vld [vmem:[%s5079_s3 + $0x50] sm:$0xff]  ;;  %v1948_v12 = vld [vmem:[%s5081_s5 + $0x20] sm:$0xff] }
  0xe4   :  { %3174 = vmatprep.subr.bf16.mxu1 %v3173_v47  ;;  %1635 = vmatmul.mubr.f32.vlgmr.msra.gmra.mrb[12].mxu0 %v4589_v8  ;;  %v487_v8 = vld [vmem:[%s5077_s1 + $0xe20] sm:$0xff]  ;;  %v3193_v47 = vpack.c.bf16 %v542_v38, %v541_v37  ;;  %v3279_v37 = vmov 0.0|0.0  }
  0xe5   :  { %3144 = vmatpush3.bf16.msra.mxu0 %v3143_v55  ;;  %1774 = vmatprep.mubr.f32.mxu0 %v696_v63  ;;  %v3151_v16 = vpack.c.bf16 %v488_v6, %v487_v8  ;;  %v3163_v55 = vpack.c.bf16 %v494_v44, %v493_v43  ;;  %v514_v63 = vld [vmem:[%s5077_s1 + $0xef8] sm:$0xff]  ;;  %v3167_v6 = vpack.c.bf16 %v496_v58, %v495_v45  ;;  %v1856_v43 = vld [vmem:[%s5079_s3 + $0x28] sm:$0xff]  ;;  %v1863_v45 = vld [vmem:[%s5079_s3 + $0x60] sm:$0xff] }
  0xe6   :  { %1705 = vmatmul.mubr.f32.vlgmr.msra.gmra.mrb[12].mxu1 %v4598_v10  ;;  %3146 = vmatprep.subr.bf16.mxu0 %v3145_v57  ;;  %v520_v10 = vld [vmem:[%s5077_s1 + $0xf28] sm:$0xff]  ;;  %v3165_v57 = vpack.c.bf16 %v512_v50, %v511_v49  ;;  %v1859_v49 = vld [vmem:[%s5079_s3 + $0x40] sm:$0xff] }
  0xe7   :  { %3176 = vmatpush3.bf16.msra.mxu1 %v3175_v56  ;;  %1844 = vmatprep.mubr.f32.mxu1 %v697_v2  ;;  %v3183_v17 = vpack.c.bf16 %v520_v10, %v519_v7  ;;  %v3195_v56 = vpack.c.bf16 %v526_v48, %v525_v46  ;;  %v3169_v10 = vpack.c.bf16 %v514_v63, %v513_v62  ;;  %v1857_v46 = vld [vmem:[%s5079_s3 + $0x30] sm:$0xff]  ;;  %v1860_v50 = vld [vmem:[%s5079_s3 + $0x48] sm:$0xff] }
  0xe8   :  { %3178 = vmatprep.subr.bf16.mxu1 %v3177_v13  ;;  %v3218_v53 = vpack.c.bf16 %v1860_v50, %v1859_v49  ;;  %v1864_v58 = vld [vmem:[%s5079_s3 + $0x68] sm:$0xff]  ;;  %v1951_v49 = vld [vmem:[%s5081_s5 + $0x38] sm:$0xff] }
  0xe9   :  { %3148 = vmatpush3.bf16.msra.mxu0 %v3147_v3  ;;  %v545_v3 = vld [vmem:[%s5077_s1 + $0xff0] sm:$0xff] }
  0xea   :  { %3150 = vmatprep.subr.bf16.mxu0 %v3149_v5 }
  0xeb   :  { %3180 = vmatpush3.bf16.msra.mxu1 %v3179_v4  ;;  %v546_v4 = vld [vmem:[%s5077_s1 + $0xff8] sm:$0xff] }
  0xec   :  { %3182 = vmatprep.subr.bf16.mxu1 %v3181_v9  ;;  %v3199_v9 = vpack.c.bf16 %v528_v61, %v527_v59  ;;  %v3201_v15 = vpack.c.bf16 %v546_v4, %v545_v3 }
  0xed   :  { %3152 = vmatpush3.bf16.msra.mxu0 %v3151_v16  ;;  %v529_v16 = vld [vmem:[%s5077_s1 + $0xf70] sm:$0xff] }
  0xee   :  { %3154 = vmatprep.subr.bf16.mxu0 %v3153_v18 }
  0xef   :  { %3184 = vmatpush3.bf16.msra.mxu1 %v3183_v17  ;;  %v530_v17 = vld [vmem:[%s5077_s1 + $0xf78] sm:$0xff]  ;;  %s2041_s1 = sshll.u32 %s3282_s23, 4  ;;  %s2042_s1 = int_to_ptr.vmem [resolvable:$true] %s2041_s1 }
  0xf0   :  { %3186 = vmatprep.subr.bf16.mxu1 %v3185_v22  ;;  %v3203_v20 = vpack.c.bf16 %v530_v17, %v529_v16  ;;  %p3259_p1 = scmp.lt.s32.totalorder %s2042_s1, %s2042_s1 }
  0xf1   :  { %3156 = vmatpush3.bf16.msra.mxu0 %v3155_v28 }
  0xf2   :  { %3158 = vmatprep.subr.bf16.mxu0 %v3157_v31 }
  0xf3   :  { %3188 = vmatpush3.bf16.msra.mxu1 %v3187_v29 }
  0xf4   :  { %3190 = vmatprep.subr.bf16.mxu1 %v3189_v34 }
  0xf5   :  { %3160 = vmatpush3.bf16.msra.mxu0 %v3159_v39  ;;  %v1854_v39 = vld [vmem:[%s5079_s3 + $0x18] sm:$0xff] }
  0xf6   :  { %3162 = vmatprep.subr.bf16.mxu0 %v3161_v41  ;;  %v1855_v41 = vld [vmem:[%s5079_s3 + $0x20] sm:$0xff] }
  0xf7   :  { %3192 = vmatpush3.bf16.msra.mxu1 %v3191_v40  ;;  %v2085_v13 = vpop.f32.mrb[0].mxu0  ;;  %v3209_v40 = vpack.c.bf16 %v1854_v39, %v1853_v52  ;;  %v3212_v44 = vpack.c.bf16 %v1856_v43, %v1855_v41 }
  0xf8   :  { %3194 = vmatprep.subr.bf16.mxu1 %v3193_v47  ;;  %v2086_v1 = vpop.f32.mrb[1].mxu0  ;;  %v1858_v47 = vld [vmem:[%s5079_s3 + $0x38] sm:$0xff] }
  0xf9   :  { %v2120_v2 = vpop.f32.mrb[0].mxu1  ;;  %v2087_v5 = vadd.f32 %v2086_v1, %v2085_v13  ;;  %3164 = vmatpush3.bf16.msra.mxu0 %v3163_v55  ;;  %v3215_v48 = vpack.c.bf16 %v1858_v47, %v1857_v46  ;;  %v1862_v55 = vld [vmem:[%s5079_s3 + $0x58] sm:$0xff]  ;;  %v1865_v1 = vld [vmem:[%s5079_s3 + $0x70] sm:$0xff] }
  0xfa   :  { %v2121_v8 = vpop.f32.mrb[1].mxu1  ;;  %3166 = vmatprep.subr.bf16.mxu0 %v3165_v57 }
  0xfb   :  { %v2122_v7 = vadd.f32 %v2121_v8, %v2120_v2  ;;  %3196 = vmatpush3.bf16.msra.mxu1 %v3195_v56  ;;  %v797_v14 = vadd.f32 %v2087_v5, %v2049_v0  ;;  %v3221_v56 = vpack.c.bf16 %v1862_v55, %v1861_v54  ;;  %v1866_v2 = vld [vmem:[%s5079_s3 + $0x78] sm:$0xff]  ;;  %v3281_v5 = vmov 0.0   ;;  %v1944_v8 = vld [vmem:[%s5081_s5] sm:$0xff] }
  0xfc   :  { %3198 = vmatprep.subr.bf16.mxu1 %v3197_v60  ;;  %v3224_v60 = vpack.c.bf16 %v1864_v58, %v1863_v45  ;;  %v3227_v3 = vpack.c.bf16 %v1866_v2, %v1865_v1 }
  0xfd   :  { %v867_v18 = vadd.f32 %v2122_v7, %v797_v14  ;;  %3168 = vmatpush3.bf16.msra.mxu0 %v3167_v6  ;;  %v1945_v6 = vld [vmem:[%s5081_s5 + $0x8] sm:$0xff]  ;;  %v1946_v7 = vld [vmem:[%s5081_s5 + $0x10] sm:$0xff] }
  0xfe   :  { %3170 = vmatprep.subr.bf16.mxu0 %v3169_v10  ;;  %v1947_v10 = vld [vmem:[%s5081_s5 + $0x18] sm:$0xff]  ;;  %v1949_v14 = vld [vmem:[%s5081_s5 + $0x28] sm:$0xff] }
  0xff   :  { %3200 = vmatpush3.bf16.msra.mxu1 %v3199_v9  ;;  %v3230_v9 = vpack.c.bf16 %v1945_v6, %v1944_v8  ;;  %v3233_v11 = vpack.c.bf16 %v1947_v10, %v1946_v7 }
 0x100   :  { %3202 = vmatprep.subr.bf16.mxu1 %v3201_v15  ;;  %v3236_v15 = vpack.c.bf16 %v1949_v14, %v1948_v12 }
 0x101   :  { %3172 = vmatpush3.bf16.msra.mxu0 %v3171_v19 }
 0x102   :  { %3205 = vmatprep.subr.bf16.mxu0 %v3279_v37 }
 0x103   :  { %3204 = vmatpush3.bf16.msra.mxu1 %v3203_v20 }
 0x104   :  { %1775 = vmatmul.mubr.f32.vlgmr.msra.gmra.mrb[14].mxu0 %v4796_v51  ;;  %v1851_v51 = vld [vmem:[%s5079_s3] sm:$0xff]  ;;  %3229 = vmatprep.subr.bf16.mxu1 %v3279_v37 }
 0x105   :  { %2671 = vmatprep.mubr.msk.f32.mxu0 %vm3280_vm0, %v3281_v5 }
 0x106   :  { %1845 = vmatmul.mubr.f32.vlgmr.msra.gmra.mrb[14].mxu1 %v4805_v33  ;;  %v1852_v33 = vld [vmem:[%s5079_s3 + $0x8] sm:$0xff] }
 0x107   :  { %v3206_v38 = vpack.c.bf16 %v1852_v33, %v1851_v51  ;;  %2690 = vmatprep.mubr.msk.f32.mxu1 %vm3280_vm0, %v3281_v5  ;;  %3231 = vmatpush3.bf16.msra.mxu1 %v3230_v9 }
 0x108   :  { %3232 = vmatprep.subr.bf16.mxu1 %v3279_v37 }
 0x109   :  { %3207 = vmatpush3.bf16.msra.mxu0 %v3206_v38 }
 0x10a   :  { %3208 = vmatprep.subr.bf16.mxu0 %v3279_v37 }
 0x10b   :  { %3234 = vmatpush3.bf16.msra.mxu1 %v3233_v11 }
 0x10c   :  { %3235 = vmatprep.subr.bf16.mxu1 %v3279_v37 }
 0x10d   :  { %3210 = vmatpush3.bf16.msra.mxu0 %v3209_v40 }
 0x10e   :  { %3211 = vmatprep.subr.bf16.mxu0 %v3279_v37 }
 0x10f   :  { %3237 = vmatpush3.bf16.msra.mxu1 %v3236_v15 }
 0x110   :  { %3238 = vmatprep.subr.bf16.mxu1 %v3279_v37 }
 0x111   :  { %3213 = vmatpush3.bf16.msra.mxu0 %v3212_v44 }
 0x112   :  { %3214 = vmatprep.subr.bf16.mxu0 %v3279_v37 }
 0x115   :  { %3216 = vmatpush3.bf16.msra.mxu0 %v3215_v48  ;;  %v1950_v48 = vld [vmem:[%s5081_s5 + $0x30] sm:$0xff]  ;;  %s3254_s5 = scalar_lea.vmem %s2042_s1, 32 }
 0x116   :  { %3217 = vmatprep.subr.bf16.mxu0 %v3279_v37  ;;  %v3239_v50 = vpack.c.bf16 %v1951_v49, %v1950_v48  ;;  %p3255_p0 = scmp.ne.s32.totalorder %s2042_s1, %s3254_s5  ;;  %p3260_p2 = scmp.lt.s32.totalorder %s3254_s5, %s3254_s5 }
 0x117   :  { %v2155_v21 = vpop.f32.mrb[2].mxu0 }
 0x118   :  { %v2156_v22 = vpop.f32.mrb[3].mxu0  ;;  %3240 = vmatpush3.bf16.msra.mxu1 %v3239_v50  ;;  %p3261_p3 = por %p3260_p2, %p3259_p1 }
 0x119   :  { %v2190_v23 = vpop.f32.mrb[2].mxu1  ;;  %v2157_v24 = vadd.f32 %v2156_v22, %v2155_v21  ;;  %3219 = vmatpush3.bf16.msra.mxu0 %v3218_v53  ;;  %v2050_v53 = vld [vmem:[%s5080_s4] ss:$0 sm:$0xff] }
 0x11a   :  { %v2191_v25 = vpop.f32.mrb[3].mxu1  ;;  %3220 = vmatprep.subr.bf16.mxu0 %v3279_v37  ;;  %p3262_p4 = pnand %p3261_p3, %p3255_p0 }
 0x11b   :  { %v2192_v26 = vadd.f32 %v2191_v25, %v2190_v23  ;;  %v937_v27 = vadd.f32 %v2157_v24, %v867_v18 }
 0x11d   :  { %v1007_v28 = vadd.f32 %v2192_v26, %v937_v27  ;;  %3222 = vmatpush3.bf16.msra.mxu0 %v3221_v56 }
 0x11e   :  { %3223 = vmatprep.subr.bf16.mxu0 %v3279_v37 }
 0x121   :  { %3225 = vmatpush3.bf16.msra.mxu0 %v3224_v60 }
 0x122   :  { %3226 = vmatprep.subr.bf16.mxu0 %v3279_v37 }
 0x125   :  { %3228 = vmatpush3.bf16.msra.mxu0 %v3227_v3 }
 0x137   :  { %v2225_v29 = vpop.f32.mrb[4].mxu0 }
 0x138   :  { %v2226_v31 = vpop.f32.mrb[5].mxu0 }
 0x139   :  { %v2260_v30 = vpop.f32.mrb[4].mxu1  ;;  %v2227_v32 = vadd.f32 %v2226_v31, %v2225_v29 }
 0x13a   :  { %v2261_v42 = vpop.f32.mrb[5].mxu1 }
 0x13b   :  { %v2262_v34 = vadd.f32 %v2261_v42, %v2260_v30  ;;  %v1077_v35 = vadd.f32 %v2227_v32, %v1007_v28 }
 0x13d   :  { %v1147_v36 = vadd.f32 %v2262_v34, %v1077_v35 }
 0x157   :  { %v2295_v57 = vpop.f32.mrb[6].mxu0 }
 0x158   :  { %v2296_v59 = vpop.f32.mrb[7].mxu0 }
 0x159   :  { %v2330_v13 = vpop.f32.mrb[6].mxu1  ;;  %v2297_v61 = vadd.f32 %v2296_v59, %v2295_v57  ;;  %v2051_v57 = vld [vmem:[%s5082_s6] ss:$0 sm:$0xff] }
 0x15a   :  { %v2331_v62 = vpop.f32.mrb[7].mxu1 }
 0x15b   :  { %v2332_v63 = vadd.f32 %v2331_v62, %v2330_v13  ;;  %v1217_v0 = vadd.f32 %v2297_v61, %v1147_v36 }
 0x15d   :  { %v1287_v4 = vadd.f32 %v2332_v63, %v1217_v0 }
 0x177   :  { %v2365_v16 = vpop.f32.mrb[8].mxu0 }
 0x178   :  { %v2366_v17 = vpop.f32.mrb[9].mxu0 }
 0x179   :  { %v2400_v18 = vpop.f32.mrb[8].mxu1  ;;  %v2367_v19 = vadd.f32 %v2366_v17, %v2365_v16 }
 0x17a   :  { %v2401_v20 = vpop.f32.mrb[9].mxu1 }
 0x17b   :  { %v2402_v21 = vadd.f32 %v2401_v20, %v2400_v18  ;;  %v1357_v22 = vadd.f32 %v2367_v19, %v1287_v4 }
 0x17d   :  { %v1427_v23 = vadd.f32 %v2402_v21, %v1357_v22 }
 0x197   :  { %v2435_v24 = vpop.f32.mrb[10].mxu0 }
 0x198   :  { %v2436_v25 = vpop.f32.mrb[11].mxu0 }
 0x199   :  { %v2470_v26 = vpop.f32.mrb[10].mxu1  ;;  %v2437_v27 = vadd.f32 %v2436_v25, %v2435_v24 }
 0x19a   :  { %v2471_v28 = vpop.f32.mrb[11].mxu1 }
 0x19b   :  { %v2472_v29 = vadd.f32 %v2471_v28, %v2470_v26  ;;  %v1497_v31 = vadd.f32 %v2437_v27, %v1427_v23 }
 0x19d   :  { %v1567_v30 = vadd.f32 %v2472_v29, %v1497_v31 }
 0x1b7   :  { %v2505_v32 = vpop.f32.mrb[12].mxu0 }
 0x1b8   :  { %v2506_v42 = vpop.f32.mrb[13].mxu0 }
 0x1b9   :  { %v2540_v34 = vpop.f32.mrb[12].mxu1  ;;  %v2507_v35 = vadd.f32 %v2506_v42, %v2505_v32 }
 0x1ba   :  { %v2541_v36 = vpop.f32.mrb[13].mxu1 }
 0x1bb   :  { %v2542_v51 = vadd.f32 %v2541_v36, %v2540_v34  ;;  %v1637_v33 = vadd.f32 %v2507_v35, %v1567_v30 }
 0x1bd   :  { %v1707_v52 = vadd.f32 %v2542_v51, %v1637_v33 }
 0x1d7   :  { %v2575_v37 = vpop.f32.mrb[14].mxu0 }
 0x1d8   :  { %v2576_v38 = vpop.f32.mrb[15].mxu0 }
 0x1d9   :  { %v2610_v39 = vpop.f32.mrb[14].mxu1  ;;  %v2577_v40 = vadd.f32 %v2576_v38, %v2575_v37 }
 0x1da   :  { %v2611_v41 = vpop.f32.mrb[15].mxu1 }
 0x1db   :  { %v2612_v43 = vadd.f32 %v2611_v41, %v2610_v39  ;;  %v1777_v44 = vadd.f32 %v2577_v40, %v1707_v52 }
 0x1dd   :  { %v1847_v46 = vadd.f32 %v2612_v43, %v1777_v44 }
 0x1df   :  { %v1850_v47 = vmax.f32 %v1847_v46, 0.0 }
 0x1e1   :  { %2672 = vmatmul.mubr.f32.vlgmr.msra.gmra.mrb[16].mxu0 %v1850_v47 }
 0x2b4   :  { %v1940_v54 = vpop.f32.mrb[16].mxu0 }
 0x2b5   :  { %v1941_v55 = vadd.f32 %v2050_v53, %v1940_v54  ;;  %v2673_v56 = vpop.f32.mrb[17].mxu0 }
 0x2b7   :  { %2691 = vmatmul.mubr.msk.f32.vlgmr.msra.gmra.mrb[16].mxu1 %vm1959_vm1, %v1941_v55 }
 0x38a   :  { %v2029_v45 = vpop.f32.mrb[16].mxu1 }
 0x38b   :  { %v2030_v58 = vadd.f32 %v2051_v57, %v2029_v45  ;;  %v2692_v59 = vpop.f32.mrb[17].mxu1 }
 0x38d   :  { %2034 = vst.msk [vmem:[#allocation2] sm:$0x3] %vm2033_vm2, %v2030_v58 }
 0x38e   :  { %3265 = shalt.err (!%p3262_p4)
}
 0x38f   :  { %s3266_s25 = scalar_lea.hbm %s5083_s7, 32 }
 0x390   :  { %p3267_p5 = scmp.ne.s32.totalorder %s5083_s7, %s3266_s25  ;;  %p3270_p6 = scmp.lt.u32.totalorder %s3266_s25, %s5083_s7 }
 0x392   :  { %p3272_p7 = pnand %p3270_p6, %p3267_p5 }
 0x394   :  { %3275 = shalt.err (!%p3272_p7)
}
 0x395   :  { %2044 = dma.vmem_to_hbm [thread:$0]  %s2042_s1, 32, %s5083_s7, [#allocation3]  }
 0x396   :  { %3276 = dma.done.wait [#allocation3], 32  }
 0x397   :  { %3277 = vsyncadd [#allocation3], 4294967264 }
 0x398   :  { %2048 = vsyncpa [#allocation3], 1 }

// kernel: net_forward.2
= control target key start
LH: loop header
LB: loop body
LE: loop exit
PB: predicated region body
PF: predicated region fallthrough
CT: control target
= control target key end

     0   :  { %s6019_s18 = smov 0   ;;  %s7237_s0 = inlined_call_operand.vmem [shape: f32[2,256,36], index: 0, kind: input, shape index: {}]   ;;  %s7238_s1 = inlined_call_operand.vmem [shape: f32[36,32], index: 1, kind: input, shape index: {}]   ;;  %s7239_s2 = inlined_call_operand.vmem [shape: f32[1,32], index: 2, kind: input, shape index: {}]   ;;  %s7240_s3 = inlined_call_operand.vmem [shape: f32[9,32,64], index: 3, kind: input, shape index: {}]   ;;  %s7241_s4 = inlined_call_operand.vmem [shape: f32[1,64], index: 4, kind: input, shape index: {}]   ;;  %s7242_s5 = inlined_call_operand.vmem [shape: f32[2,64,64], index: 5, kind: output, shape index: {}]  }
   0x1 LB: > { %s4344_s19 = sadd.s32 4294967295, %s5986_s18   ;;  %p4348_p0 = scmp.ge.s32.totalorder %s5986_s18, 1  ;;  %s5986_s18 = sphi %s6019_s18, %s15_s18  }
   0x2   : > { %p187_p1 = scmp.lt.s32.totalorder %s5986_s18, 3 }
   0x4   : > { %p188_p2 = pnand %p4348_p0, %p187_p1 }
   0x6   : > { %191 = sbr.rel (%p188_p2) target bundleno = 800 (0x320), region = 40 }
   0xd   : > { %v257_v0 = vld [vmem:[%s7238_s1] sm:$0xff]  ;;  %v258_v1 = vld [vmem:[%s7238_s1 + $0x8] sm:$0xff]  ;;  %v259_v2 = vld [vmem:[%s7238_s1 + $0x10] sm:$0xff]  ;;  %p215_p3 = scmp.lt.s32.totalorder %s4344_s19, 1  ;;  %vm269_vm0 = vcmask 293888   ;;  %vm366_vm1 = vcmask 1043456  }
   0xe   : > { %v5635_v3 = vpack.c.bf16 %v258_v1, %v257_v0  ;;  %v260_v4 = vld [vmem:[%s7238_s1 + $0x18] sm:$0xff]  ;;  %v261_v6 = vld [vmem:[%s7238_s1 + $0x20] sm:$0xf]  ;;  %v4388_v40 = vld [vmem:[%s7240_s3 + $0x28] sm:$0xff]  ;;  %vm627_vm2 = vcmask 261120   ;;  %vm630_vm3 = vcmask 254976  }
   0xf   : > { %v5639_v5 = vpack.c.bf16 %v260_v4, %v259_v2  ;;  %s7356_s19 = smov (!%p215_p3, %s4344_s19), 1  ;;  %v4387_v39 = vld [vmem:[%s7240_s3 + $0x20] sm:$0xff]  ;;  %v5988_v42 = vmov 0.0   ;;  %v4528_v44 = vld [vmem:[%s7240_s3 + $0x88] sm:$0xff]  ;;  %v4389_v45 = vld [vmem:[%s7240_s3 + $0x30] sm:$0xff]  ;;  %vm4217_vm4 = vcmask 523264  }
  0x10   : > { %5636 = vmatprep.subr.bf16.mxu0 %v5635_v3  ;;  %s4710_s28 = sshll.u32 %s7356_s19, 8  ;;  %v5643_v41 = vpack.c.bf16 %v4388_v40, %v4387_v39  ;;  %633 = vst.msk [vmem:[#allocation2 + $0x20] sm:$0xff] %vm627_vm2, %v5988_v42  ;;  %628 = vst.msk [vmem:[#allocation2] sm:$0xff] %vm627_vm2, %v5988_v42  ;;  %v4527_v43 = vld [vmem:[%s7240_s3 + $0x80] sm:$0xff]  ;;  %v4390_v47 = vld [vmem:[%s7240_s3 + $0x38] sm:$0xff]  ;;  %s4711_s16 = sshll.u32 %s7356_s19, 6 }
  0x11   : > { %5638 = vmatpush3.bf16.msra.mxu0 %v5635_v3  ;;  %s6045_s6 = scalar_lea.vmem %s7237_s0, %s4710_s28  ;;  %629 = vst.msk [vmem:[#allocation2 + $0x8] sm:$0xff] %vm627_vm2, %v5988_v42  ;;  %632 = vst.msk [vmem:[#allocation2 + $0x18] sm:$0xff] %vm627_vm2, %v5988_v42  ;;  %v5675_v46 = vpack.c.bf16 %v4528_v44, %v4527_v43  ;;  %v5647_v48 = vpack.c.bf16 %v4390_v47, %v4389_v45  ;;  %v4529_v49 = vld [vmem:[%s7240_s3 + $0x90] sm:$0xff]  ;;  %v4530_v50 = vld [vmem:[%s7240_s3 + $0x98] sm:$0xff]  ;;  %s7158_s21 = scalar_lea.vmem %s7242_s5, %s4711_s16 }
  0x12   : > { %5640 = vmatprep.subr.bf16.mxu0 %v5639_v5  ;;  %v225_v7 = vld [vmem:[%s6045_s6] sm:$0xff]  ;;  %v226_v8 = vld [vmem:[%s6045_s6 + $0x8] sm:$0xff]  ;;  %v227_v9 = vld [vmem:[%s6045_s6 + $0x10] sm:$0xff]  ;;  %635 = vst.msk [vmem:[#allocation2 + $0x30] sm:$0xff] %vm627_vm2, %v5988_v42  ;;  %v5679_v52 = vpack.c.bf16 %v4530_v50, %v4529_v49 }
  0x13   : > { %5083 = vmatprep.mubr.msk.f32.mxu0 %vm269_vm0, %v225_v7  ;;  %v228_v10 = vld [vmem:[%s6045_s6 + $0x18] sm:$0xff]  ;;  %v229_v11 = vld [vmem:[%s6045_s6 + $0x20] sm:$0xff]  ;;  %v230_v12 = vld [vmem:[%s6045_s6 + $0x28] sm:$0xff]  ;;  %636 = vst.msk [vmem:[#allocation2 + $0x38] sm:$0xff] %vm627_vm2, %v5988_v42  ;;  %5676 = vmatprep.subr.bf16.mxu1 %v5675_v46 }
  0x14   : > { %v231_v13 = vld [vmem:[%s6045_s6 + $0x30] sm:$0xff]  ;;  %v232_v14 = vld [vmem:[%s6045_s6 + $0x38] sm:$0xff]  ;;  %v233_v15 = vld [vmem:[%s6045_s6 + $0x40] sm:$0xff]  ;;  %638 = vst.msk [vmem:[#allocation2 + $0x48] sm:$0xff] %vm627_vm2, %v5988_v42  ;;  %5678 = vmatpush3.bf16.msra.mxu1 %v5675_v46 }
  0x15   : > { %5642 = vmatpush3.bf16.msra.mxu0 %v5639_v5  ;;  %v234_v16 = vld [vmem:[%s6045_s6 + $0x48] sm:$0xff]  ;;  %v235_v17 = vld [vmem:[%s6045_s6 + $0x50] sm:$0xff]  ;;  %v236_v18 = vld [vmem:[%s6045_s6 + $0x58] sm:$0xff]  ;;  %639 = vst.msk [vmem:[#allocation2 + $0x50] sm:$0xff] %vm627_vm2, %v5988_v42  ;;  %5680 = vmatprep.subr.bf16.mxu1 %v5679_v52 }
  0x16   : > { %5081 = vmatprep.subr.msk.mxu0 %vm366_vm1, %v261_v6  ;;  %v237_v19 = vld [vmem:[%s6045_s6 + $0x60] sm:$0xff]  ;;  %v238_v20 = vld [vmem:[%s6045_s6 + $0x68] sm:$0xff]  ;;  %v239_v21 = vld [vmem:[%s6045_s6 + $0x70] sm:$0xff]  ;;  %641 = vst.msk [vmem:[#allocation2 + $0x60] sm:$0xff] %vm627_vm2, %v5988_v42 }
  0x17   : > { %v240_v22 = vld [vmem:[%s6045_s6 + $0x78] sm:$0xff]  ;;  %v241_v23 = vld [vmem:[%s6045_s6 + $0x80] sm:$0xff]  ;;  %v242_v24 = vld [vmem:[%s6045_s6 + $0x88] sm:$0xff]  ;;  %642 = vst.msk [vmem:[#allocation2 + $0x68] sm:$0xff] %vm627_vm2, %v5988_v42 }
  0x18   : > { %v243_v25 = vld [vmem:[%s6045_s6 + $0x90] sm:$0xff]  ;;  %v244_v26 = vld [vmem:[%s6045_s6 + $0x98] sm:$0xff]  ;;  %v245_v27 = vld [vmem:[%s6045_s6 + $0xa0] sm:$0xff]  ;;  %644 = vst.msk [vmem:[#allocation2 + $0x78] sm:$0xff] %vm627_vm2, %v5988_v42  ;;  %5682 = vmatpush3.bf16.msra.mxu1 %v5679_v52 }
  0x19   : > { %5082 = vmatpush3.msk.msra.mxu0 %vm366_vm1, %v261_v6  ;;  %v246_v28 = vld [vmem:[%s6045_s6 + $0xa8] sm:$0xff]  ;;  %v247_v29 = vld [vmem:[%s6045_s6 + $0xb0] sm:$0xff]  ;;  %v248_v30 = vld [vmem:[%s6045_s6 + $0xb8] sm:$0xff]  ;;  %645 = vst.msk [vmem:[#allocation2 + $0x80] sm:$0xff] %vm627_vm2, %v5988_v42 }
  0x1a   : > { %5084 = vmatmul.mubr.msk.f32.vlgmr.msra.gmra.mrb[0].mxu0 %vm269_vm0, %v226_v8  ;;  %v249_v31 = vld [vmem:[%s6045_s6 + $0xc0] sm:$0xff]  ;;  %v250_v32 = vld [vmem:[%s6045_s6 + $0xc8] sm:$0xff]  ;;  %v251_v33 = vld [vmem:[%s6045_s6 + $0xd0] sm:$0xff]  ;;  %647 = vst.msk [vmem:[#allocation2 + $0x90] sm:$0xff] %vm627_vm2, %v5988_v42  ;;  %5644 = vmatprep.subr.bf16.mxu0 %v5643_v41 }
  0x1b   : > { %5086 = vmatprep.mubr.msk.f32.mxu0 %vm269_vm0, %v227_v9  ;;  %v252_v34 = vld [vmem:[%s6045_s6 + $0xd8] sm:$0xff]  ;;  %v253_v35 = vld [vmem:[%s6045_s6 + $0xe0] sm:$0xff]  ;;  %v254_v36 = vld [vmem:[%s6045_s6 + $0xe8] sm:$0xff]  ;;  %648 = vst.msk [vmem:[#allocation2 + $0x98] sm:$0xff] %vm627_vm2, %v5988_v42  ;;  %5646 = vmatpush3.bf16.msra.mxu0 %v5643_v41 }
  0x1c   : > { %v255_v37 = vld [vmem:[%s6045_s6 + $0xf0] sm:$0xff]  ;;  %v256_v38 = vld [vmem:[%s6045_s6 + $0xf8] sm:$0xff]  ;;  %650 = vst.msk [vmem:[#allocation2 + $0xa8] sm:$0xff] %vm627_vm2, %v5988_v42  ;;  %651 = vst.msk [vmem:[#allocation2 + $0xb0] sm:$0xff] %vm627_vm2, %v5988_v42  ;;  %5648 = vmatprep.subr.bf16.mxu0 %v5647_v48 }
  0x1d   : > { %653 = vst.msk [vmem:[#allocation2 + $0xc0] sm:$0xff] %vm627_vm2, %v5988_v42  ;;  %654 = vst.msk [vmem:[#allocation2 + $0xc8] sm:$0xff] %vm627_vm2, %v5988_v42  ;;  %v752_v51 = vld [vmem:[#allocation2 + $0x1] sm:$0xff]  ;;  %v750_v60 = vld [vmem:[%s7240_s3 + $0x10] sm:$0xff] }
  0x1e   : > { %5087 = vmatmul.mubr.msk.f32.gmra.mrb[2].mxu0 %vm269_vm0, %v228_v10  ;;  %656 = vst.msk [vmem:[#allocation2 + $0xd8] sm:$0xff] %vm627_vm2, %v5988_v42  ;;  %657 = vst.msk [vmem:[#allocation2 + $0xe0] sm:$0xff] %vm627_vm2, %v5988_v42  ;;  %v4563_v54 = vld [vmem:[%s7240_s3 + $0xa0] sm:$0xff]  ;;  %v4564_v55 = vld [vmem:[%s7240_s3 + $0xa8] sm:$0xff] }
  0x1f   : > { %5089 = vmatprep.mubr.msk.f32.mxu0 %vm269_vm0, %v229_v11  ;;  %659 = vst.msk [vmem:[#allocation2 + $0xf0] sm:$0xff] %vm627_vm2, %v5988_v42  ;;  %660 = vst.msk [vmem:[#allocation2 + $0xf8] sm:$0xff] %vm627_vm2, %v5988_v42  ;;  %5650 = vmatpush3.bf16.msra.mxu0 %v5647_v48  ;;  %v5683_v56 = vpack.c.bf16 %v4564_v55, %v4563_v54  ;;  %v748_v57 = vld [vmem:[%s7240_s3] sm:$0xff]  ;;  %v749_v58 = vld [vmem:[%s7240_s3 + $0x8] sm:$0xff] }
  0x20   : > { %662 = vst.msk [vmem:[#allocation2 + $0x108] sm:$0xff] %vm627_vm2, %v5988_v42  ;;  %663 = vst.msk [vmem:[#allocation2 + $0x110] sm:$0xff] %vm627_vm2, %v5988_v42  ;;  %v5651_v59 = vpack.c.bf16 %v749_v58, %v748_v57  ;;  %v751_v61 = vld [vmem:[%s7240_s3 + $0x18] sm:$0xff]  ;;  %v6215_v63 = vld [vmem:[%s7239_s2] ss:$0 sm:$0xff] }
  0x21   : > { %665 = vst.msk [vmem:[#allocation2 + $0x120] sm:$0xff] %vm627_vm2, %v5988_v42  ;;  %666 = vst.msk [vmem:[#allocation2 + $0x128] sm:$0xff] %vm627_vm2, %v5988_v42  ;;  %5684 = vmatprep.subr.bf16.mxu1 %v5683_v56  ;;  %v5655_v62 = vpack.c.bf16 %v751_v61, %v750_v60  ;;  %v4455_v3 = vld [vmem:[%s7240_s3 + $0x40] sm:$0xff]  ;;  %v4456_v4 = vld [vmem:[%s7240_s3 + $0x48] sm:$0xff] }
  0x22   : > { %5090 = vmatmul.mubr.msk.f32.gmra.mrb[4].mxu0 %vm269_vm0, %v230_v12  ;;  %668 = vst.msk [vmem:[#allocation2 + $0x138] sm:$0xff] %vm627_vm2, %v5988_v42  ;;  %669 = vst.msk [vmem:[#allocation2 + $0x140] sm:$0xff] %vm627_vm2, %v5988_v42  ;;  %5652 = vmatprep.subr.bf16.mxu0 %v5651_v59  ;;  %v6225_v6 = vpack.c.bf16 %v4456_v4, %v4455_v3 }
  0x23   : > { %5092 = vmatprep.mubr.msk.f32.mxu0 %vm269_vm0, %v231_v13  ;;  %671 = vst.msk [vmem:[#allocation2 + $0x150] sm:$0xff] %vm627_vm2, %v5988_v42  ;;  %672 = vst.msk [vmem:[#allocation2 + $0x158] sm:$0xff] %vm627_vm2, %v5988_v42 }
  0x24   : > { %674 = vst.msk [vmem:[#allocation2 + $0x168] sm:$0xff] %vm627_vm2, %v5988_v42  ;;  %675 = vst.msk [vmem:[#allocation2 + $0x170] sm:$0xff] %vm627_vm2, %v5988_v42 }
  0x25   : > { %677 = vst.msk [vmem:[#allocation2 + $0x180] sm:$0xff] %vm627_vm2, %v5988_v42  ;;  %678 = vst.msk [vmem:[#allocation2 + $0x188] sm:$0xff] %vm627_vm2, %v5988_v42 }
  0x26   : > { %5093 = vmatmul.mubr.msk.f32.gmra.mrb[6].mxu0 %vm269_vm0, %v232_v14  ;;  %680 = vst.msk [vmem:[#allocation2 + $0x198] sm:$0xff] %vm627_vm2, %v5988_v42  ;;  %681 = vst.msk [vmem:[#allocation2 + $0x1a0] sm:$0xff] %vm627_vm2, %v5988_v42 }
  0x27   : > { %5095 = vmatprep.mubr.msk.f32.mxu0 %vm269_vm0, %v233_v15  ;;  %634 = vst.msk [vmem:[#allocation2 + $0x28] sm:$0x3] %vm630_vm3, %v5988_v42  ;;  %631 = vst.msk [vmem:[#allocation2 + $0x10] sm:$0x3] %vm630_vm3, %v5988_v42 }
  0x28   : > { %637 = vst.msk [vmem:[#allocation2 + $0x40] sm:$0x3] %vm630_vm3, %v5988_v42  ;;  %640 = vst.msk [vmem:[#allocation2 + $0x58] sm:$0x3] %vm630_vm3, %v5988_v42 }
  0x29   : > { %643 = vst.msk [vmem:[#allocation2 + $0x70] sm:$0x3] %vm630_vm3, %v5988_v42  ;;  %646 = vst.msk [vmem:[#allocation2 + $0x88] sm:$0x3] %vm630_vm3, %v5988_v42 }
  0x2a   : > { %5096 = vmatmul.mubr.msk.f32.gmra.mrb[8].mxu0 %vm269_vm0, %v234_v16  ;;  %649 = vst.msk [vmem:[#allocation2 + $0xa0] sm:$0x3] %vm630_vm3, %v5988_v42  ;;  %652 = vst.msk [vmem:[#allocation2 + $0xb8] sm:$0x3] %vm630_vm3, %v5988_v42 }
  0x2b   : > { %5098 = vmatprep.mubr.msk.f32.mxu0 %vm269_vm0, %v235_v17  ;;  %655 = vst.msk [vmem:[#allocation2 + $0xd0] sm:$0x3] %vm630_vm3, %v5988_v42  ;;  %658 = vst.msk [vmem:[#allocation2 + $0xe8] sm:$0x3] %vm630_vm3, %v5988_v42 }
  0x2c   : > { %661 = vst.msk [vmem:[#allocation2 + $0x100] sm:$0x3] %vm630_vm3, %v5988_v42  ;;  %664 = vst.msk [vmem:[#allocation2 + $0x118] sm:$0x3] %vm630_vm3, %v5988_v42 }
  0x2d   : > { %667 = vst.msk [vmem:[#allocation2 + $0x130] sm:$0x3] %vm630_vm3, %v5988_v42  ;;  %670 = vst.msk [vmem:[#allocation2 + $0x148] sm:$0x3] %vm630_vm3, %v5988_v42 }
  0x2e   : > { %5099 = vmatmul.mubr.msk.f32.gmra.mrb[10].mxu0 %vm269_vm0, %v236_v18  ;;  %673 = vst.msk [vmem:[#allocation2 + $0x160] sm:$0x3] %vm630_vm3, %v5988_v42  ;;  %676 = vst.msk [vmem:[#allocation2 + $0x178] sm:$0x3] %vm630_vm3, %v5988_v42  ;;  %v753_v53 = vld [vmem:[#allocation2 + $0x9] sm:$0xff] }
  0x2f   : > { %5101 = vmatprep.mubr.msk.f32.mxu0 %vm269_vm0, %v237_v19  ;;  %679 = vst.msk [vmem:[#allocation2 + $0x190] sm:$0x3] %vm630_vm3, %v5988_v42  ;;  %682 = vst.msk [vmem:[#allocation2 + $0x1a8] sm:$0x3] %vm630_vm3, %v5988_v42  ;;  %v4565_v19 = vld [vmem:[%s7240_s3 + $0xb0] sm:$0xff] }
  0x32   : > { %5102 = vmatmul.mubr.msk.f32.gmra.mrb[12].mxu0 %vm269_vm0, %v238_v20  ;;  %v4566_v20 = vld [vmem:[%s7240_s3 + $0xb8] sm:$0xff] }
  0x33   : > { %5104 = vmatprep.mubr.msk.f32.mxu0 %vm269_vm0, %v239_v21 }
  0x36   : > { %5105 = vmatmul.mubr.msk.f32.gmra.mrb[14].mxu0 %vm269_vm0, %v240_v22 }
  0x37   : > { %5107 = vmatprep.mubr.msk.f32.mxu0 %vm269_vm0, %v241_v23 }
  0x3a   : > { %5108 = vmatmul.mubr.msk.f32.gmra.mrb[16].mxu0 %vm269_vm0, %v242_v24 }
  0x3b   : > { %5110 = vmatprep.mubr.msk.f32.mxu0 %vm269_vm0, %v243_v25 }
  0x3e   : > { %5111 = vmatmul.mubr.msk.f32.gmra.mrb[18].mxu0 %vm269_vm0, %v244_v26 }
  0x3f   : > { %5113 = vmatprep.mubr.msk.f32.mxu0 %vm269_vm0, %v245_v27  ;;  %v5687_v27 = vpack.c.bf16 %v4566_v20, %v4565_v19 }
  0x42   : > { %5114 = vmatmul.mubr.msk.f32.gmra.mrb[20].mxu0 %vm269_vm0, %v246_v28 }
  0x43   : > { %5116 = vmatprep.mubr.msk.f32.mxu0 %vm269_vm0, %v247_v29 }
  0x46   : > { %5117 = vmatmul.mubr.msk.f32.gmra.mrb[22].mxu0 %vm269_vm0, %v248_v30  ;;  %v4599_v30 = vld [vmem:[%s7240_s3 + $0xc0] sm:$0xff] }
  0x47   : > { %5119 = vmatprep.mubr.msk.f32.mxu0 %vm269_vm0, %v249_v31  ;;  %v4600_v31 = vld [vmem:[%s7240_s3 + $0xc8] sm:$0xff] }
  0x4a   : > { %5120 = vmatmul.mubr.msk.f32.gmra.mrb[24].mxu0 %vm269_vm0, %v250_v32 }
  0x4b   : > { %5122 = vmatprep.mubr.msk.f32.mxu0 %vm269_vm0, %v251_v33 }
  0x4e   : > { %5123 = vmatmul.mubr.msk.f32.gmra.mrb[26].mxu0 %vm269_vm0, %v252_v34 }
  0x4f   : > { %5125 = vmatprep.mubr.msk.f32.mxu0 %vm269_vm0, %v253_v35 }
  0x52   : > { %5126 = vmatmul.mubr.msk.f32.gmra.mrb[28].mxu0 %vm269_vm0, %v254_v36 }
  0x53   : > { %5128 = vmatprep.mubr.msk.f32.mxu0 %vm269_vm0, %v255_v37 }
  0x56   : > { %5129 = vmatmul.mubr.msk.f32.gmra.mrb[30].mxu0 %vm269_vm0, %v256_v38  ;;  %v6258_v38 = vpack.c.bf16 %v4600_v31, %v4599_v30 }
  0x57   : > { %5139 = vmatprep.mubr.msk.f32.mxu0 %vm627_vm2, %v752_v51 }
  0x5a   : > { %5140 = vmatmul.mubr.msk.f32.vlgmr.msra.gmra.mrb[32].mxu0 %vm627_vm2, %v753_v53 }
  0x5b   : > { %5654 = vmatpush3.bf16.msra.mxu0 %v5651_v59 }
  0x5c   : > { %5656 = vmatprep.subr.bf16.mxu0 %v5655_v62 }
  0x5f   : > { %5658 = vmatpush3.bf16.msra.mxu0 %v5655_v62 }
  0x60   : > { %5660 = vmatprep.subr.bf16.mxu0 %v6225_v6 }
  0xed   : > { %v5085_v0 = vpop.f32.mrb[0].mxu0 }
  0xee   : > { %v442_v1 = vadd.f32 %v5085_v0, %v6215_v63  ;;  %v436_v2 = vpop.f32.mrb[1].mxu0 }
  0xef   : > { %v437_v5 = vadd.f32 %v6215_v63, %v436_v2 }
  0xf0   : > { %v596_v7 = vmax.f32 %v442_v1, 0.0 }
  0xf1   : > { %v595_v8 = vmax.f32 %v437_v5, 0.0  ;;  %v5088_v9 = vpop.f32.mrb[2].mxu0 }
  0xf2   : > { %685 = vst.msk [vmem:[#allocation2 + $0x21] sm:$0xff] %vm627_vm2, %v596_v7  ;;  %v452_v10 = vadd.f32 %v5088_v9, %v6215_v63  ;;  %v446_v11 = vpop.f32.mrb[3].mxu0 }
  0xf3   : > { %684 = vst.msk [vmem:[#allocation2 + $0x19] sm:$0xff] %vm627_vm2, %v595_v8  ;;  %v447_v12 = vadd.f32 %v6215_v63, %v446_v11 }
  0xf4   : > { %v598_v13 = vmax.f32 %v452_v10, 0.0 }
  0xf5   : > { %v597_v14 = vmax.f32 %v447_v12, 0.0  ;;  %v5091_v15 = vpop.f32.mrb[4].mxu0 }
  0xf6   : > { %687 = vst.msk [vmem:[#allocation2 + $0x39] sm:$0xff] %vm627_vm2, %v598_v13  ;;  %v462_v16 = vadd.f32 %v5091_v15, %v6215_v63  ;;  %v456_v17 = vpop.f32.mrb[5].mxu0 }
  0xf7   : > { %686 = vst.msk [vmem:[#allocation2 + $0x31] sm:$0xff] %vm627_vm2, %v597_v14  ;;  %v457_v18 = vadd.f32 %v6215_v63, %v456_v17 }
  0xf8   : > { %v600_v21 = vmax.f32 %v462_v16, 0.0 }
  0xf9   : > { %v599_v22 = vmax.f32 %v457_v18, 0.0  ;;  %v5094_v23 = vpop.f32.mrb[6].mxu0  ;;  %v755_v29 = vld [vmem:[#allocation2 + $0x21] sm:$0xff] }
  0xfa   : > { %689 = vst.msk [vmem:[#allocation2 + $0x51] sm:$0xff] %vm627_vm2, %v600_v21  ;;  %v472_v24 = vadd.f32 %v5094_v23, %v6215_v63  ;;  %v466_v25 = vpop.f32.mrb[7].mxu0  ;;  %v754_v26 = vld [vmem:[#allocation2 + $0x19] sm:$0xff] }
  0xfb   : > { %688 = vst.msk [vmem:[#allocation2 + $0x49] sm:$0xff] %vm627_vm2, %v599_v22  ;;  %v467_v28 = vadd.f32 %v6215_v63, %v466_v25  ;;  %5142 = vmatprep.mubr.msk.f32.mxu0 %vm627_vm2, %v754_v26  ;;  %5363 = vmatprep.mubr.msk.f32.mxu1 %vm627_vm2, %v754_v26 }
  0xfc   : > { %v602_v32 = vmax.f32 %v472_v24, 0.0  ;;  %5143 = vmatmul.mubr.msk.f32.gmra.mrb[34].mxu0 %vm627_vm2, %v755_v29  ;;  %5364 = vmatmul.mubr.msk.f32.vlgmr.msra.gmra.mrb[0].mxu1 %vm627_vm2, %v755_v29 }
  0xfd   : > { %v601_v33 = vmax.f32 %v467_v28, 0.0  ;;  %5686 = vmatpush3.bf16.msra.mxu1 %v5683_v56  ;;  %v5097_v34 = vpop.f32.mrb[8].mxu0  ;;  %v757_v40 = vld [vmem:[#allocation2 + $0x39] sm:$0xff] }
  0xfe   : > { %691 = vst.msk [vmem:[#allocation2 + $0x69] sm:$0xff] %vm627_vm2, %v602_v32  ;;  %v482_v35 = vadd.f32 %v5097_v34, %v6215_v63  ;;  %v476_v36 = vpop.f32.mrb[9].mxu0  ;;  %v756_v37 = vld [vmem:[#allocation2 + $0x31] sm:$0xff]  ;;  %5688 = vmatprep.subr.bf16.mxu1 %v5687_v27 }
  0xff   : > { %690 = vst.msk [vmem:[#allocation2 + $0x61] sm:$0xff] %vm627_vm2, %v601_v33  ;;  %v477_v39 = vadd.f32 %v6215_v63, %v476_v36  ;;  %5145 = vmatprep.mubr.msk.f32.mxu0 %vm627_vm2, %v756_v37  ;;  %5366 = vmatprep.mubr.msk.f32.mxu1 %vm627_vm2, %v756_v37 }
 0x100   : > { %v604_v41 = vmax.f32 %v482_v35, 0.0  ;;  %5146 = vmatmul.mubr.msk.f32.gmra.mrb[36].mxu0 %vm627_vm2, %v757_v40  ;;  %5367 = vmatmul.mubr.msk.f32.gmra.mrb[2].mxu1 %vm627_vm2, %v757_v40 }
 0x101   : > { %v603_v42 = vmax.f32 %v477_v39, 0.0  ;;  %v5100_v43 = vpop.f32.mrb[10].mxu0  ;;  %5690 = vmatpush3.bf16.msra.mxu1 %v5687_v27  ;;  %v759_v48 = vld [vmem:[#allocation2 + $0x51] sm:$0xff] }
 0x102   : > { %693 = vst.msk [vmem:[#allocation2 + $0x81] sm:$0xff] %vm627_vm2, %v604_v41  ;;  %v492_v44 = vadd.f32 %v5100_v43, %v6215_v63  ;;  %v486_v45 = vpop.f32.mrb[11].mxu0  ;;  %v758_v46 = vld [vmem:[#allocation2 + $0x49] sm:$0xff]  ;;  %5692 = vmatprep.subr.bf16.mxu1 %v6258_v38 }
 0x103   : > { %692 = vst.msk [vmem:[#allocation2 + $0x79] sm:$0xff] %vm627_vm2, %v603_v42  ;;  %v487_v47 = vadd.f32 %v6215_v63, %v486_v45  ;;  %5148 = vmatprep.mubr.msk.f32.mxu0 %vm627_vm2, %v758_v46  ;;  %5369 = vmatprep.mubr.msk.f32.mxu1 %vm627_vm2, %v758_v46 }
 0x104   : > { %v606_v49 = vmax.f32 %v492_v44, 0.0  ;;  %5149 = vmatmul.mubr.msk.f32.gmra.mrb[38].mxu0 %vm627_vm2, %v759_v48  ;;  %5370 = vmatmul.mubr.msk.f32.gmra.mrb[4].mxu1 %vm627_vm2, %v759_v48 }
 0x105   : > { %v605_v50 = vmax.f32 %v487_v47, 0.0  ;;  %v5103_v51 = vpop.f32.mrb[12].mxu0  ;;  %v6285_v56 = vld [vmem:[#allocation2 + $0x69] sm:$0xff] }
 0x106   : > { %695 = vst.msk [vmem:[#allocation2 + $0x99] sm:$0xff] %vm627_vm2, %v606_v49  ;;  %v502_v52 = vadd.f32 %v5103_v51, %v6215_v63  ;;  %v496_v53 = vpop.f32.mrb[13].mxu0  ;;  %v6277_v54 = vld [vmem:[#allocation2 + $0x61] sm:$0xff]  ;;  %7284 = vst [vmem:[#allocation5_spill] sm:$0xff] %v6285_v56 }
 0x107   : > { %7283 = vst [vmem:[#allocation4_spill] sm:$0xff] %v6277_v54  ;;  %694 = vst.msk [vmem:[#allocation2 + $0x91] sm:$0xff] %vm627_vm2, %v605_v50  ;;  %v497_v55 = vadd.f32 %v6215_v63, %v496_v53  ;;  %5151 = vmatprep.mubr.msk.f32.mxu0 %vm627_vm2, %v6277_v54  ;;  %5372 = vmatprep.mubr.msk.f32.mxu1 %vm627_vm2, %v6277_v54 }
 0x108   : > { %v608_v57 = vmax.f32 %v502_v52, 0.0  ;;  %5152 = vmatmul.mubr.msk.f32.gmra.mrb[40].mxu0 %vm627_vm2, %v6285_v56  ;;  %5373 = vmatmul.mubr.msk.f32.gmra.mrb[6].mxu1 %vm627_vm2, %v6285_v56 }
 0x109   : > { %v607_v58 = vmax.f32 %v497_v55, 0.0  ;;  %v5106_v59 = vpop.f32.mrb[14].mxu0  ;;  %v6301_v1 = vld [vmem:[#allocation2 + $0x81] sm:$0xff] }
 0x10a   : > { %697 = vst.msk [vmem:[#allocation2 + $0xb1] sm:$0xff] %vm627_vm2, %v608_v57  ;;  %v512_v60 = vadd.f32 %v5106_v59, %v6215_v63  ;;  %v506_v61 = vpop.f32.mrb[15].mxu0  ;;  %v6293_v62 = vld [vmem:[#allocation2 + $0x79] sm:$0xff]  ;;  %7286 = vst [vmem:[#allocation7_spill] sm:$0xff] %v6301_v1 }
 0x10b   : > { %7285 = vst [vmem:[#allocation6_spill] sm:$0xff] %v6293_v62  ;;  %696 = vst.msk [vmem:[#allocation2 + $0xa9] sm:$0xff] %vm627_vm2, %v607_v58  ;;  %v507_v0 = vadd.f32 %v6215_v63, %v506_v61  ;;  %5154 = vmatprep.mubr.msk.f32.mxu0 %vm627_vm2, %v6293_v62  ;;  %5375 = vmatprep.mubr.msk.f32.mxu1 %vm627_vm2, %v6293_v62 }
 0x10c   : > { %v610_v2 = vmax.f32 %v512_v60, 0.0  ;;  %5155 = vmatmul.mubr.msk.f32.gmra.mrb[42].mxu0 %vm627_vm2, %v6301_v1  ;;  %5376 = vmatmul.mubr.msk.f32.gmra.mrb[8].mxu1 %vm627_vm2, %v6301_v1  ;;  %v1431_v1 = vld [vmem:[#allocation2 + $0x2] sm:$0xff] }
 0x10d   : > { %v609_v3 = vmax.f32 %v507_v0, 0.0  ;;  %v5109_v4 = vpop.f32.mrb[16].mxu0  ;;  %v6317_v10 = vld [vmem:[#allocation2 + $0x99] sm:$0xff] }
 0x10e   : > { %699 = vst.msk [vmem:[#allocation2 + $0xc9] sm:$0xff] %vm627_vm2, %v610_v2  ;;  %v522_v5 = vadd.f32 %v5109_v4, %v6215_v63  ;;  %v516_v7 = vpop.f32.mrb[17].mxu0  ;;  %v6309_v8 = vld [vmem:[#allocation2 + $0x91] sm:$0xff]  ;;  %7288 = vst [vmem:[#allocation9_spill] sm:$0xff] %v6317_v10 }
 0x10f   : > { %7287 = vst [vmem:[#allocation8_spill] sm:$0xff] %v6309_v8  ;;  %698 = vst.msk [vmem:[#allocation2 + $0xc1] sm:$0xff] %vm627_vm2, %v609_v3  ;;  %v517_v9 = vadd.f32 %v6215_v63, %v516_v7  ;;  %5157 = vmatprep.mubr.msk.f32.mxu0 %vm627_vm2, %v6309_v8  ;;  %5378 = vmatprep.mubr.msk.f32.mxu1 %vm627_vm2, %v6309_v8 }
 0x110   : > { %v612_v11 = vmax.f32 %v522_v5, 0.0  ;;  %5158 = vmatmul.mubr.msk.f32.gmra.mrb[44].mxu0 %vm627_vm2, %v6317_v10  ;;  %5379 = vmatmul.mubr.msk.f32.gmra.mrb[10].mxu1 %vm627_vm2, %v6317_v10 }
 0x111   : > { %v611_v12 = vmax.f32 %v517_v9, 0.0  ;;  %v5112_v13 = vpop.f32.mrb[18].mxu0  ;;  %v6333_v18 = vld [vmem:[#allocation2 + $0xb1] sm:$0xff] }
 0x112   : > { %701 = vst.msk [vmem:[#allocation2 + $0xe1] sm:$0xff] %vm627_vm2, %v612_v11  ;;  %v532_v14 = vadd.f32 %v5112_v13, %v6215_v63  ;;  %v526_v15 = vpop.f32.mrb[19].mxu0  ;;  %v6325_v16 = vld [vmem:[#allocation2 + $0xa9] sm:$0xff]  ;;  %7290 = vst [vmem:[#allocation11_spill] sm:$0xff] %v6333_v18 }
 0x113   : > { %7289 = vst [vmem:[#allocation10_spill] sm:$0xff] %v6325_v16  ;;  %700 = vst.msk [vmem:[#allocation2 + $0xd9] sm:$0xff] %vm627_vm2, %v611_v12  ;;  %v527_v17 = vadd.f32 %v6215_v63, %v526_v15  ;;  %5160 = vmatprep.mubr.msk.f32.mxu0 %vm627_vm2, %v6325_v16  ;;  %5381 = vmatprep.mubr.msk.f32.mxu1 %vm627_vm2, %v6325_v16 }
 0x114   : > { %v614_v19 = vmax.f32 %v532_v14, 0.0  ;;  %5161 = vmatmul.mubr.msk.f32.gmra.mrb[46].mxu0 %vm627_vm2, %v6333_v18  ;;  %5382 = vmatmul.mubr.msk.f32.gmra.mrb[12].mxu1 %vm627_vm2, %v6333_v18 }
 0x115   : > { %v613_v20 = vmax.f32 %v527_v17, 0.0  ;;  %v5115_v21 = vpop.f32.mrb[20].mxu0  ;;  %v6349_v26 = vld [vmem:[#allocation2 + $0xc9] sm:$0xff]  ;;  %v716_v17 = vld [vmem:[#allocation2] sm:$0xff] }
 0x116   : > { %703 = vst.msk [vmem:[#allocation2 + $0xf9] sm:$0xff] %vm627_vm2, %v614_v19  ;;  %v542_v22 = vadd.f32 %v5115_v21, %v6215_v63  ;;  %v536_v23 = vpop.f32.mrb[21].mxu0  ;;  %v6341_v24 = vld [vmem:[#allocation2 + $0xc1] sm:$0xff]  ;;  %7292 = vst [vmem:[#allocation13_spill] sm:$0xff] %v6349_v26  ;;  %v4458_v21 = vld [vmem:[%s7240_s3 + $0x58] sm:$0xff] }
 0x117   : > { %7291 = vst [vmem:[#allocation12_spill] sm:$0xff] %v6341_v24  ;;  %702 = vst.msk [vmem:[#allocation2 + $0xf1] sm:$0xff] %vm627_vm2, %v613_v20  ;;  %v537_v25 = vadd.f32 %v6215_v63, %v536_v23  ;;  %5163 = vmatprep.mubr.msk.f32.mxu0 %vm627_vm2, %v6341_v24  ;;  %5384 = vmatprep.mubr.msk.f32.mxu1 %vm627_vm2, %v6341_v24  ;;  %v4457_v20 = vld [vmem:[%s7240_s3 + $0x50] sm:$0xff] }
 0x118   : > { %v616_v27 = vmax.f32 %v542_v22, 0.0  ;;  %5164 = vmatmul.mubr.msk.f32.gmra.mrb[48].mxu0 %vm627_vm2, %v6349_v26  ;;  %5385 = vmatmul.mubr.msk.f32.gmra.mrb[14].mxu1 %vm627_vm2, %v6349_v26  ;;  %v717_v22 = vld [vmem:[#allocation2 + $0x8] sm:$0xff] }
 0x119   : > { %v615_v28 = vmax.f32 %v537_v25, 0.0  ;;  %v5118_v29 = vpop.f32.mrb[22].mxu0  ;;  %v6365_v34 = vld [vmem:[#allocation2 + $0xe1] sm:$0xff] }
 0x11a   : > { %705 = vst.msk [vmem:[#allocation2 + $0x111] sm:$0xff] %vm627_vm2, %v616_v27  ;;  %v552_v30 = vadd.f32 %v5118_v29, %v6215_v63  ;;  %v546_v31 = vpop.f32.mrb[23].mxu0  ;;  %v6357_v32 = vld [vmem:[#allocation2 + $0xd9] sm:$0xff]  ;;  %7294 = vst [vmem:[#allocation15_spill] sm:$0xff] %v6365_v34  ;;  %v4601_v27 = vld [vmem:[%s7240_s3 + $0xd0] sm:$0xff]  ;;  %v5663_v29 = vpack.c.bf16 %v4458_v21, %v4457_v20 }
 0x11b   : > { %7293 = vst [vmem:[#allocation14_spill] sm:$0xff] %v6357_v32  ;;  %704 = vst.msk [vmem:[#allocation2 + $0x109] sm:$0xff] %vm627_vm2, %v615_v28  ;;  %v547_v33 = vadd.f32 %v6215_v63, %v546_v31  ;;  %5166 = vmatprep.mubr.msk.f32.mxu0 %vm627_vm2, %v6357_v32  ;;  %5387 = vmatprep.mubr.msk.f32.mxu1 %vm627_vm2, %v6357_v32  ;;  %v4602_v28 = vld [vmem:[%s7240_s3 + $0xd8] sm:$0xff]  ;;  %v6601_v20 = vld [vmem:[#allocation2 + $0xaa] sm:$0xff] }
 0x11c   : > { %v618_v35 = vmax.f32 %v552_v30, 0.0  ;;  %5167 = vmatmul.mubr.msk.f32.gmra.mrb[50].mxu0 %vm627_vm2, %v6365_v34  ;;  %5388 = vmatmul.mubr.msk.f32.gmra.mrb[16].mxu1 %vm627_vm2, %v6365_v34  ;;  %v6483_v30 = vld [vmem:[#allocation2 + $0x18] sm:$0xff]  ;;  %v6607_v21 = vld [vmem:[#allocation2 + $0xb0] sm:$0xff] }
 0x11d   : > { %v617_v36 = vmax.f32 %v547_v33, 0.0  ;;  %v5121_v37 = vpop.f32.mrb[24].mxu0  ;;  %v6381_v43 = vld [vmem:[#allocation2 + $0xf9] sm:$0xff]  ;;  %7309 = vst [vmem:[#allocation30_spill] sm:$0xff] %v6483_v30  ;;  %v6491_v33 = vld [vmem:[#allocation2 + $0x22] sm:$0xff] }
 0x11e   : > { %707 = vst.msk [vmem:[#allocation2 + $0x129] sm:$0xff] %vm627_vm2, %v618_v35  ;;  %v562_v39 = vadd.f32 %v5121_v37, %v6215_v63  ;;  %v556_v40 = vpop.f32.mrb[25].mxu0  ;;  %v6373_v41 = vld [vmem:[#allocation2 + $0xf1] sm:$0xff]  ;;  %7296 = vst [vmem:[#allocation17_spill] sm:$0xff] %v6381_v43  ;;  %v6485_v31 = vld [vmem:[#allocation2 + $0x1a] sm:$0xff]  ;;  %v5695_v35 = vpack.c.bf16 %v4602_v28, %v4601_v27 }
 0x11f   : > { %7295 = vst [vmem:[#allocation16_spill] sm:$0xff] %v6373_v41  ;;  %706 = vst.msk [vmem:[#allocation2 + $0x121] sm:$0xff] %vm627_vm2, %v617_v36  ;;  %v557_v42 = vadd.f32 %v6215_v63, %v556_v40  ;;  %5169 = vmatprep.mubr.msk.f32.mxu0 %vm627_vm2, %v6373_v41  ;;  %5390 = vmatprep.mubr.msk.f32.mxu1 %vm627_vm2, %v6373_v41  ;;  %v6494_v36 = vld [vmem:[#allocation2 + $0x20] sm:$0xff]  ;;  %v6506_v40 = vld [vmem:[#allocation2 + $0x30] sm:$0xff] }
 0x120   : > { %v620_v44 = vmax.f32 %v562_v39, 0.0  ;;  %5170 = vmatmul.mubr.msk.f32.gmra.mrb[52].mxu0 %vm627_vm2, %v6381_v43  ;;  %5391 = vmatmul.mubr.msk.f32.gmra.mrb[18].mxu1 %vm627_vm2, %v6381_v43  ;;  %7310 = vst [vmem:[#allocation31_spill] sm:$0xff] %v6494_v36  ;;  %v4491_v37 = vld [vmem:[%s7240_s3 + $0x60] sm:$0xff]  ;;  %v4492_v39 = vld [vmem:[%s7240_s3 + $0x68] sm:$0xff] }
 0x121   : > { %v619_v45 = vmax.f32 %v557_v42, 0.0  ;;  %v5124_v46 = vpop.f32.mrb[26].mxu0  ;;  %v6397_v51 = vld [vmem:[#allocation2 + $0x111] sm:$0xff]  ;;  %v4636_v42 = vld [vmem:[%s7240_s3 + $0xe8] sm:$0xff]  ;;  %v6615_v27 = vld [vmem:[#allocation2 + $0xc0] sm:$0xff] }
 0x122   : > { %709 = vst.msk [vmem:[#allocation2 + $0x141] sm:$0xff] %vm627_vm2, %v620_v44  ;;  %v572_v47 = vadd.f32 %v5124_v46, %v6215_v63  ;;  %v566_v48 = vpop.f32.mrb[27].mxu0  ;;  %v6389_v49 = vld [vmem:[#allocation2 + $0x109] sm:$0xff]  ;;  %7298 = vst [vmem:[#allocation19_spill] sm:$0xff] %v6397_v51  ;;  %v6517_v44 = vld [vmem:[#allocation2 + $0x32] sm:$0xff] }
 0x123   : > { %7297 = vst [vmem:[#allocation18_spill] sm:$0xff] %v6389_v49  ;;  %708 = vst.msk [vmem:[#allocation2 + $0x139] sm:$0xff] %vm627_vm2, %v619_v45  ;;  %v567_v50 = vadd.f32 %v6215_v63, %v566_v48  ;;  %5172 = vmatprep.mubr.msk.f32.mxu0 %vm627_vm2, %v6389_v49  ;;  %5393 = vmatprep.mubr.msk.f32.mxu1 %vm627_vm2, %v6389_v49  ;;  %v6521_v45 = vpack.c.bf16 %v4492_v39, %v4491_v37  ;;  %v6523_v46 = vld [vmem:[#allocation2 + $0x38] sm:$0xff]  ;;  %v6617_v28 = vld [vmem:[#allocation2 + $0xc2] sm:$0xff] }
 0x124   : > { %v622_v52 = vmax.f32 %v572_v47, 0.0  ;;  %5173 = vmatmul.mubr.msk.f32.gmra.mrb[54].mxu0 %vm627_vm2, %v6397_v51  ;;  %5394 = vmatmul.mubr.msk.f32.gmra.mrb[20].mxu1 %vm627_vm2, %v6397_v51  ;;  %v6525_v47 = vld [vmem:[#allocation2 + $0x3a] sm:$0xff] }
 0x125   : > { %v621_v53 = vmax.f32 %v567_v50, 0.0  ;;  %v5127_v55 = vpop.f32.mrb[28].mxu0  ;;  %v6413_v61 = vld [vmem:[#allocation2 + $0x129] sm:$0xff]  ;;  %v6631_v37 = vld [vmem:[#allocation2 + $0xd8] sm:$0xff] }
 0x126   : > { %711 = vst.msk [vmem:[#allocation2 + $0x159] sm:$0xff] %vm627_vm2, %v622_v52  ;;  %v582_v57 = vadd.f32 %v5127_v55, %v6215_v63  ;;  %v576_v58 = vpop.f32.mrb[29].mxu0  ;;  %v6405_v59 = vld [vmem:[#allocation2 + $0x121] sm:$0xff]  ;;  %7300 = vst [vmem:[#allocation21_spill] sm:$0xff] %v6413_v61  ;;  %v6535_v50 = vld [vmem:[#allocation2 + $0x4a] sm:$0xff] }
 0x127   : > { %7299 = vst [vmem:[#allocation20_spill] sm:$0xff] %v6405_v59  ;;  %710 = vst.msk [vmem:[#allocation2 + $0x151] sm:$0xff] %vm627_vm2, %v621_v53  ;;  %v577_v60 = vadd.f32 %v6215_v63, %v576_v58  ;;  %5175 = vmatprep.mubr.msk.f32.mxu0 %vm627_vm2, %v6405_v59  ;;  %5396 = vmatprep.mubr.msk.f32.mxu1 %vm627_vm2, %v6405_v59  ;;  %v6542_v52 = vld [vmem:[#allocation2 + $0x50] sm:$0xff]  ;;  %v6551_v55 = vld [vmem:[#allocation2 + $0x60] sm:$0xff] }
 0x128   : > { %v624_v0 = vmax.f32 %v582_v57, 0.0  ;;  %5176 = vmatmul.mubr.msk.f32.gmra.mrb[56].mxu0 %vm627_vm2, %v6413_v61  ;;  %5397 = vmatmul.mubr.msk.f32.gmra.mrb[22].mxu1 %vm627_vm2, %v6413_v61  ;;  %v6544_v53 = vld [vmem:[#allocation2 + $0x52] sm:$0xff]  ;;  %v6553_v57 = vld [vmem:[#allocation2 + $0x62] sm:$0xff]  ;;  %v6633_v39 = vld [vmem:[#allocation2 + $0xda] sm:$0xff] }
 0x129   : > { %v623_v2 = vmax.f32 %v577_v60, 0.0  ;;  %v5130_v3 = vpop.f32.mrb[30].mxu0  ;;  %v6429_v11 = vld [vmem:[#allocation2 + $0x141] sm:$0xff]  ;;  %v6561_v60 = vld [vmem:[#allocation2 + $0x6a] sm:$0xff] }
 0x12a   : > { %713 = vst.msk [vmem:[#allocation2 + $0x171] sm:$0xff] %vm627_vm2, %v624_v0  ;;  %v592_v4 = vadd.f32 %v5130_v3, %v6215_v63  ;;  %v586_v5 = vpop.f32.mrb[31].mxu0  ;;  %v6421_v7 = vld [vmem:[#allocation2 + $0x139] sm:$0xff]  ;;  %7302 = vst [vmem:[#allocation23_spill] sm:$0xff] %v6429_v11  ;;  %v6559_v58 = vld [vmem:[#allocation2 + $0x68] sm:$0xff] }
 0x12b   : > { %7301 = vst [vmem:[#allocation22_spill] sm:$0xff] %v6421_v7  ;;  %712 = vst.msk [vmem:[#allocation2 + $0x169] sm:$0xff] %vm627_vm2, %v623_v2  ;;  %v587_v9 = vadd.f32 %v6215_v63, %v586_v5  ;;  %5178 = vmatprep.mubr.msk.f32.mxu0 %vm627_vm2, %v6421_v7  ;;  %5399 = vmatprep.mubr.msk.f32.mxu1 %vm627_vm2, %v6421_v7  ;;  %v6567_v0 = vld [vmem:[#allocation2 + $0x78] sm:$0xff]  ;;  %v6575_v3 = vld [vmem:[#allocation2 + $0x80] sm:$0xff] }
 0x12c   : > { %v626_v12 = vmax.f32 %v592_v4, 0.0  ;;  %5179 = vmatmul.mubr.msk.f32.gmra.mrb[58].mxu0 %vm627_vm2, %v6429_v11  ;;  %5400 = vmatmul.mubr.msk.f32.gmra.mrb[24].mxu1 %vm627_vm2, %v6429_v11  ;;  %v6569_v2 = vld [vmem:[#allocation2 + $0x7a] sm:$0xff]  ;;  %v6577_v4 = vld [vmem:[#allocation2 + $0x82] sm:$0xff]  ;;  %v6583_v5 = vld [vmem:[#allocation2 + $0x90] sm:$0xff] }
 0x12d   : > { %v625_v13 = vmax.f32 %v587_v9, 0.0  ;;  %v6443_v63 = vld [vmem:[#allocation2 + $0x159] sm:$0xff]  ;;  %v6671_v11 = vld [vmem:[#allocation2 + $0x110] sm:$0xff]  ;;  %v6681_v59 = vld [vmem:[#allocation2 + $0x122] sm:$0xff] }
 0x12e   : > { %715 = vst.msk [vmem:[#allocation2 + $0x189] sm:$0xff] %vm627_vm2, %v626_v12  ;;  %v6436_v14 = vld [vmem:[#allocation2 + $0x151] sm:$0xff]  ;;  %7304 = vst [vmem:[#allocation25_spill] sm:$0xff] %v6443_v63  ;;  %v6679_v61 = vld [vmem:[#allocation2 + $0x120] sm:$0xff] }
 0x12f   : > { %7303 = vst [vmem:[#allocation24_spill] sm:$0xff] %v6436_v14  ;;  %714 = vst.msk [vmem:[#allocation2 + $0x181] sm:$0xff] %vm627_vm2, %v625_v13  ;;  %5181 = vmatprep.mubr.msk.f32.mxu0 %vm627_vm2, %v6436_v14  ;;  %5402 = vmatprep.mubr.msk.f32.mxu1 %vm627_vm2, %v6436_v14  ;;  %v6585_v9 = vld [vmem:[#allocation2 + $0x92] sm:$0xff]  ;;  %v6593_v13 = vld [vmem:[#allocation2 + $0x9a] sm:$0xff] }
 0x130   : > { %5182 = vmatmul.mubr.msk.f32.gmra.mrb[60].mxu0 %vm627_vm2, %v6443_v63  ;;  %5403 = vmatmul.mubr.msk.f32.gmra.mrb[26].mxu1 %vm627_vm2, %v6443_v63  ;;  %v6591_v12 = vld [vmem:[#allocation2 + $0x98] sm:$0xff]  ;;  %v6663_v63 = vld [vmem:[#allocation2 + $0x108] sm:$0xff]  ;;  %v6703_v34 = vld [vmem:[#allocation2 + $0x140] sm:$0xff] }
 0x131   : > { %v6455_v19 = vld [vmem:[#allocation2 + $0x171] sm:$0xff]  ;;  %v6687_v51 = vld [vmem:[#allocation2 + $0x128] sm:$0xff]  ;;  %v6697_v41 = vld [vmem:[#allocation2 + $0x13a] sm:$0xff] }
 0x132   : > { %v6449_v15 = vld [vmem:[#allocation2 + $0x169] sm:$0xff]  ;;  %7306 = vst [vmem:[#allocation27_spill] sm:$0xff] %v6455_v19  ;;  %v6673_v7 = vld [vmem:[#allocation2 + $0x112] sm:$0xff]  ;;  %v6721_v16 = vld [vmem:[#allocation2 + $0x15a] sm:$0xff] }
 0x133   : > { %7305 = vst [vmem:[#allocation26_spill] sm:$0xff] %v6449_v15  ;;  %5184 = vmatprep.mubr.msk.f32.mxu0 %vm627_vm2, %v6449_v15  ;;  %5405 = vmatprep.mubr.msk.f32.mxu1 %vm627_vm2, %v6449_v15  ;;  %v6657_v15 = vld [vmem:[#allocation2 + $0xfa] sm:$0xff]  ;;  %v6665_v14 = vld [vmem:[#allocation2 + $0x10a] sm:$0xff]  ;;  %v6705_v32 = vld [vmem:[#allocation2 + $0x142] sm:$0xff] }
 0x134   : > { %5185 = vmatmul.mubr.msk.f32.gmra.mrb[62].mxu0 %vm627_vm2, %v6455_v19  ;;  %5406 = vmatmul.mubr.msk.f32.gmra.mrb[28].mxu1 %vm627_vm2, %v6455_v19  ;;  %v6655_v19 = vld [vmem:[#allocation2 + $0xf8] sm:$0xff]  ;;  %v6689_v49 = vld [vmem:[#allocation2 + $0x12a] sm:$0xff]  ;;  %7311 = vst [vmem:[#allocation32_spill] sm:$0xff] %v6721_v16 }
 0x135   : > { %5195 = vmatprep.mubr.msk.f32.mxu0 %vm627_vm2, %v716_v17  ;;  %v6472_v25 = vld [vmem:[#allocation2 + $0x189] sm:$0xff]  ;;  %v6695_v43 = vld [vmem:[#allocation2 + $0x138] sm:$0xff] }
 0x136   : > { %v6468_v23 = vld [vmem:[#allocation2 + $0x181] sm:$0xff]  ;;  %7308 = vst [vmem:[#allocation29_spill] sm:$0xff] %v6472_v25  ;;  %v6711_v26 = vld [vmem:[#allocation2 + $0x150] sm:$0xff]  ;;  %v6719_v18 = vld [vmem:[#allocation2 + $0x158] sm:$0xff] }
 0x137   : > { %7307 = vst [vmem:[#allocation28_spill] sm:$0xff] %v6468_v23  ;;  %5408 = vmatprep.mubr.msk.f32.mxu1 %vm627_vm2, %v6468_v23  ;;  %v6599_v17 = vld [vmem:[#allocation2 + $0xa8] sm:$0xff]  ;;  %v6649_v23 = vld [vmem:[#allocation2 + $0xf2] sm:$0xff] }
 0x138   : > { %5196 = vmatmul.mubr.msk.f32.vlgmr.msra.gmra.mrb[32].mxu0 %vm627_vm2, %v717_v22  ;;  %5409 = vmatmul.mubr.msk.f32.gmra.mrb[30].mxu1 %vm627_vm2, %v6472_v25  ;;  %v6609_v22 = vld [vmem:[#allocation2 + $0xb2] sm:$0xff]  ;;  %v6727_v10 = vld [vmem:[#allocation2 + $0x168] sm:$0xff] }
 0x139   : > { %5198 = vmatprep.mubr.msk.f32.mxu0 %vm627_vm2, %v6483_v30  ;;  %5419 = vmatprep.mubr.msk.f32.mxu1 %vm627_vm2, %v6485_v31  ;;  %v6647_v25 = vld [vmem:[#allocation2 + $0xf0] sm:$0xff]  ;;  %7312 = vst [vmem:[#allocation33_spill] sm:$0xff] %v6727_v10  ;;  %v6743_v54 = vld [vmem:[#allocation2 + $0x182] sm:$0xff]  ;;  %v4494_v30 = vld [vmem:[%s7240_s3 + $0x78] sm:$0xff] }
 0x13a   : > { %5662 = vmatpush3.bf16.msra.mxu0 %v6225_v6  ;;  %v4635_v6 = vld [vmem:[%s7240_s3 + $0xe0] sm:$0xff]  ;;  %v6713_v24 = vld [vmem:[#allocation2 + $0x152] sm:$0xff]  ;;  %v6729_v8 = vld [vmem:[#allocation2 + $0x16a] sm:$0xff]  ;;  %7316 = vst [vmem:[#allocation37_spill] sm:$0xff] %v6743_v54 }
 0x13b   : > { %5664 = vmatprep.subr.bf16.mxu0 %v5663_v29  ;;  %v6527_v48 = vpack.c.bf16 %v4636_v42, %v4635_v6  ;;  %v6639_v6 = vld [vmem:[#allocation2 + $0xe0] sm:$0xff]  ;;  %7313 = vst [vmem:[#allocation34_spill] sm:$0xff] %v6729_v8  ;;  %v6735_v62 = vld [vmem:[#allocation2 + $0x170] sm:$0xff] }
 0x13c   : > { %5199 = vmatmul.mubr.msk.f32.gmra.mrb[34].mxu0 %vm627_vm2, %v6494_v36  ;;  %5420 = vmatmul.mubr.msk.f32.vlgmr.msra.gmra.mrb[0].mxu1 %vm627_vm2, %v6491_v33  ;;  %v6641_v42 = vld [vmem:[#allocation2 + $0xe2] sm:$0xff]  ;;  %7314 = vst [vmem:[#allocation35_spill] sm:$0xff] %v6735_v62  ;;  %v6737_v56 = vld [vmem:[#allocation2 + $0x172] sm:$0xff] }
 0x13d   : > { %5694 = vmatpush3.bf16.msra.mxu1 %v6258_v38  ;;  %5201 = vmatprep.mubr.msk.f32.mxu0 %vm627_vm2, %v6506_v40  ;;  %v6533_v38 = vld [vmem:[#allocation2 + $0x48] sm:$0xff]  ;;  %7315 = vst [vmem:[#allocation36_spill] sm:$0xff] %v6737_v56  ;;  %v4493_v36 = vld [vmem:[%s7240_s3 + $0x70] sm:$0xff] }
 0x13e   : > { %5422 = vmatprep.mubr.msk.f32.mxu1 %vm627_vm2, %v6517_v44  ;;  %5696 = vmatprep.subr.bf16.mxu1 %v5695_v35 }
 0x13f   : > { %5666 = vmatpush3.bf16.msra.mxu0 %v5663_v29  ;;  %v6623_v29 = vld [vmem:[#allocation2 + $0xc8] sm:$0xff] }
 0x140   : > { %5202 = vmatmul.mubr.msk.f32.gmra.mrb[36].mxu0 %vm627_vm2, %v6523_v46  ;;  %5423 = vmatmul.mubr.msk.f32.gmra.mrb[2].mxu1 %vm627_vm2, %v6525_v47 }
 0x141   : > { %5204 = vmatprep.mubr.msk.f32.mxu0 %vm627_vm2, %v6533_v38  ;;  %5425 = vmatprep.mubr.msk.f32.mxu1 %vm627_vm2, %v6535_v50 }
 0x142   : > { %5698 = vmatpush3.bf16.msra.mxu1 %v5695_v35  ;;  %5668 = vmatprep.subr.bf16.mxu0 %v6521_v45  ;;  %v6625_v35 = vld [vmem:[#allocation2 + $0xca] sm:$0xff] }
 0x143   : > { %5700 = vmatprep.subr.bf16.mxu1 %v6527_v48 }
 0x144   : > { %5205 = vmatmul.mubr.msk.f32.gmra.mrb[38].mxu0 %vm627_vm2, %v6542_v52  ;;  %5426 = vmatmul.mubr.msk.f32.gmra.mrb[4].mxu1 %vm627_vm2, %v6544_v53 }
 0x145   : > { %5207 = vmatprep.mubr.msk.f32.mxu0 %vm627_vm2, %v6551_v55  ;;  %5428 = vmatprep.mubr.msk.f32.mxu1 %vm627_vm2, %v6553_v57 }
 0x148   : > { %5208 = vmatmul.mubr.msk.f32.gmra.mrb[40].mxu0 %vm627_vm2, %v6559_v58  ;;  %5429 = vmatmul.mubr.msk.f32.gmra.mrb[6].mxu1 %vm627_vm2, %v6561_v60 }
 0x149   : > { %5210 = vmatprep.mubr.msk.f32.mxu0 %vm627_vm2, %v6567_v0  ;;  %5431 = vmatprep.mubr.msk.f32.mxu1 %vm627_vm2, %v6569_v2 }
 0x14c   : > { %5211 = vmatmul.mubr.msk.f32.gmra.mrb[42].mxu0 %vm627_vm2, %v6575_v3  ;;  %5432 = vmatmul.mubr.msk.f32.gmra.mrb[8].mxu1 %vm627_vm2, %v6577_v4 }
 0x14d   : > { %5213 = vmatprep.mubr.msk.f32.mxu0 %vm627_vm2, %v6583_v5  ;;  %5434 = vmatprep.mubr.msk.f32.mxu1 %vm627_vm2, %v6585_v9 }
 0x150   : > { %5214 = vmatmul.mubr.msk.f32.gmra.mrb[44].mxu0 %vm627_vm2, %v6591_v12  ;;  %5435 = vmatmul.mubr.msk.f32.gmra.mrb[10].mxu1 %vm627_vm2, %v6593_v13 }
 0x151   : > { %5216 = vmatprep.mubr.msk.f32.mxu0 %vm627_vm2, %v6599_v17  ;;  %5437 = vmatprep.mubr.msk.f32.mxu1 %vm627_vm2, %v6601_v20 }
 0x154   : > { %5217 = vmatmul.mubr.msk.f32.gmra.mrb[46].mxu0 %vm627_vm2, %v6607_v21  ;;  %5438 = vmatmul.mubr.msk.f32.gmra.mrb[12].mxu1 %vm627_vm2, %v6609_v22 }
 0x155   : > { %5219 = vmatprep.mubr.msk.f32.mxu0 %vm627_vm2, %v6615_v27  ;;  %5440 = vmatprep.mubr.msk.f32.mxu1 %vm627_vm2, %v6617_v28 }
 0x158   : > { %5220 = vmatmul.mubr.msk.f32.gmra.mrb[48].mxu0 %vm627_vm2, %v6623_v29  ;;  %5441 = vmatmul.mubr.msk.f32.gmra.mrb[14].mxu1 %vm627_vm2, %v6625_v35 }
 0x159   : > { %5222 = vmatprep.mubr.msk.f32.mxu0 %vm627_vm2, %v6631_v37  ;;  %5443 = vmatprep.mubr.msk.f32.mxu1 %vm627_vm2, %v6633_v39 }
 0x15c   : > { %5223 = vmatmul.mubr.msk.f32.gmra.mrb[50].mxu0 %vm627_vm2, %v6639_v6  ;;  %5444 = vmatmul.mubr.msk.f32.gmra.mrb[16].mxu1 %vm627_vm2, %v6641_v42 }
 0x15d   : > { %5225 = vmatprep.mubr.msk.f32.mxu0 %vm627_vm2, %v6647_v25  ;;  %5446 = vmatprep.mubr.msk.f32.mxu1 %vm627_vm2, %v6649_v23 }
 0x160   : > { %5226 = vmatmul.mubr.msk.f32.gmra.mrb[52].mxu0 %vm627_vm2, %v6655_v19  ;;  %5447 = vmatmul.mubr.msk.f32.gmra.mrb[18].mxu1 %vm627_vm2, %v6657_v15 }
 0x161   : > { %5228 = vmatprep.mubr.msk.f32.mxu0 %vm627_vm2, %v6663_v63  ;;  %5449 = vmatprep.mubr.msk.f32.mxu1 %vm627_vm2, %v6665_v14 }
 0x164   : > { %5229 = vmatmul.mubr.msk.f32.gmra.mrb[54].mxu0 %vm627_vm2, %v6671_v11  ;;  %5450 = vmatmul.mubr.msk.f32.gmra.mrb[20].mxu1 %vm627_vm2, %v6673_v7 }
 0x165   : > { %5231 = vmatprep.mubr.msk.f32.mxu0 %vm627_vm2, %v6679_v61  ;;  %5452 = vmatprep.mubr.msk.f32.mxu1 %vm627_vm2, %v6681_v59 }
 0x168   : > { %5232 = vmatmul.mubr.msk.f32.gmra.mrb[56].mxu0 %vm627_vm2, %v6687_v51  ;;  %5453 = vmatmul.mubr.msk.f32.gmra.mrb[22].mxu1 %vm627_vm2, %v6689_v49 }
 0x169   : > { %5234 = vmatprep.mubr.msk.f32.mxu0 %vm627_vm2, %v6695_v43  ;;  %5455 = vmatprep.mubr.msk.f32.mxu1 %vm627_vm2, %v6697_v41 }
 0x16c   : > { %5235 = vmatmul.mubr.msk.f32.gmra.mrb[58].mxu0 %vm627_vm2, %v6703_v34  ;;  %5456 = vmatmul.mubr.msk.f32.gmra.mrb[24].mxu1 %vm627_vm2, %v6705_v32 }
 0x16d   : > { %5237 = vmatprep.mubr.msk.f32.mxu0 %vm627_vm2, %v6711_v26  ;;  %5458 = vmatprep.mubr.msk.f32.mxu1 %vm627_vm2, %v6713_v24 }
 0x170   : > { %5238 = vmatmul.mubr.msk.f32.gmra.mrb[60].mxu0 %vm627_vm2, %v6719_v18  ;;  %5459 = vmatmul.mubr.msk.f32.gmra.mrb[26].mxu1 %vm627_vm2, %v6721_v16  ;;  %v4638_v16 = vld [vmem:[%s7240_s3 + $0xf8] sm:$0xff] }
 0x171   : > { %5240 = vmatprep.mubr.msk.f32.mxu0 %vm627_vm2, %v6727_v10  ;;  %5461 = vmatprep.mubr.msk.f32.mxu1 %vm627_vm2, %v6729_v8  ;;  %v1432_v8 = vld [vmem:[#allocation2 + $0xa] sm:$0xff]  ;;  %v5671_v10 = vpack.c.bf16 %v4494_v30, %v4493_v36  ;;  %v7321_v36 = vld [vmem:[#allocation34_spill] sm:$0xff] }
 0x172   : > { %v4672_v30 = vld [vmem:[%s7240_s3 + $0x108] sm:$0xff] }
 0x174   : > { %5241 = vmatmul.mubr.msk.f32.gmra.mrb[62].mxu0 %vm627_vm2, %v6735_v62  ;;  %5462 = vmatmul.mubr.msk.f32.gmra.mrb[28].mxu1 %vm627_vm2, %v6737_v56  ;;  %v6754_v62 = vld [vmem:[#allocation2 + $0x18a] sm:$0xff] }
 0x175   : > { %5464 = vmatprep.mubr.msk.f32.mxu1 %vm627_vm2, %v6743_v54  ;;  %5251 = vmatprep.mubr.msk.f32.mxu0 %vm627_vm2, %v1431_v1  ;;  %7317 = vst [vmem:[#allocation38_spill] sm:$0xff] %v6754_v62  ;;  %v4637_v56 = vld [vmem:[%s7240_s3 + $0xf0] sm:$0xff]  ;;  %v4674_v54 = vld [vmem:[%s7240_s3 + $0x118] sm:$0xff] }
 0x176   : > { %v5703_v1 = vpack.c.bf16 %v4638_v16, %v4637_v56  ;;  %v7319_v16 = vld [vmem:[#allocation32_spill] sm:$0xff] }
 0x178   : > { %5252 = vmatmul.mubr.msk.f32.vlgmr.msra.gmra.mrb[32].mxu0 %vm627_vm2, %v1432_v8  ;;  %5465 = vmatmul.mubr.msk.f32.gmra.mrb[30].mxu1 %vm627_vm2, %v6754_v62  ;;  %v4671_v8 = vld [vmem:[%s7240_s3 + $0x100] sm:$0xff]  ;;  %v4673_v62 = vld [vmem:[%s7240_s3 + $0x110] sm:$0xff] }
 0x179   : > { %5254 = vmatprep.mubr.msk.f32.mxu0 %vm627_vm2, %v6485_v31  ;;  %5475 = vmatprep.mubr.msk.f32.mxu1 %vm627_vm2, %v6506_v40  ;;  %v6785_v56 = vpack.c.bf16 %v4672_v30, %v4671_v8  ;;  %v7320_v31 = vld [vmem:[#allocation35_spill] sm:$0xff]  ;;  %v7323_v8 = vld [vmem:[#allocation30_spill] sm:$0xff] }
 0x17a   : > { %5670 = vmatpush3.bf16.msra.mxu0 %v6521_v45  ;;  %v3022_v45 = vld [vmem:[#allocation2 + $0x198] sm:$0xff]  ;;  %v3023_v30 = vld [vmem:[#allocation2 + $0x1a0] sm:$0xff] }
 0x17b   : > { %5672 = vmatprep.subr.bf16.mxu0 %v5671_v10 }
 0x17c   : > { %5255 = vmatmul.mubr.msk.f32.gmra.mrb[34].mxu0 %vm627_vm2, %v6491_v33  ;;  %5476 = vmatmul.mubr.msk.f32.vlgmr.msra.gmra.mrb[0].mxu1 %vm627_vm2, %v6523_v46  ;;  %v6888_v33 = vld [vmem:[#allocation2 + $0x180] sm:$0xff] }
 0x17d   : > { %5702 = vmatpush3.bf16.msra.mxu1 %v6527_v48  ;;  %5257 = vmatprep.mubr.msk.f32.mxu0 %vm627_vm2, %v6517_v44  ;;  %v6894_v48 = vld [vmem:[#allocation2 + $0x188] sm:$0xff] }
 0x17e   : > { %5478 = vmatprep.mubr.msk.f32.mxu1 %vm627_vm2, %v6533_v38  ;;  %5704 = vmatprep.subr.bf16.mxu1 %v5703_v1 }
 0x17f   : > { %5674 = vmatpush3.bf16.msra.mxu0 %v5671_v10  ;;  %v7318_v10 = vld [vmem:[#allocation33_spill] sm:$0xff] }
 0x180   : > { %5258 = vmatmul.mubr.msk.f32.gmra.mrb[36].mxu0 %vm627_vm2, %v6525_v47  ;;  %5479 = vmatmul.mubr.msk.f32.gmra.mrb[2].mxu1 %vm627_vm2, %v6542_v52 }
 0x181   : > { %5260 = vmatprep.mubr.msk.f32.mxu0 %vm627_vm2, %v6535_v50  ;;  %5481 = vmatprep.mubr.msk.f32.mxu1 %vm627_vm2, %v6551_v55 }
 0x182   : > { %5706 = vmatpush3.bf16.msra.mxu1 %v5703_v1  ;;  %v7322_v1 = vld [vmem:[#allocation36_spill] sm:$0xff] }
 0x183   : > { %5708 = vmatprep.subr.bf16.mxu1 %v6785_v56 }
 0x184   : > { %5261 = vmatmul.mubr.msk.f32.gmra.mrb[38].mxu0 %vm627_vm2, %v6544_v53  ;;  %5482 = vmatmul.mubr.msk.f32.gmra.mrb[4].mxu1 %vm627_vm2, %v6559_v58 }
 0x185   : > { %5263 = vmatprep.mubr.msk.f32.mxu0 %vm627_vm2, %v6553_v57  ;;  %5484 = vmatprep.mubr.msk.f32.mxu1 %vm627_vm2, %v6567_v0 }
 0x188   : > { %5264 = vmatmul.mubr.msk.f32.gmra.mrb[40].mxu0 %vm627_vm2, %v6561_v60  ;;  %5485 = vmatmul.mubr.msk.f32.gmra.mrb[6].mxu1 %vm627_vm2, %v6575_v3 }
 0x189   : > { %5266 = vmatprep.mubr.msk.f32.mxu0 %vm627_vm2, %v6569_v2  ;;  %5487 = vmatprep.mubr.msk.f32.mxu1 %vm627_vm2, %v6583_v5 }
 0x18c   : > { %5267 = vmatmul.mubr.msk.f32.gmra.mrb[42].mxu0 %vm627_vm2, %v6577_v4  ;;  %5488 = vmatmul.mubr.msk.f32.gmra.mrb[8].mxu1 %vm627_vm2, %v6591_v12 }
 0x18d   : > { %5269 = vmatprep.mubr.msk.f32.mxu0 %vm627_vm2, %v6585_v9  ;;  %5490 = vmatprep.mubr.msk.f32.mxu1 %vm627_vm2, %v6599_v17 }
 0x190   : > { %5270 = vmatmul.mubr.msk.f32.gmra.mrb[44].mxu0 %vm627_vm2, %v6593_v13  ;;  %5491 = vmatmul.mubr.msk.f32.gmra.mrb[10].mxu1 %vm627_vm2, %v6607_v21 }
 0x191   : > { %5272 = vmatprep.mubr.msk.f32.mxu0 %vm627_vm2, %v6601_v20  ;;  %5493 = vmatprep.mubr.msk.f32.mxu1 %vm627_vm2, %v6615_v27 }
 0x194   : > { %5273 = vmatmul.mubr.msk.f32.gmra.mrb[46].mxu0 %vm627_vm2, %v6609_v22  ;;  %5494 = vmatmul.mubr.msk.f32.gmra.mrb[12].mxu1 %vm627_vm2, %v6623_v29 }
 0x195   : > { %5275 = vmatprep.mubr.msk.f32.mxu0 %vm627_vm2, %v6617_v28  ;;  %5496 = vmatprep.mubr.msk.f32.mxu1 %vm627_vm2, %v6631_v37 }
 0x198   : > { %5276 = vmatmul.mubr.msk.f32.gmra.mrb[48].mxu0 %vm627_vm2, %v6625_v35  ;;  %5497 = vmatmul.mubr.msk.f32.gmra.mrb[14].mxu1 %vm627_vm2, %v6639_v6 }
 0x199   : > { %5278 = vmatprep.mubr.msk.f32.mxu0 %vm627_vm2, %v6633_v39  ;;  %5499 = vmatprep.mubr.msk.f32.mxu1 %vm627_vm2, %v6647_v25 }
 0x19c   : > { %5279 = vmatmul.mubr.msk.f32.gmra.mrb[50].mxu0 %vm627_vm2, %v6641_v42  ;;  %5500 = vmatmul.mubr.msk.f32.gmra.mrb[16].mxu1 %vm627_vm2, %v6655_v19 }
 0x19d   : > { %5281 = vmatprep.mubr.msk.f32.mxu0 %vm627_vm2, %v6649_v23  ;;  %5502 = vmatprep.mubr.msk.f32.mxu1 %vm627_vm2, %v6663_v63 }
 0x1a0   : > { %5282 = vmatmul.mubr.msk.f32.gmra.mrb[52].mxu0 %vm627_vm2, %v6657_v15  ;;  %5503 = vmatmul.mubr.msk.f32.gmra.mrb[18].mxu1 %vm627_vm2, %v6671_v11 }
 0x1a1   : > { %5284 = vmatprep.mubr.msk.f32.mxu0 %vm627_vm2, %v6665_v14  ;;  %5505 = vmatprep.mubr.msk.f32.mxu1 %vm627_vm2, %v6679_v61 }
 0x1a4   : > { %5285 = vmatmul.mubr.msk.f32.gmra.mrb[54].mxu0 %vm627_vm2, %v6673_v7  ;;  %5506 = vmatmul.mubr.msk.f32.gmra.mrb[20].mxu1 %vm627_vm2, %v6687_v51 }
 0x1a5   : > { %5287 = vmatprep.mubr.msk.f32.mxu0 %vm627_vm2, %v6681_v59  ;;  %5508 = vmatprep.mubr.msk.f32.mxu1 %vm627_vm2, %v6695_v43 }
 0x1a8   : > { %5288 = vmatmul.mubr.msk.f32.gmra.mrb[56].mxu0 %vm627_vm2, %v6689_v49  ;;  %5509 = vmatmul.mubr.msk.f32.gmra.mrb[22].mxu1 %vm627_vm2, %v6703_v34 }
 0x1a9   : > { %5290 = vmatprep.mubr.msk.f32.mxu0 %vm627_vm2, %v6697_v41  ;;  %5511 = vmatprep.mubr.msk.f32.mxu1 %vm627_vm2, %v6711_v26 }
 0x1ac   : > { %5291 = vmatmul.mubr.msk.f32.gmra.mrb[58].mxu0 %vm627_vm2, %v6705_v32  ;;  %5512 = vmatmul.mubr.msk.f32.gmra.mrb[24].mxu1 %vm627_vm2, %v6719_v18 }
 0x1ad   : > { %5293 = vmatprep.mubr.msk.f32.mxu0 %vm627_vm2, %v6713_v24  ;;  %5514 = vmatprep.mubr.msk.f32.mxu1 %vm627_vm2, %v7318_v10 }
 0x1b0   : > { %5294 = vmatmul.mubr.msk.f32.gmra.mrb[60].mxu0 %vm627_vm2, %v7319_v16  ;;  %5515 = vmatmul.mubr.msk.f32.gmra.mrb[26].mxu1 %vm627_vm2, %v7320_v31 }
 0x1b1   : > { %5296 = vmatprep.mubr.msk.f32.mxu0 %vm627_vm2, %v7321_v36  ;;  %5517 = vmatprep.mubr.msk.f32.mxu1 %vm627_vm2, %v6888_v33  ;;  %v7324_v36 = vld [vmem:[#allocation31_spill] sm:$0xff] }
 0x1b4   : > { %5297 = vmatmul.mubr.msk.f32.gmra.mrb[62].mxu0 %vm627_vm2, %v7322_v1  ;;  %5518 = vmatmul.mubr.msk.f32.gmra.mrb[28].mxu1 %vm627_vm2, %v6894_v48  ;;  %v3382_v1 = vld [vmem:[#allocation2 + $0x31] sm:$0xff] }
 0x1b5   : > { %5307 = vmatprep.mubr.msk.f32.mxu0 %vm627_vm2, %v7323_v8  ;;  %5520 = vmatprep.mubr.msk.f32.mxu1 %vm627_vm2, %v3022_v45  ;;  %v5711_v45 = vpack.c.bf16 %v4674_v54, %v4673_v62  ;;  %v3383_v8 = vld [vmem:[#allocation2 + $0x39] sm:$0xff]  ;;  %v7325_v54 = vld [vmem:[#allocation4_spill] sm:$0xff] }
 0x1b6   : > { %v7326_v62 = vld [vmem:[#allocation5_spill] sm:$0xff] }
 0x1b8   : > { %5308 = vmatmul.mubr.msk.f32.vlgmr.msra.gmra.mrb[32].mxu0 %vm627_vm2, %v7324_v36  ;;  %5521 = vmatmul.mubr.msk.f32.gmra.mrb[30].mxu1 %vm627_vm2, %v3023_v30  ;;  %v3384_v36 = vld [vmem:[#allocation2 + $0x49] sm:$0xff]  ;;  %v3385_v30 = vld [vmem:[#allocation2 + $0x51] sm:$0xff] }
 0x1b9   : > { %5310 = vmatprep.mubr.msk.f32.mxu0 %vm627_vm2, %v6506_v40  ;;  %5531 = vmatprep.mubr.msk.f32.mxu1 %vm627_vm2, %v3382_v1  ;;  %v7327_v40 = vld [vmem:[#allocation6_spill] sm:$0xff] }
 0x1bc   : > { %5311 = vmatmul.mubr.msk.f32.gmra.mrb[34].mxu0 %vm627_vm2, %v6523_v46  ;;  %5532 = vmatmul.mubr.msk.f32.vlgmr.msra.gmra.mrb[0].mxu1 %vm627_vm2, %v3383_v8  ;;  %v7328_v46 = vld [vmem:[#allocation7_spill] sm:$0xff] }
 0x1bd   : > { %5710 = vmatpush3.bf16.msra.mxu1 %v6785_v56  ;;  %5313 = vmatprep.mubr.msk.f32.mxu0 %vm627_vm2, %v6533_v38  ;;  %v7329_v38 = vld [vmem:[#allocation8_spill] sm:$0xff] }
 0x1be   : > { %5534 = vmatprep.mubr.msk.f32.mxu1 %vm627_vm2, %v3384_v36  ;;  %5712 = vmatprep.subr.bf16.mxu1 %v5711_v45 }
 0x1c0   : > { %5314 = vmatmul.mubr.msk.f32.gmra.mrb[36].mxu0 %vm627_vm2, %v6542_v52  ;;  %5535 = vmatmul.mubr.msk.f32.gmra.mrb[2].mxu1 %vm627_vm2, %v3385_v30  ;;  %v7330_v52 = vld [vmem:[#allocation9_spill] sm:$0xff] }
 0x1c1   : > { %5316 = vmatprep.mubr.msk.f32.mxu0 %vm627_vm2, %v6551_v55  ;;  %5537 = vmatprep.mubr.msk.f32.mxu1 %vm627_vm2, %v7325_v54  ;;  %v7331_v55 = vld [vmem:[#allocation10_spill] sm:$0xff] }
 0x1c2   : > { %5714 = vmatpush3.bf16.msra.mxu1 %v5711_v45 }
 0x1c4   : > { %5317 = vmatmul.mubr.msk.f32.gmra.mrb[38].mxu0 %vm627_vm2, %v6559_v58  ;;  %5538 = vmatmul.mubr.msk.f32.gmra.mrb[4].mxu1 %vm627_vm2, %v7326_v62  ;;  %v7332_v58 = vld [vmem:[#allocation11_spill] sm:$0xff] }
 0x1c5   : > { %5319 = vmatprep.mubr.msk.f32.mxu0 %vm627_vm2, %v6567_v0  ;;  %5540 = vmatprep.mubr.msk.f32.mxu1 %vm627_vm2, %v7327_v40  ;;  %v7333_v0 = vld [vmem:[#allocation12_spill] sm:$0xff] }
 0x1c8   : > { %5320 = vmatmul.mubr.msk.f32.gmra.mrb[40].mxu0 %vm627_vm2, %v6575_v3  ;;  %5541 = vmatmul.mubr.msk.f32.gmra.mrb[6].mxu1 %vm627_vm2, %v7328_v46  ;;  %v7334_v3 = vld [vmem:[#allocation13_spill] sm:$0xff] }
 0x1c9   : > { %5322 = vmatprep.mubr.msk.f32.mxu0 %vm627_vm2, %v6583_v5  ;;  %5543 = vmatprep.mubr.msk.f32.mxu1 %vm627_vm2, %v7329_v38  ;;  %v7335_v5 = vld [vmem:[#allocation14_spill] sm:$0xff] }
 0x1cc   : > { %5323 = vmatmul.mubr.msk.f32.gmra.mrb[42].mxu0 %vm627_vm2, %v6591_v12  ;;  %5544 = vmatmul.mubr.msk.f32.gmra.mrb[8].mxu1 %vm627_vm2, %v7330_v52  ;;  %v7336_v12 = vld [vmem:[#allocation15_spill] sm:$0xff] }
 0x1cd   : > { %5325 = vmatprep.mubr.msk.f32.mxu0 %vm627_vm2, %v6599_v17  ;;  %5546 = vmatprep.mubr.msk.f32.mxu1 %vm627_vm2, %v7331_v55  ;;  %v7337_v17 = vld [vmem:[#allocation16_spill] sm:$0xff]  ;;  %v7140_v55 = vld [vmem:[%s7241_s4] ss:$0 sm:$0xff] }
 0x1d0   : > { %5326 = vmatmul.mubr.msk.f32.gmra.mrb[44].mxu0 %vm627_vm2, %v6607_v21  ;;  %5547 = vmatmul.mubr.msk.f32.gmra.mrb[10].mxu1 %vm627_vm2, %v7332_v58  ;;  %v7338_v21 = vld [vmem:[#allocation17_spill] sm:$0xff] }
 0x1d1   : > { %5328 = vmatprep.mubr.msk.f32.mxu0 %vm627_vm2, %v6615_v27  ;;  %5549 = vmatprep.mubr.msk.f32.mxu1 %vm627_vm2, %v7333_v0  ;;  %v7339_v27 = vld [vmem:[#allocation18_spill] sm:$0xff] }
 0x1d4   : > { %5329 = vmatmul.mubr.msk.f32.gmra.mrb[46].mxu0 %vm627_vm2, %v6623_v29  ;;  %5550 = vmatmul.mubr.msk.f32.gmra.mrb[12].mxu1 %vm627_vm2, %v7334_v3  ;;  %v7340_v29 = vld [vmem:[#allocation19_spill] sm:$0xff] }
 0x1d5   : > { %5331 = vmatprep.mubr.msk.f32.mxu0 %vm627_vm2, %v6631_v37  ;;  %5552 = vmatprep.mubr.msk.f32.mxu1 %vm627_vm2, %v7335_v5  ;;  %v7350_v37 = vld [vmem:[#allocation29_spill] sm:$0xff] }
 0x1d8   : > { %5332 = vmatmul.mubr.msk.f32.gmra.mrb[48].mxu0 %vm627_vm2, %v6639_v6  ;;  %5553 = vmatmul.mubr.msk.f32.gmra.mrb[14].mxu1 %vm627_vm2, %v7336_v12  ;;  %v3413_v6 = vld [vmem:[#allocation2 + $0x1a1] sm:$0xff] }
 0x1d9   : > { %5334 = vmatprep.mubr.msk.f32.mxu0 %vm627_vm2, %v6647_v25  ;;  %5555 = vmatprep.mubr.msk.f32.mxu1 %vm627_vm2, %v7337_v17  ;;  %v7341_v25 = vld [vmem:[#allocation20_spill] sm:$0xff] }
 0x1dc   : > { %5335 = vmatmul.mubr.msk.f32.gmra.mrb[50].mxu0 %vm627_vm2, %v6655_v19  ;;  %5556 = vmatmul.mubr.msk.f32.gmra.mrb[16].mxu1 %vm627_vm2, %v7338_v21  ;;  %v7342_v19 = vld [vmem:[#allocation21_spill] sm:$0xff] }
 0x1dd   : > { %5337 = vmatprep.mubr.msk.f32.mxu0 %vm627_vm2, %v6663_v63  ;;  %5558 = vmatprep.mubr.msk.f32.mxu1 %vm627_vm2, %v7339_v27  ;;  %v7343_v63 = vld [vmem:[#allocation22_spill] sm:$0xff] }
 0x1e0   : > { %5338 = vmatmul.mubr.msk.f32.gmra.mrb[52].mxu0 %vm627_vm2, %v6671_v11  ;;  %5559 = vmatmul.mubr.msk.f32.gmra.mrb[18].mxu1 %vm627_vm2, %v7340_v29  ;;  %v7344_v11 = vld [vmem:[#allocation23_spill] sm:$0xff] }
 0x1e1   : > { %5340 = vmatprep.mubr.msk.f32.mxu0 %vm627_vm2, %v6679_v61  ;;  %5561 = vmatprep.mubr.msk.f32.mxu1 %vm627_vm2, %v7341_v25  ;;  %v7345_v61 = vld [vmem:[#allocation24_spill] sm:$0xff] }
 0x1e4   : > { %5341 = vmatmul.mubr.msk.f32.gmra.mrb[54].mxu0 %vm627_vm2, %v6687_v51  ;;  %5562 = vmatmul.mubr.msk.f32.gmra.mrb[20].mxu1 %vm627_vm2, %v7342_v19  ;;  %v7346_v51 = vld [vmem:[#allocation25_spill] sm:$0xff] }
 0x1e5   : > { %5343 = vmatprep.mubr.msk.f32.mxu0 %vm627_vm2, %v6695_v43  ;;  %5564 = vmatprep.mubr.msk.f32.mxu1 %vm627_vm2, %v7343_v63  ;;  %v7347_v43 = vld [vmem:[#allocation26_spill] sm:$0xff] }
 0x1e8   : > { %5344 = vmatmul.mubr.msk.f32.gmra.mrb[56].mxu0 %vm627_vm2, %v6703_v34  ;;  %5565 = vmatmul.mubr.msk.f32.gmra.mrb[22].mxu1 %vm627_vm2, %v7344_v11  ;;  %v7348_v34 = vld [vmem:[#allocation27_spill] sm:$0xff] }
 0x1e9   : > { %5346 = vmatprep.mubr.msk.f32.mxu0 %vm627_vm2, %v6711_v26  ;;  %5567 = vmatprep.mubr.msk.f32.mxu1 %vm627_vm2, %v7345_v61  ;;  %v7349_v26 = vld [vmem:[#allocation28_spill] sm:$0xff] }
 0x1ec   : > { %5347 = vmatmul.mubr.msk.f32.gmra.mrb[58].mxu0 %vm627_vm2, %v6719_v18  ;;  %5568 = vmatmul.mubr.msk.f32.gmra.mrb[24].mxu1 %vm627_vm2, %v7346_v51  ;;  %v3412_v18 = vld [vmem:[#allocation2 + $0x199] sm:$0xff] }
 0x1ed   : > { %5349 = vmatprep.mubr.msk.f32.mxu0 %vm627_vm2, %v7318_v10  ;;  %5570 = vmatprep.mubr.msk.f32.mxu1 %vm627_vm2, %v7347_v43 }
 0x1f0   : > { %5350 = vmatmul.mubr.msk.f32.gmra.mrb[60].mxu0 %vm627_vm2, %v7320_v31  ;;  %5571 = vmatmul.mubr.msk.f32.gmra.mrb[26].mxu1 %vm627_vm2, %v7348_v34 }
 0x1f1   : > { %5352 = vmatprep.mubr.msk.f32.mxu0 %vm627_vm2, %v6888_v33  ;;  %5573 = vmatprep.mubr.msk.f32.mxu1 %vm627_vm2, %v7349_v26 }
 0x1f4   : > { %5353 = vmatmul.mubr.msk.f32.gmra.mrb[62].mxu0 %vm627_vm2, %v6894_v48  ;;  %5574 = vmatmul.mubr.msk.f32.gmra.mrb[28].mxu1 %vm627_vm2, %v7350_v37 }
 0x1f5   : > { %5576 = vmatprep.mubr.msk.f32.mxu1 %vm627_vm2, %v3412_v18 }
 0x1f8   : > { %5577 = vmatmul.mubr.msk.f32.gmra.mrb[30].mxu1 %vm627_vm2, %v3413_v6 }
 0x1f9   : > { %5587 = vmatprep.mubr.msk.f32.mxu1 %vm627_vm2, %v6517_v44 }
 0x1fc   : > { %5588 = vmatmul.mubr.msk.f32.vlgmr.msra.gmra.mrb[0].mxu1 %vm627_vm2, %v6525_v47 }
 0x1fd   : > { %5590 = vmatprep.mubr.msk.f32.mxu1 %vm627_vm2, %v6535_v50 }
 0x200   : > { %5591 = vmatmul.mubr.msk.f32.gmra.mrb[2].mxu1 %vm627_vm2, %v6544_v53 }
 0x201   : > { %5593 = vmatprep.mubr.msk.f32.mxu1 %vm627_vm2, %v6553_v57 }
 0x204   : > { %5594 = vmatmul.mubr.msk.f32.gmra.mrb[4].mxu1 %vm627_vm2, %v6561_v60 }
 0x205   : > { %5596 = vmatprep.mubr.msk.f32.mxu1 %vm627_vm2, %v6569_v2 }
 0x208   : > { %5597 = vmatmul.mubr.msk.f32.gmra.mrb[6].mxu1 %vm627_vm2, %v6577_v4 }
 0x209   : > { %5599 = vmatprep.mubr.msk.f32.mxu1 %vm627_vm2, %v6585_v9 }
 0x20c   : > { %5600 = vmatmul.mubr.msk.f32.gmra.mrb[8].mxu1 %vm627_vm2, %v6593_v13 }
 0x20d   : > { %5602 = vmatprep.mubr.msk.f32.mxu1 %vm627_vm2, %v6601_v20 }
 0x210   : > { %5603 = vmatmul.mubr.msk.f32.gmra.mrb[10].mxu1 %vm627_vm2, %v6609_v22 }
 0x211   : > { %5605 = vmatprep.mubr.msk.f32.mxu1 %vm627_vm2, %v6617_v28 }
 0x214   : > { %5606 = vmatmul.mubr.msk.f32.gmra.mrb[12].mxu1 %vm627_vm2, %v6625_v35 }
 0x215   : > { %5608 = vmatprep.mubr.msk.f32.mxu1 %vm627_vm2, %v6633_v39 }
 0x218   : > { %5609 = vmatmul.mubr.msk.f32.gmra.mrb[14].mxu1 %vm627_vm2, %v6641_v42 }
 0x219   : > { %5611 = vmatprep.mubr.msk.f32.mxu1 %vm627_vm2, %v6649_v23 }
 0x21c   : > { %5612 = vmatmul.mubr.msk.f32.gmra.mrb[16].mxu1 %vm627_vm2, %v6657_v15 }
 0x21d   : > { %5614 = vmatprep.mubr.msk.f32.mxu1 %vm627_vm2, %v6665_v14  ;;  %v7351_v14 = vld [vmem:[#allocation34_spill] sm:$0xff] }
 0x220   : > { %5615 = vmatmul.mubr.msk.f32.gmra.mrb[18].mxu1 %vm627_vm2, %v6673_v7  ;;  %v7352_v7 = vld [vmem:[#allocation36_spill] sm:$0xff] }
 0x221   : > { %5617 = vmatprep.mubr.msk.f32.mxu1 %vm627_vm2, %v6681_v59  ;;  %v7353_v59 = vld [vmem:[#allocation37_spill] sm:$0xff] }
 0x224   : > { %5618 = vmatmul.mubr.msk.f32.gmra.mrb[20].mxu1 %vm627_vm2, %v6689_v49  ;;  %v3802_v49 = vld [vmem:[#allocation2 + $0x19a] sm:$0xff] }
 0x225   : > { %5620 = vmatprep.mubr.msk.f32.mxu1 %vm627_vm2, %v6697_v41  ;;  %v7354_v41 = vld [vmem:[#allocation38_spill] sm:$0xff] }
 0x228   : > { %5621 = vmatmul.mubr.msk.f32.gmra.mrb[22].mxu1 %vm627_vm2, %v6705_v32  ;;  %v3803_v32 = vld [vmem:[#allocation2 + $0x1a2] sm:$0xff] }
 0x229   : > { %5623 = vmatprep.mubr.msk.f32.mxu1 %vm627_vm2, %v6713_v24 }
 0x22c   : > { %5624 = vmatmul.mubr.msk.f32.gmra.mrb[24].mxu1 %vm627_vm2, %v7319_v16 }
 0x22d   : > { %5626 = vmatprep.mubr.msk.f32.mxu1 %vm627_vm2, %v7351_v14 }
 0x230   : > { %5627 = vmatmul.mubr.msk.f32.gmra.mrb[26].mxu1 %vm627_vm2, %v7352_v7 }
 0x231   : > { %5629 = vmatprep.mubr.msk.f32.mxu1 %vm627_vm2, %v7353_v59 }
 0x234   : > { %5630 = vmatmul.mubr.msk.f32.gmra.mrb[28].mxu1 %vm627_vm2, %v7354_v41 }
 0x235   : > { %5632 = vmatprep.mubr.msk.f32.mxu1 %vm627_vm2, %v3802_v49 }
 0x238   : > { %5633 = vmatmul.mubr.msk.f32.gmra.mrb[30].mxu1 %vm627_vm2, %v3803_v32 }
 0x28b   : > { %v5309_v24 = vpop.f32.mrb[32].mxu0 }
 0x28c   : > { %v2020_v15 = vpop.f32.mrb[33].mxu0 }
 0x28f   : > { %v5312_v23 = vpop.f32.mrb[34].mxu0 }
 0x290   : > { %v2030_v44 = vpop.f32.mrb[35].mxu0 }
 0x293   : > { %v5315_v47 = vpop.f32.mrb[36].mxu0 }
 0x294   : > { %v2040_v50 = vpop.f32.mrb[37].mxu0 }
 0x297   : > { %v5318_v53 = vpop.f32.mrb[38].mxu0 }
 0x298   : > { %v2050_v57 = vpop.f32.mrb[39].mxu0 }
 0x29b   : > { %v5321_v60 = vpop.f32.mrb[40].mxu0 }
 0x29c   : > { %v2060_v2 = vpop.f32.mrb[41].mxu0 }
 0x29f   : > { %v7093_v4 = vpop.f32.mrb[42].mxu0 }
 0x2a0   : > { %v7095_v9 = vpop.f32.mrb[43].mxu0 }
 0x2a3   : > { %v7097_v13 = vpop.f32.mrb[44].mxu0 }
 0x2a4   : > { %v7099_v20 = vpop.f32.mrb[45].mxu0 }
 0x2a7   : > { %v7101_v22 = vpop.f32.mrb[46].mxu0 }
 0x2a8   : > { %v7103_v28 = vpop.f32.mrb[47].mxu0 }
 0x2ab   : > { %v7105_v35 = vpop.f32.mrb[48].mxu0 }
 0x2ac   : > { %v7107_v39 = vpop.f32.mrb[49].mxu0 }
 0x2af   : > { %v7109_v42 = vpop.f32.mrb[50].mxu0 }
 0x2b0   : > { %v7111_v56 = vpop.f32.mrb[51].mxu0 }
 0x2b3   : > { %v7113_v10 = vpop.f32.mrb[52].mxu0 }
 0x2b4   : > { %v7115_v16 = vpop.f32.mrb[53].mxu0 }
 0x2b7   : > { %v7117_v31 = vpop.f32.mrb[54].mxu0 }
 0x2b8   : > { %v7119_v33 = vpop.f32.mrb[55].mxu0 }
 0x2bb   : > { %v7121_v48 = vpop.f32.mrb[56].mxu0 }
 0x2bc   : > { %v7123_v1 = vpop.f32.mrb[57].mxu0 }
 0x2bf   : > { %v7125_v45 = vpop.f32.mrb[58].mxu0 }
 0x2c0   : > { %v7127_v8 = vpop.f32.mrb[59].mxu0 }
 0x2c3   : > { %v7129_v36 = vpop.f32.mrb[60].mxu0 }
 0x2c4   : > { %v7131_v30 = vpop.f32.mrb[61].mxu0 }
 0x2c7   : > { %v7133_v54 = vpop.f32.mrb[62].mxu0 }
 0x2c8   : > { %v7135_v62 = vpop.f32.mrb[63].mxu0 }
 0x2cf   : > { %v5589_v40 = vpop.f32.mrb[0].mxu1 }
 0x2d0   : > { %v5715_v46 = vadd.f32 %v5589_v40, %v5309_v24  ;;  %v3971_v38 = vpop.f32.mrb[1].mxu1 }
 0x2d1   : > { %v5716_v52 = vadd.f32 %v3971_v38, %v2020_v15 }
 0x2d2   : > { %v4170_v12 = vadd.f32 %v5715_v46, %v7140_v55 }
 0x2d3   : > { %v5592_v58 = vpop.f32.mrb[2].mxu1  ;;  %v4169_v21 = vadd.f32 %v5716_v52, %v7140_v55 }
 0x2d4   : > { %v5717_v0 = vadd.f32 %v5592_v58, %v5312_v23  ;;  %v3981_v3 = vpop.f32.mrb[3].mxu1 }
 0x2d5   : > { %v5718_v5 = vadd.f32 %v3981_v3, %v2030_v44 }
 0x2d6   : > { %v4172_v17 = vadd.f32 %v5717_v0, %v7140_v55 }
 0x2d7   : > { %v4171_v27 = vadd.f32 %v5718_v5, %v7140_v55  ;;  %v5595_v29 = vpop.f32.mrb[4].mxu1 }
 0x2d8   : > { %v4202_v25 = vmax.f32 %v4170_v12, %v4172_v17  ;;  %v5719_v19 = vadd.f32 %v5595_v29, %v5315_v47  ;;  %v3991_v63 = vpop.f32.mrb[5].mxu1 }
 0x2d9   : > { %v4201_v11 = vmax.f32 %v4169_v21, %v4171_v27  ;;  %v5720_v61 = vadd.f32 %v3991_v63, %v2040_v50 }
 0x2da   : > { %4219 = vst.msk [vmem:[#allocation3 + $0x8] sm:$0xff] %vm4217_vm4, %v4202_v25  ;;  %v4174_v18 = vadd.f32 %v5719_v19, %v7140_v55 }
 0x2db   : > { %4218 = vst.msk [vmem:[#allocation3] sm:$0xff] %vm4217_vm4, %v4201_v11  ;;  %v5598_v51 = vpop.f32.mrb[6].mxu1  ;;  %v4173_v6 = vadd.f32 %v5720_v61, %v7140_v55 }
 0x2dc   : > { %v5721_v43 = vadd.f32 %v5598_v51, %v5318_v53  ;;  %v4001_v34 = vpop.f32.mrb[7].mxu1 }
 0x2dd   : > { %v5722_v26 = vadd.f32 %v4001_v34, %v2050_v57 }
 0x2de   : > { %v4176_v37 = vadd.f32 %v5721_v43, %v7140_v55 }
 0x2df   : > { %v4175_v14 = vadd.f32 %v5722_v26, %v7140_v55  ;;  %v5601_v7 = vpop.f32.mrb[8].mxu1 }
 0x2e0   : > { %v4204_v59 = vmax.f32 %v4174_v18, %v4176_v37  ;;  %v5723_v49 = vadd.f32 %v5601_v7, %v5321_v60  ;;  %v4011_v41 = vpop.f32.mrb[9].mxu1 }
 0x2e1   : > { %v4203_v32 = vmax.f32 %v4173_v6, %v4175_v14  ;;  %v5724_v24 = vadd.f32 %v4011_v41, %v2060_v2 }
 0x2e2   : > { %v4234_v15 = vld [vmem:[#allocation3] ss:$2 sm:$0xff]  ;;  %v4250_v23 = vld [vmem:[#allocation3 + $0x1] ss:$2 sm:$0xff]  ;;  %4221 = vst.msk [vmem:[#allocation3 + $0x18] sm:$0xff] %vm4217_vm4, %v4204_v59  ;;  %v4178_v2 = vadd.f32 %v5723_v49, %v7140_v55 }
 0x2e3   : > { %v4265_v44 = vmax.f32 %v4234_v15, %v4250_v23  ;;  %4220 = vst.msk [vmem:[#allocation3 + $0x10] sm:$0xff] %vm4217_vm4, %v4203_v32  ;;  %v5604_v47 = vpop.f32.mrb[10].mxu1  ;;  %v4177_v46 = vadd.f32 %v5724_v24, %v7140_v55 }
 0x2e4   : > { %v5725_v50 = vadd.f32 %v5604_v47, %v7093_v4  ;;  %v4021_v53 = vpop.f32.mrb[11].mxu1 }
 0x2e5   : > { %v4273_v57 = vmax.f32 %v4265_v44, 0.0  ;;  %v5726_v60 = vadd.f32 %v4021_v53, %v7095_v9 }
 0x2e6   : > { %v4180_v40 = vadd.f32 %v5725_v50, %v7140_v55 }
 0x2e7   : > { %4281 = vst.msk [vmem:[%s7158_s21] sm:$0xff] %vm4217_vm4, %v4273_v57  ;;  %v4179_v38 = vadd.f32 %v5726_v60, %v7140_v55  ;;  %v5607_v52 = vpop.f32.mrb[12].mxu1 }
 0x2e8   : > { %v4206_v58 = vmax.f32 %v4178_v2, %v4180_v40  ;;  %v5727_v0 = vadd.f32 %v5607_v52, %v7097_v13  ;;  %v4031_v4 = vpop.f32.mrb[13].mxu1 }
 0x2e9   : > { %v4205_v3 = vmax.f32 %v4177_v46, %v4179_v38  ;;  %v5728_v5 = vadd.f32 %v4031_v4, %v7099_v20 }
 0x2ea   : > { %v4236_v9 = vld [vmem:[#allocation3 + $0x10] ss:$2 sm:$0xff]  ;;  %v4252_v12 = vld [vmem:[#allocation3 + $0x11] ss:$2 sm:$0xff]  ;;  %4223 = vst.msk [vmem:[#allocation3 + $0x28] sm:$0xff] %vm4217_vm4, %v4206_v58  ;;  %v4182_v13 = vadd.f32 %v5727_v0, %v7140_v55 }
 0x2eb   : > { %v4266_v17 = vmax.f32 %v4236_v9, %v4252_v12  ;;  %4222 = vst.msk [vmem:[#allocation3 + $0x20] sm:$0xff] %vm4217_vm4, %v4205_v3  ;;  %v5610_v21 = vpop.f32.mrb[14].mxu1  ;;  %v4181_v20 = vadd.f32 %v5728_v5, %v7140_v55 }
 0x2ec   : > { %v5729_v27 = vadd.f32 %v5610_v21, %v7101_v22  ;;  %v4041_v29 = vpop.f32.mrb[15].mxu1 }
 0x2ed   : > { %v4274_v25 = vmax.f32 %v4266_v17, 0.0  ;;  %v5730_v19 = vadd.f32 %v4041_v29, %v7103_v28 }
 0x2ee   : > { %v4184_v63 = vadd.f32 %v5729_v27, %v7140_v55 }
 0x2ef   : > { %4282 = vst.msk [vmem:[%s7158_s21 + $0x8] sm:$0xff] %vm4217_vm4, %v4274_v25  ;;  %v4183_v11 = vadd.f32 %v5730_v19, %v7140_v55  ;;  %v5613_v61 = vpop.f32.mrb[16].mxu1 }
 0x2f0   : > { %v4208_v51 = vmax.f32 %v4182_v13, %v4184_v63  ;;  %v5731_v43 = vadd.f32 %v5613_v61, %v7105_v35  ;;  %v4051_v22 = vpop.f32.mrb[17].mxu1 }
 0x2f1   : > { %v4207_v34 = vmax.f32 %v4181_v20, %v4183_v11  ;;  %v5732_v26 = vadd.f32 %v4051_v22, %v7107_v39 }
 0x2f2   : > { %v4238_v28 = vld [vmem:[#allocation3 + $0x20] ss:$2 sm:$0xff]  ;;  %v4254_v18 = vld [vmem:[#allocation3 + $0x21] ss:$2 sm:$0xff]  ;;  %4225 = vst.msk [vmem:[#allocation3 + $0x38] sm:$0xff] %vm4217_vm4, %v4208_v51  ;;  %v4186_v35 = vadd.f32 %v5731_v43, %v7140_v55 }
 0x2f3   : > { %v4267_v37 = vmax.f32 %v4238_v28, %v4254_v18  ;;  %4224 = vst.msk [vmem:[#allocation3 + $0x30] sm:$0xff] %vm4217_vm4, %v4207_v34  ;;  %v5616_v6 = vpop.f32.mrb[18].mxu1  ;;  %v4185_v39 = vadd.f32 %v5732_v26, %v7140_v55 }
 0x2f4   : > { %v5733_v14 = vadd.f32 %v5616_v6, %v7109_v42  ;;  %v4061_v7 = vpop.f32.mrb[19].mxu1 }
 0x2f5   : > { %v4275_v59 = vmax.f32 %v4267_v37, 0.0  ;;  %v5734_v49 = vadd.f32 %v4061_v7, %v7111_v56 }
 0x2f6   : > { %v4188_v41 = vadd.f32 %v5733_v14, %v7140_v55 }
 0x2f7   : > { %4283 = vst.msk [vmem:[%s7158_s21 + $0x10] sm:$0xff] %vm4217_vm4, %v4275_v59  ;;  %v4187_v32 = vadd.f32 %v5734_v49, %v7140_v55  ;;  %v5619_v24 = vpop.f32.mrb[20].mxu1 }
 0x2f8   : > { %v4210_v15 = vmax.f32 %v4186_v35, %v4188_v41  ;;  %v5735_v23 = vadd.f32 %v5619_v24, %v7113_v10  ;;  %v4071_v42 = vpop.f32.mrb[21].mxu1 }
 0x2f9   : > { %v4209_v44 = vmax.f32 %v4185_v39, %v4187_v32  ;;  %v5736_v47 = vadd.f32 %v4071_v42, %v7115_v16 }
 0x2fa   : > { %v4240_v56 = vld [vmem:[#allocation3 + $0x30] ss:$2 sm:$0xff]  ;;  %v4256_v50 = vld [vmem:[#allocation3 + $0x31] ss:$2 sm:$0xff]  ;;  %4227 = vst.msk [vmem:[#allocation3 + $0x48] sm:$0xff] %vm4217_vm4, %v4210_v15  ;;  %v4190_v10 = vadd.f32 %v5735_v23, %v7140_v55 }
 0x2fb   : > { %v4268_v53 = vmax.f32 %v4240_v56, %v4256_v50  ;;  %4226 = vst.msk [vmem:[#allocation3 + $0x40] sm:$0xff] %vm4217_vm4, %v4209_v44  ;;  %v5622_v57 = vpop.f32.mrb[22].mxu1  ;;  %v4189_v16 = vadd.f32 %v5736_v47, %v7140_v55 }
 0x2fc   : > { %v5737_v60 = vadd.f32 %v5622_v57, %v7117_v31  ;;  %v4081_v2 = vpop.f32.mrb[23].mxu1 }
 0x2fd   : > { %v4276_v40 = vmax.f32 %v4268_v53, 0.0  ;;  %v5738_v46 = vadd.f32 %v4081_v2, %v7119_v33 }
 0x2fe   : > { %v4192_v38 = vadd.f32 %v5737_v60, %v7140_v55 }
 0x2ff   : > { %4284 = vst.msk [vmem:[%s7158_s21 + $0x18] sm:$0xff] %vm4217_vm4, %v4276_v40  ;;  %v4191_v52 = vadd.f32 %v5738_v46, %v7140_v55  ;;  %v5625_v58 = vpop.f32.mrb[24].mxu1 }
 0x300   : > { %v4212_v0 = vmax.f32 %v4190_v10, %v4192_v38  ;;  %v5739_v4 = vadd.f32 %v5625_v58, %v7121_v48  ;;  %v4091_v31 = vpop.f32.mrb[25].mxu1 }
 0x301   : > { %v4211_v3 = vmax.f32 %v4189_v16, %v4191_v52  ;;  %v5740_v5 = vadd.f32 %v4091_v31, %v7123_v1 }
 0x302   : > { %v4242_v33 = vld [vmem:[#allocation3 + $0x40] ss:$2 sm:$0xff]  ;;  %v4258_v9 = vld [vmem:[#allocation3 + $0x41] ss:$2 sm:$0xff]  ;;  %4229 = vst.msk [vmem:[#allocation3 + $0x58] sm:$0xff] %vm4217_vm4, %v4212_v0  ;;  %v4194_v48 = vadd.f32 %v5739_v4, %v7140_v55 }
 0x303   : > { %v4269_v12 = vmax.f32 %v4242_v33, %v4258_v9  ;;  %4228 = vst.msk [vmem:[#allocation3 + $0x50] sm:$0xff] %vm4217_vm4, %v4211_v3  ;;  %v5628_v17 = vpop.f32.mrb[26].mxu1  ;;  %v4193_v1 = vadd.f32 %v5740_v5, %v7140_v55 }
 0x304   : > { %v5741_v21 = vadd.f32 %v5628_v17, %v7125_v45  ;;  %v4101_v27 = vpop.f32.mrb[27].mxu1 }
 0x305   : > { %v4277_v29 = vmax.f32 %v4269_v12, 0.0  ;;  %v5742_v25 = vadd.f32 %v4101_v27, %v7127_v8 }
 0x306   : > { %v4196_v19 = vadd.f32 %v5741_v21, %v7140_v55 }
 0x307   : > { %4285 = vst.msk [vmem:[%s7158_s21 + $0x20] sm:$0xff] %vm4217_vm4, %v4277_v29  ;;  %v4195_v13 = vadd.f32 %v5742_v25, %v7140_v55  ;;  %v5631_v63 = vpop.f32.mrb[28].mxu1 }
 0x308   : > { %v4214_v20 = vmax.f32 %v4194_v48, %v4196_v19  ;;  %v5743_v11 = vadd.f32 %v5631_v63, %v7129_v36  ;;  %v4111_v45 = vpop.f32.mrb[29].mxu1 }
 0x309   : > { %v4213_v61 = vmax.f32 %v4193_v1, %v4195_v13  ;;  %v5744_v51 = vadd.f32 %v4111_v45, %v7131_v30 }
 0x30a   : > { %v4244_v8 = vld [vmem:[#allocation3 + $0x50] ss:$2 sm:$0xff]  ;;  %v4260_v43 = vld [vmem:[#allocation3 + $0x51] ss:$2 sm:$0xff]  ;;  %4231 = vst.msk [vmem:[#allocation3 + $0x68] sm:$0xff] %vm4217_vm4, %v4214_v20  ;;  %v4198_v37 = vadd.f32 %v5743_v11, %v7140_v55 }
 0x30b   : > { %v4270_v22 = vmax.f32 %v4244_v8, %v4260_v43  ;;  %4230 = vst.msk [vmem:[#allocation3 + $0x60] sm:$0xff] %vm4217_vm4, %v4213_v61  ;;  %v5634_v34 = vpop.f32.mrb[30].mxu1  ;;  %v4197_v30 = vadd.f32 %v5744_v51, %v7140_v55 }
 0x30c   : > { %v5745_v26 = vadd.f32 %v5634_v34, %v7133_v54  ;;  %v4121_v28 = vpop.f32.mrb[31].mxu1 }
 0x30d   : > { %v4278_v18 = vmax.f32 %v4270_v22, 0.0  ;;  %v5746_v36 = vadd.f32 %v4121_v28, %v7135_v62 }
 0x30e   : > { %v4200_v6 = vadd.f32 %v5745_v26, %v7140_v55 }
 0x30f   : > { %4286 = vst.msk [vmem:[%s7158_s21 + $0x28] sm:$0xff] %vm4217_vm4, %v4278_v18  ;;  %v4199_v14 = vadd.f32 %v5746_v36, %v7140_v55 }
 0x310   : > { %v4216_v7 = vmax.f32 %v4198_v37, %v4200_v6 }
 0x311   : > { %v4215_v59 = vmax.f32 %v4197_v30, %v4199_v14 }
 0x312   : > { %v4246_v49 = vld [vmem:[#allocation3 + $0x60] ss:$2 sm:$0xff]  ;;  %v4262_v54 = vld [vmem:[#allocation3 + $0x61] ss:$2 sm:$0xff]  ;;  %4233 = vst.msk [vmem:[#allocation3 + $0x78] sm:$0xff] %vm4217_vm4, %v4216_v7 }
 0x313   : > { %v4271_v35 = vmax.f32 %v4246_v49, %v4262_v54  ;;  %4232 = vst.msk [vmem:[#allocation3 + $0x70] sm:$0xff] %vm4217_vm4, %v4215_v59 }
 0x315   : > { %v4279_v62 = vmax.f32 %v4271_v35, 0.0 }
 0x317   : > { %4287 = vst.msk [vmem:[%s7158_s21 + $0x30] sm:$0xff] %vm4217_vm4, %v4279_v62 }
 0x31a   : > { %v4248_v41 = vld [vmem:[#allocation3 + $0x70] ss:$2 sm:$0xff]  ;;  %v4264_v39 = vld [vmem:[#allocation3 + $0x71] ss:$2 sm:$0xff] }
 0x31b   : > { %v4272_v32 = vmax.f32 %v4248_v41, %v4264_v39 }
 0x31d   : > { %v4280_v24 = vmax.f32 %v4272_v32, 0.0 }
 0x31f   : > { %4288 = vst.msk [vmem:[%s7158_s21 + $0x38] sm:$0xff] %vm4217_vm4, %v4280_v24 }
 0x320 PF: > { %s15_s18 = sadd.s32 1, %s5986_s18  }
 0x321   : > { %p12_p4 = scmp.ge.s32.totalorder %s15_s18, 4  }
 0x323   :  { %14 = sbr.rel (!%p12_p4) target bundleno = 1 (0x1), region = 95 }

</bundles_post_ra>
